<compile_context>
chip_gen: v6e
topology: v6e:2x2x1
jax: 0.10.0
libtpu: 0.0.40
codegen_flags: <defaults>
</compile_context>

<pallas_src>
import functools

import jax
import jax.numpy as jnp
from jax.experimental import pallas as pl
from jax.experimental.pallas import tpu as pltpu


def _round_up(x, m):
    return ((x + m - 1) // m) * m


def _slab_layout(V_pad, E_pad, H):
    """Row layout of the two packed parameter slabs (order == concatenation order)."""
    H2 = 2 * H

    def offs(rows):
        out, r = [], 0
        for name, n in rows:
            out.append((name, r, n))
            r += n
        return out, r

    l128, n128 = offs((('emb', V_pad), ('fc1_w', E_pad), ('fc1_b', 8), ('whh1f', H),
                       ('hw1', H2), ('hb1', 8), ('hw2', 128), ('hb2', 8)))
    l256, n256 = offs((('wih0', E_pad), ('b0', 8), ('whh0', H2), ('wih1', H2), ('b1', 8)))
    return l128, n128, l256, n256


# ------------------------------ fused forward kernel ------------------------------
def _fused_forward_kernel(idx_ref,            # (T*B, 1) int32, time-major (row = t*B + b)
                          w128_ref,           # packed slab, lane width 128
                          w256_ref,           # packed slab, lane width 256 (= 8H)
                          out_ref,            # (B, C)
                          x1_ref,             # VMEM scratch (T*B, 2H): layer-0 outputs
                          *, T, B, H, C, V_pad, E_pad, off128, off256):
    f32 = jnp.float32
    H2, H4 = 2 * H, 4 * H
    TB = T * B

    def mm(a, b):
        return jnp.dot(a, b, preferred_element_type=f32)

    def sl128(name):
        r, n = off128[name]
        return w128_ref[r:r + n, :]

    def row128(name):
        r, _ = off128[name]
        return w128_ref[r:r + 1, :]

    def sl256(name):
        r, n = off256[name]
        return w256_ref[r:r + n, :]

    def row256(name):
        r, _ = off256[name]
        return w256_ref[r:r + 1, :]

    def cell(gates, c_prev):
        # PyTorch gate order i, f, g, o; sigmoid over the full 4H lanes, tanh on the g lanes.
        s = jax.nn.sigmoid(gates)
        i = s[:, 0 * H:1 * H]
        f = s[:, 1 * H:2 * H]
        o = s[:, 3 * H:4 * H]
        g = jnp.tanh(gates[:, 2 * H:3 * H])
        c = f * c_prev + i * g
        h = o * jnp.tanh(c)
        return h, c

    # ---- embedding gather via one-hot MXU matmul (exact row selection) ----
    idx = idx_ref[...]                                                   # (TB, 1) int32
    iota = jax.lax.broadcasted_iota(jnp.int32, (TB, V_pad), 1)
    onehot = (iota == idx).astype(f32)                                   # (TB, V_pad)
    emb = mm(onehot, sl128('emb'))                                       # (TB, E_pad)

    # ---- fc1: Linear + ReLU (padded lanes stay exactly zero) ----
    x = jnp.maximum(mm(emb, sl128('fc1_w')) + row128('fc1_b'), 0.0)      # (TB, E_pad)

    # ---- LSTM layer 0: both directions fused into one T-step recurrence ----
    gx = mm(x, sl256('wih0')) + row256('b0')                             # (TB, 8H)
    gxF = gx[:, :H4]                                                     # fwd gate inputs
    gxB = gx[:, H4:]                                                     # bwd gate inputs
    whh0 = sl256('whh0')                                                 # (2H, 8H) block-diag

    zz = jnp.zeros((B, H), f32)
    h_f, h_b, c_f, c_b = zz, zz, zz, zz
    for s in range(T):                                                   # fully unrolled
        tb = T - 1 - s                                                   # bwd time index
        rec = mm(jnp.concatenate([h_f, h_b], axis=-1), whh0)             # one MXU push/step
        h_f, c_f = cell(gxF[s * B:(s + 1) * B, :] + rec[:, :H4], c_f)
        h_b, c_b = cell(gxB[tb * B:(tb + 1) * B, :] + rec[:, H4:], c_b)
        x1_ref[s * B:(s + 1) * B, 0:H] = h_f                             # time-major staging
        x1_ref[tb * B:(tb + 1) * B, H:H2] = h_b

    x1 = x1_ref[...]                                                     # (TB, 2H)

    # ---- LSTM layer 1 (final layer): classifier only needs time step T-1 ----
    gx1 = mm(x1, sl256('wih1')) + row256('b1')                           # (TB, 8H)
    gx1f = gx1[:, :H4]
    whh1 = sl128('whh1f')                                                # (H, 4H=128)
    h, c = zz, zz
    for s in range(T):
        h, c = cell(gx1f[s * B:(s + 1) * B, :] + mm(h, whh1), c)
    # Backward direction at original time T-1 is its FIRST processed step (h0=c0=0),
    # so the recurrent W_hh term vanishes: one projected row is enough.
    hb_last, _ = cell(gx1[(T - 1) * B:TB, H4:], zz)                      # (B, H)

    # ---- classifier head: Linear + ReLU + Linear + Sigmoid ----
    last = jnp.concatenate([h, hb_last], axis=-1)                        # (B, 2H)
    hid = jnp.maximum(mm(last, sl128('hw1')) + row128('hb1'), 0.0)       # (B, 128), cols>=H are 0
    logits = mm(hid, sl128('hw2')) + row128('hb2')                       # (B, 128)
    out_ref[...] = jax.nn.sigmoid(logits[:, :C])


# ----------------------------------- wrapper -----------------------------------
@functools.partial(jax.jit, static_argnames=('vocab', 'E', 'H', 'C'))
def forward(indices, prep, *, vocab, E, H, C):
    B, T = indices.shape
    TB = T * B
    V_pad = _round_up(vocab, 128)
    E_pad = _round_up(E, 128)
    l128, n128, l256, n256 = _slab_layout(V_pad, E_pad, H)
    off128 = {name: (r, n) for name, r, n in l128}
    off256 = {name: (r, n) for name, r, n in l256}

    # indices in time-major flattened order (row = t*B + b); 64 bytes of glue.
    flat_idx = indices.T.reshape(TB, 1).astype(jnp.int32)

    kernel = functools.partial(_fused_forward_kernel, T=T, B=B, H=H, C=C,
                               V_pad=V_pad, E_pad=E_pad, off128=off128, off256=off256)

    n_flops = 2 * (TB * V_pad * E_pad          # one-hot embedding gather
                   + TB * E_pad * E_pad        # fc1
                   + TB * E_pad * 8 * H        # layer-0 input projection
                   + T * B * 2 * H * 8 * H     # layer-0 fused recurrence
                   + TB * 2 * H * 8 * H        # layer-1 input projection
                   + T * B * H * 4 * H         # layer-1 recurrence
                   + B * 2 * H * 128           # head fc
                   + B * 128 * 128)            # head out
    n_trans = TB * 18 * H + B * 6 * H + B * C
    n_bytes = 4 * (prep['slab128'].size + prep['slab256'].size + TB + B * C)

    vmem = pl.BlockSpec(memory_space=pltpu.MemorySpace.VMEM)
    return pl.pallas_call(
        kernel,
        out_shape=jax.ShapeDtypeStruct((B, C), jnp.float32),
        in_specs=[vmem, vmem, vmem],
        out_specs=vmem,
        scratch_shapes=[pltpu.VMEM((TB, 2 * H), jnp.float32)],
        cost_estimate=pl.CostEstimate(flops=n_flops, transcendentals=n_trans,
                                      bytes_accessed=n_bytes),
    )(flat_idx, prep['slab128'], prep['slab256'])


def prepare_params(params):
    """One-time parameter prep (outside the hot path): transpose to [in,out], pre-sum the two
    LSTM biases, zero-pad to lane-dense widths, build the fused/block-diag layer-0 weights and
    pack everything into two contiguous slabs."""
    f32 = jnp.float32
    emb = jnp.asarray(params['emb'], f32)
    vocab, E = emb.shape
    lp0, lp1 = params['lstm']
    H = lp0['w_hh_f'].shape[1]
    assert H % 8 == 0 and 4 * H == 128, "slab packing assumes hidden_size=32 (4H==128)"
    H2, H4, H8 = 2 * H, 4 * H, 8 * H
    V_pad = _round_up(vocab, 128)
    E_pad = _round_up(E, 128)
    l128, n128, l256, n256 = _slab_layout(V_pad, E_pad, H)

    def pad2(a, rows, cols):
        a = jnp.asarray(a, f32)
        if a.ndim == 1:
            a = a[None, :]
        out = jnp.zeros((rows, cols), f32)
        return out.at[:a.shape[0], :a.shape[1]].set(a)

    blocks128 = {
        'emb':   pad2(emb, V_pad, E_pad),
        'fc1_w': pad2(jnp.asarray(params['fc1_w'], f32).T, E_pad, E_pad),
        'fc1_b': pad2(params['fc1_b'], 8, E_pad),
        'whh1f': pad2(jnp.asarray(lp1['w_hh_f'], f32).T, H, 128),
        'hw1':   pad2(jnp.asarray(params['fc2_w1'], f32).T, H2, 128),
        'hb1':   pad2(params['fc2_b1'], 8, 128),
        'hw2':   pad2(jnp.asarray(params['fc2_w2'], f32).T, 128, 128),
        'hb2':   pad2(params['fc2_b2'], 8, 128),
    }
    # Layer-0 fused weights: direction-major gate columns [4H fwd | 4H bwd].
    whh0 = jnp.zeros((H2, H8), f32)
    whh0 = whh0.at[:H, :H4].set(jnp.asarray(lp0['w_hh_f'], f32).T)       # block-diagonal
    whh0 = whh0.at[H:, H4:].set(jnp.asarray(lp0['w_hh_b'], f32).T)
    blocks256 = {
        'wih0': jnp.concatenate([pad2(jnp.asarray(lp0['w_ih_f'], f32).T, E_pad, H4),
                                 pad2(jnp.asarray(lp0['w_ih_b'], f32).T, E_pad, H4)], axis=1),
        'b0':   pad2(jnp.concatenate([lp0['b_ih_f'] + lp0['b_hh_f'],
                                      lp0['b_ih_b'] + lp0['b_hh_b']]), 8, H8),
        'whh0': whh0,
        'wih1': jnp.concatenate([jnp.asarray(lp1['w_ih_f'], f32).T,
                                 jnp.asarray(lp1['w_ih_b'], f32).T], axis=1),
        'b1':   pad2(jnp.concatenate([lp1['b_ih_f'] + lp1['b_hh_f'],
                                      lp1['b_ih_b'] + lp1['b_hh_b']]), 8, H8),
    }
    slab128 = jnp.concatenate([blocks128[name] for name, _, _ in l128], axis=0)
    slab256 = jnp.concatenate([blocks256[name] for name, _, _ in l256], axis=0)
    assert slab128.shape == (n128, 128) and slab256.shape == (n256, H8)
    return {'slab128': slab128, 'slab256': slab256}


# ------------------------------ pure-JAX reference ------------------------------
def _ref_lstm_dir(x, w_ih, w_hh, b, H):
    B, T, _ = x.shape
    h = jnp.zeros((B, H), jnp.float32)
    c = jnp.zeros((B, H), jnp.float32)
    ys = []
    for t in range(T):
        gates = x[:, t] @ w_ih.T + h @ w_hh.T + b
        i = jax.nn.sigmoid(gates[:, :H])
        f = jax.nn.sigmoid(gates[:, H:2 * H])
        g = jnp.tanh(gates[:, 2 * H:3 * H])
        o = jax.nn.sigmoid(gates[:, 3 * H:])
        c = f * c + i * g
        h = o * jnp.tanh(c)
        ys.append(h)
    return jnp.stack(ys, axis=1)


def ref_forward(indices, params, H, L):
    emb = params['emb'][indices]
    x = jnp.maximum(emb @ params['fc1_w'].T + params['fc1_b'], 0.0)
    out = x
    for l in range(L):
        lp = params['lstm'][l]
        y_f = _ref_lstm_dir(out, lp['w_ih_f'], lp['w_hh_f'],
                            lp['b_ih_f'] + lp['b_hh_f'], H)
        y_b = _ref_lstm_dir(out[:, ::-1], lp['w_ih_b'], lp['w_hh_b'],
                            lp['b_ih_b'] + lp['b_hh_b'], H)[:, ::-1]
        out = jnp.concatenate([y_f, y_b], axis=-1)
    last = out[:, -1, :]
    h1 = jnp.maximum(last @ params['fc2_w1'].T + params['fc2_b1'], 0.0)
    return jax.nn.sigmoid(h1 @ params['fc2_w2'].T + params['fc2_b2'])


# --------------------------------- parameter init ---------------------------------
def init_params(key, vocab, E, H, L, C):
    keys = iter(jax.random.split(key, 8 + 8 * L))

    def u(shape, scale=0.1):
        return jax.random.uniform(next(keys), shape, jnp.float32, -scale, scale)

    params = {
        'emb': u((vocab, E), 1.0),
        'fc1_w': u((E, E)), 'fc1_b': u((E,)),
        'fc2_w1': u((H, 2 * H)), 'fc2_b1': u((H,)),
        'fc2_w2': u((C, H)), 'fc2_b2': u((C,)),
        'lstm': [],
    }
    for l in range(L):
        Din = E if l == 0 else 2 * H
        params['lstm'].append({
            'w_ih_f': u((4 * H, Din)), 'w_hh_f': u((4 * H, H)),
            'b_ih_f': u((4 * H,)), 'b_hh_f': u((4 * H,)),
            'w_ih_b': u((4 * H, Din)), 'w_hh_b': u((4 * H, H)),
            'b_ih_b': u((4 * H,)), 'b_hh_b': u((4 * H,)),
        })
    return params


if __name__ == "__main__":
    B, T = 2, 8
    vocab, E, H, L, C = 50, 100, 32, 2, 2   # embedding_dim=100, 2-layer bi-LSTM, 2 classes

    key = jax.random.PRNGKey(0)
    kp, ki = jax.random.split(key)
    params = init_params(kp, vocab, E, H, L, C)
    prep = prepare_params(params)
    input_indices = jax.random.randint(ki, (B, T), 0, vocab, dtype=jnp.int32)

    out = forward(input_indices, prep, vocab=vocab, E=E, H=H, C=C)
    out = jax.block_until_ready(out)

    with jax.default_matmul_precision("float32"):
        ref = jax.block_until_ready(ref_forward(input_indices, params, H, L))

    assert out.shape == (B, C), out.shape
    assert jnp.allclose(out, ref, rtol=1e-4, atol=1e-4), (out, ref)
    print("KERNEL_OK")
</pallas_src>

<mosaic_0001>
module attributes {stable_mosaic.version = 11 : i64} {
  func.func @_fused_forward_kernel(%arg0: memref<16x1xi32, #tpu.memory_space<vmem>>, %arg1: memref<504x128xf32, #tpu.memory_space<vmem>>, %arg2: memref<272x256xf32, #tpu.memory_space<vmem>>, %arg3: memref<2x2xf32, #tpu.memory_space<vmem>>, %arg4: memref<16x64xf32, #tpu.memory_space<vmem>>) attributes {dimension_semantics = [], scalar_prefetch = 0 : i64, scratch_operands = 1 : i64, tpu.core_type = #tpu.core_type<tc>} {
    %c0 = arith.constant 0 : index
    %c0_0 = arith.constant 0 : index
    %0 = vector.load %arg0[%c0, %c0_0] : memref<16x1xi32, #tpu.memory_space<vmem>>, vector<16x1xi32>
    %1 = tpu.iota {dimensions = array<i32: 1>} : vector<16x128xi32>
    %2 = vector.broadcast %0 : vector<16x1xi32> to vector<16x128xi32>
    %3 = arith.cmpi eq, %1, %2 : vector<16x128xi32>
    %4 = arith.extui %3 : vector<16x128xi1> to vector<16x128xi32>
    %5 = arith.sitofp %4 : vector<16x128xi32> to vector<16x128xf32>
    %c0_1 = arith.constant 0 : index
    %c0_2 = arith.constant 0 : index
    %6 = vector.load %arg1[%c0_1, %c0_2] : memref<504x128xf32, #tpu.memory_space<vmem>>, vector<128x128xf32>
    %cst = arith.constant dense<0.000000e+00> : vector<16x128xf32>
    %7 = tpu.matmul %5, %6, %cst {dimension_numbers = #tpu.dot_dimension_numbers<[1], [0], [0], [1], [0, 0, 1, 1], [], []>} : vector<16x128xf32>, vector<128x128xf32>, vector<16x128xf32> -> vector<16x128xf32>
    %c128 = arith.constant 128 : index
    %c0_3 = arith.constant 0 : index
    %8 = vector.load %arg1[%c128, %c0_3] : memref<504x128xf32, #tpu.memory_space<vmem>>, vector<128x128xf32>
    %cst_4 = arith.constant dense<0.000000e+00> : vector<16x128xf32>
    %9 = tpu.matmul %7, %8, %cst_4 {dimension_numbers = #tpu.dot_dimension_numbers<[1], [0], [0], [1], [0, 0, 1, 1], [], []>} : vector<16x128xf32>, vector<128x128xf32>, vector<16x128xf32> -> vector<16x128xf32>
    %c256 = arith.constant 256 : index
    %c0_5 = arith.constant 0 : index
    %10 = vector.load %arg1[%c256, %c0_5] : memref<504x128xf32, #tpu.memory_space<vmem>>, vector<1x128xf32>
    %11 = vector.broadcast %10 : vector<1x128xf32> to vector<16x128xf32>
    %12 = arith.addf %9, %11 : vector<16x128xf32>
    %cst_6 = arith.constant 0.000000e+00 : f32
    %13 = vector.broadcast %cst_6 : f32 to vector<16x128xf32>
    %14 = arith.maximumf %12, %13 : vector<16x128xf32>
    %c0_7 = arith.constant 0 : index
    %c0_8 = arith.constant 0 : index
    %15 = vector.load %arg2[%c0_7, %c0_8] : memref<272x256xf32, #tpu.memory_space<vmem>>, vector<128x256xf32>
    %cst_9 = arith.constant dense<0.000000e+00> : vector<16x256xf32>
    %16 = tpu.matmul %14, %15, %cst_9 {dimension_numbers = #tpu.dot_dimension_numbers<[1], [0], [0], [1], [0, 0, 1, 1], [], []>} : vector<16x128xf32>, vector<128x256xf32>, vector<16x256xf32> -> vector<16x256xf32>
    %c128_10 = arith.constant 128 : index
    %c0_11 = arith.constant 0 : index
    %17 = vector.load %arg2[%c128_10, %c0_11] : memref<272x256xf32, #tpu.memory_space<vmem>>, vector<1x256xf32>
    %18 = vector.broadcast %17 : vector<1x256xf32> to vector<16x256xf32>
    %19 = arith.addf %16, %18 : vector<16x256xf32>
    %20 = vector.extract_strided_slice %19 {offsets = [0, 0], sizes = [16, 128], strides = [1, 1]} : vector<16x256xf32> to vector<16x128xf32>
    %21 = vector.extract_strided_slice %19 {offsets = [0, 128], sizes = [16, 128], strides = [1, 1]} : vector<16x256xf32> to vector<16x128xf32>
    %c136 = arith.constant 136 : index
    %c0_12 = arith.constant 0 : index
    %22 = vector.load %arg2[%c136, %c0_12] : memref<272x256xf32, #tpu.memory_space<vmem>>, vector<64x256xf32>
    %cst_13 = arith.constant 0.000000e+00 : f32
    %23 = vector.broadcast %cst_13 : f32 to vector<2x32xf32>
    %24 = tpu.concatenate %23, %23 in 1 : vector<2x32xf32>, vector<2x32xf32> -> vector<2x64xf32>
    %cst_14 = arith.constant dense<0.000000e+00> : vector<2x256xf32>
    %25 = tpu.matmul %24, %22, %cst_14 {dimension_numbers = #tpu.dot_dimension_numbers<[1], [0], [0], [1], [0, 0, 1, 1], [], []>} : vector<2x64xf32>, vector<64x256xf32>, vector<2x256xf32> -> vector<2x256xf32>
    %26 = vector.extract_strided_slice %20 {offsets = [0, 0], sizes = [2, 128], strides = [1, 1]} : vector<16x128xf32> to vector<2x128xf32>
    %27 = vector.extract_strided_slice %25 {offsets = [0, 0], sizes = [2, 128], strides = [1, 1]} : vector<2x256xf32> to vector<2x128xf32>
    %28 = arith.addf %26, %27 : vector<2x128xf32>
    %29 = arith.negf %28 : vector<2x128xf32>
    %30 = math.exp %29 : vector<2x128xf32>
    %cst_15 = arith.constant 1.000000e+00 : f32
    %31 = vector.broadcast %cst_15 : f32 to vector<2x128xf32>
    %32 = arith.addf %31, %30 : vector<2x128xf32>
    %33 = arith.divf %31, %32 : vector<2x128xf32>
    %34 = vector.extract_strided_slice %33 {offsets = [0, 0], sizes = [2, 32], strides = [1, 1]} : vector<2x128xf32> to vector<2x32xf32>
    %35 = vector.extract_strided_slice %33 {offsets = [0, 32], sizes = [2, 32], strides = [1, 1]} : vector<2x128xf32> to vector<2x32xf32>
    %36 = vector.extract_strided_slice %33 {offsets = [0, 96], sizes = [2, 32], strides = [1, 1]} : vector<2x128xf32> to vector<2x32xf32>
    %37 = vector.extract_strided_slice %28 {offsets = [0, 64], sizes = [2, 32], strides = [1, 1]} : vector<2x128xf32> to vector<2x32xf32>
    %38 = math.tanh %37 : vector<2x32xf32>
    %39 = arith.mulf %35, %23 : vector<2x32xf32>
    %40 = arith.mulf %34, %38 : vector<2x32xf32>
    %41 = arith.addf %39, %40 : vector<2x32xf32>
    %42 = math.tanh %41 : vector<2x32xf32>
    %43 = arith.mulf %36, %42 : vector<2x32xf32>
    %44 = vector.extract_strided_slice %21 {offsets = [14, 0], sizes = [2, 128], strides = [1, 1]} : vector<16x128xf32> to vector<2x128xf32>
    %45 = vector.extract_strided_slice %25 {offsets = [0, 128], sizes = [2, 128], strides = [1, 1]} : vector<2x256xf32> to vector<2x128xf32>
    %46 = arith.addf %44, %45 : vector<2x128xf32>
    %47 = arith.negf %46 : vector<2x128xf32>
    %48 = math.exp %47 : vector<2x128xf32>
    %cst_16 = arith.constant 1.000000e+00 : f32
    %49 = vector.broadcast %cst_16 : f32 to vector<2x128xf32>
    %50 = arith.addf %49, %48 : vector<2x128xf32>
    %51 = arith.divf %49, %50 : vector<2x128xf32>
    %52 = vector.extract_strided_slice %51 {offsets = [0, 0], sizes = [2, 32], strides = [1, 1]} : vector<2x128xf32> to vector<2x32xf32>
    %53 = vector.extract_strided_slice %51 {offsets = [0, 32], sizes = [2, 32], strides = [1, 1]} : vector<2x128xf32> to vector<2x32xf32>
    %54 = vector.extract_strided_slice %51 {offsets = [0, 96], sizes = [2, 32], strides = [1, 1]} : vector<2x128xf32> to vector<2x32xf32>
    %55 = vector.extract_strided_slice %46 {offsets = [0, 64], sizes = [2, 32], strides = [1, 1]} : vector<2x128xf32> to vector<2x32xf32>
    %56 = math.tanh %55 : vector<2x32xf32>
    %57 = arith.mulf %53, %23 : vector<2x32xf32>
    %58 = arith.mulf %52, %56 : vector<2x32xf32>
    %59 = arith.addf %57, %58 : vector<2x32xf32>
    %60 = math.tanh %59 : vector<2x32xf32>
    %61 = arith.mulf %54, %60 : vector<2x32xf32>
    %c0_17 = arith.constant 0 : index
    %c0_18 = arith.constant 0 : index
    %62 = vector.load %arg4[%c0_17, %c0_18] : memref<16x64xf32, #tpu.memory_space<vmem>>, vector<2x32xf32>
    tpu.vector_store %arg4[%c0_17, %c0_18], %43 {strides = array<i32>} : memref<16x64xf32, #tpu.memory_space<vmem>>, vector<2x32xf32>,
    %c14 = arith.constant 14 : index
    %c32 = arith.constant 32 : index
    %63 = vector.load %arg4[%c14, %c32] : memref<16x64xf32, #tpu.memory_space<vmem>>, vector<2x32xf32>
    tpu.vector_store %arg4[%c14, %c32], %61 {strides = array<i32>} : memref<16x64xf32, #tpu.memory_space<vmem>>, vector<2x32xf32>,
    %64 = tpu.concatenate %43, %61 in 1 : vector<2x32xf32>, vector<2x32xf32> -> vector<2x64xf32>
    %cst_19 = arith.constant dense<0.000000e+00> : vector<2x256xf32>
    %65 = tpu.matmul %64, %22, %cst_19 {dimension_numbers = #tpu.dot_dimension_numbers<[1], [0], [0], [1], [0, 0, 1, 1], [], []>} : vector<2x64xf32>, vector<64x256xf32>, vector<2x256xf32> -> vector<2x256xf32>
    %66 = vector.extract_strided_slice %20 {offsets = [2, 0], sizes = [2, 128], strides = [1, 1]} : vector<16x128xf32> to vector<2x128xf32>
    %67 = vector.extract_strided_slice %65 {offsets = [0, 0], sizes = [2, 128], strides = [1, 1]} : vector<2x256xf32> to vector<2x128xf32>
    %68 = arith.addf %66, %67 : vector<2x128xf32>
    %69 = arith.negf %68 : vector<2x128xf32>
    %70 = math.exp %69 : vector<2x128xf32>
    %cst_20 = arith.constant 1.000000e+00 : f32
    %71 = vector.broadcast %cst_20 : f32 to vector<2x128xf32>
    %72 = arith.addf %71, %70 : vector<2x128xf32>
    %73 = arith.divf %71, %72 : vector<2x128xf32>
    %74 = vector.extract_strided_slice %73 {offsets = [0, 0], sizes = [2, 32], strides = [1, 1]} : vector<2x128xf32> to vector<2x32xf32>
    %75 = vector.extract_strided_slice %73 {offsets = [0, 32], sizes = [2, 32], strides = [1, 1]} : vector<2x128xf32> to vector<2x32xf32>
    %76 = vector.extract_strided_slice %73 {offsets = [0, 96], sizes = [2, 32], strides = [1, 1]} : vector<2x128xf32> to vector<2x32xf32>
    %77 = vector.extract_strided_slice %68 {offsets = [0, 64], sizes = [2, 32], strides = [1, 1]} : vector<2x128xf32> to vector<2x32xf32>
    %78 = math.tanh %77 : vector<2x32xf32>
    %79 = arith.mulf %75, %41 : vector<2x32xf32>
    %80 = arith.mulf %74, %78 : vector<2x32xf32>
    %81 = arith.addf %79, %80 : vector<2x32xf32>
    %82 = math.tanh %81 : vector<2x32xf32>
    %83 = arith.mulf %76, %82 : vector<2x32xf32>
    %84 = vector.extract_strided_slice %21 {offsets = [12, 0], sizes = [2, 128], strides = [1, 1]} : vector<16x128xf32> to vector<2x128xf32>
    %85 = vector.extract_strided_slice %65 {offsets = [0, 128], sizes = [2, 128], strides = [1, 1]} : vector<2x256xf32> to vector<2x128xf32>
    %86 = arith.addf %84, %85 : vector<2x128xf32>
    %87 = arith.negf %86 : vector<2x128xf32>
    %88 = math.exp %87 : vector<2x128xf32>
    %cst_21 = arith.constant 1.000000e+00 : f32
    %89 = vector.broadcast %cst_21 : f32 to vector<2x128xf32>
    %90 = arith.addf %89, %88 : vector<2x128xf32>
    %91 = arith.divf %89, %90 : vector<2x128xf32>
    %92 = vector.extract_strided_slice %91 {offsets = [0, 0], sizes = [2, 32], strides = [1, 1]} : vector<2x128xf32> to vector<2x32xf32>
    %93 = vector.extract_strided_slice %91 {offsets = [0, 32], sizes = [2, 32], strides = [1, 1]} : vector<2x128xf32> to vector<2x32xf32>
    %94 = vector.extract_strided_slice %91 {offsets = [0, 96], sizes = [2, 32], strides = [1, 1]} : vector<2x128xf32> to vector<2x32xf32>
    %95 = vector.extract_strided_slice %86 {offsets = [0, 64], sizes = [2, 32], strides = [1, 1]} : vector<2x128xf32> to vector<2x32xf32>
    %96 = math.tanh %95 : vector<2x32xf32>
    %97 = arith.mulf %93, %59 : vector<2x32xf32>
    %98 = arith.mulf %92, %96 : vector<2x32xf32>
    %99 = arith.addf %97, %98 : vector<2x32xf32>
    %100 = math.tanh %99 : vector<2x32xf32>
    %101 = arith.mulf %94, %100 : vector<2x32xf32>
    %c2 = arith.constant 2 : index
    %c0_22 = arith.constant 0 : index
    %102 = vector.load %arg4[%c2, %c0_22] : memref<16x64xf32, #tpu.memory_space<vmem>>, vector<2x32xf32>
    tpu.vector_store %arg4[%c2, %c0_22], %83 {strides = array<i32>} : memref<16x64xf32, #tpu.memory_space<vmem>>, vector<2x32xf32>,
    %c12 = arith.constant 12 : index
    %c32_23 = arith.constant 32 : index
    %103 = vector.load %arg4[%c12, %c32_23] : memref<16x64xf32, #tpu.memory_space<vmem>>, vector<2x32xf32>
    tpu.vector_store %arg4[%c12, %c32_23], %101 {strides = array<i32>} : memref<16x64xf32, #tpu.memory_space<vmem>>, vector<2x32xf32>,
    %104 = tpu.concatenate %83, %101 in 1 : vector<2x32xf32>, vector<2x32xf32> -> vector<2x64xf32>
    %cst_24 = arith.constant dense<0.000000e+00> : vector<2x256xf32>
    %105 = tpu.matmul %104, %22, %cst_24 {dimension_numbers = #tpu.dot_dimension_numbers<[1], [0], [0], [1], [0, 0, 1, 1], [], []>} : vector<2x64xf32>, vector<64x256xf32>, vector<2x256xf32> -> vector<2x256xf32>
    %106 = vector.extract_strided_slice %20 {offsets = [4, 0], sizes = [2, 128], strides = [1, 1]} : vector<16x128xf32> to vector<2x128xf32>
    %107 = vector.extract_strided_slice %105 {offsets = [0, 0], sizes = [2, 128], strides = [1, 1]} : vector<2x256xf32> to vector<2x128xf32>
    %108 = arith.addf %106, %107 : vector<2x128xf32>
    %109 = arith.negf %108 : vector<2x128xf32>
    %110 = math.exp %109 : vector<2x128xf32>
    %cst_25 = arith.constant 1.000000e+00 : f32
    %111 = vector.broadcast %cst_25 : f32 to vector<2x128xf32>
    %112 = arith.addf %111, %110 : vector<2x128xf32>
    %113 = arith.divf %111, %112 : vector<2x128xf32>
    %114 = vector.extract_strided_slice %113 {offsets = [0, 0], sizes = [2, 32], strides = [1, 1]} : vector<2x128xf32> to vector<2x32xf32>
    %115 = vector.extract_strided_slice %113 {offsets = [0, 32], sizes = [2, 32], strides = [1, 1]} : vector<2x128xf32> to vector<2x32xf32>
    %116 = vector.extract_strided_slice %113 {offsets = [0, 96], sizes = [2, 32], strides = [1, 1]} : vector<2x128xf32> to vector<2x32xf32>
    %117 = vector.extract_strided_slice %108 {offsets = [0, 64], sizes = [2, 32], strides = [1, 1]} : vector<2x128xf32> to vector<2x32xf32>
    %118 = math.tanh %117 : vector<2x32xf32>
    %119 = arith.mulf %115, %81 : vector<2x32xf32>
    %120 = arith.mulf %114, %118 : vector<2x32xf32>
    %121 = arith.addf %119, %120 : vector<2x32xf32>
    %122 = math.tanh %121 : vector<2x32xf32>
    %123 = arith.mulf %116, %122 : vector<2x32xf32>
    %124 = vector.extract_strided_slice %21 {offsets = [10, 0], sizes = [2, 128], strides = [1, 1]} : vector<16x128xf32> to vector<2x128xf32>
    %125 = vector.extract_strided_slice %105 {offsets = [0, 128], sizes = [2, 128], strides = [1, 1]} : vector<2x256xf32> to vector<2x128xf32>
    %126 = arith.addf %124, %125 : vector<2x128xf32>
    %127 = arith.negf %126 : vector<2x128xf32>
    %128 = math.exp %127 : vector<2x128xf32>
    %cst_26 = arith.constant 1.000000e+00 : f32
    %129 = vector.broadcast %cst_26 : f32 to vector<2x128xf32>
    %130 = arith.addf %129, %128 : vector<2x128xf32>
    %131 = arith.divf %129, %130 : vector<2x128xf32>
    %132 = vector.extract_strided_slice %131 {offsets = [0, 0], sizes = [2, 32], strides = [1, 1]} : vector<2x128xf32> to vector<2x32xf32>
    %133 = vector.extract_strided_slice %131 {offsets = [0, 32], sizes = [2, 32], strides = [1, 1]} : vector<2x128xf32> to vector<2x32xf32>
    %134 = vector.extract_strided_slice %131 {offsets = [0, 96], sizes = [2, 32], strides = [1, 1]} : vector<2x128xf32> to vector<2x32xf32>
    %135 = vector.extract_strided_slice %126 {offsets = [0, 64], sizes = [2, 32], strides = [1, 1]} : vector<2x128xf32> to vector<2x32xf32>
    %136 = math.tanh %135 : vector<2x32xf32>
    %137 = arith.mulf %133, %99 : vector<2x32xf32>
    %138 = arith.mulf %132, %136 : vector<2x32xf32>
    %139 = arith.addf %137, %138 : vector<2x32xf32>
    %140 = math.tanh %139 : vector<2x32xf32>
    %141 = arith.mulf %134, %140 : vector<2x32xf32>
    %c4 = arith.constant 4 : index
    %c0_27 = arith.constant 0 : index
    %142 = vector.load %arg4[%c4, %c0_27] : memref<16x64xf32, #tpu.memory_space<vmem>>, vector<2x32xf32>
    tpu.vector_store %arg4[%c4, %c0_27], %123 {strides = array<i32>} : memref<16x64xf32, #tpu.memory_space<vmem>>, vector<2x32xf32>,
    %c10 = arith.constant 10 : index
    %c32_28 = arith.constant 32 : index
    %143 = vector.load %arg4[%c10, %c32_28] : memref<16x64xf32, #tpu.memory_space<vmem>>, vector<2x32xf32>
    tpu.vector_store %arg4[%c10, %c32_28], %141 {strides = array<i32>} : memref<16x64xf32, #tpu.memory_space<vmem>>, vector<2x32xf32>,
    %144 = tpu.concatenate %123, %141 in 1 : vector<2x32xf32>, vector<2x32xf32> -> vector<2x64xf32>
    %cst_29 = arith.constant dense<0.000000e+00> : vector<2x256xf32>
    %145 = tpu.matmul %144, %22, %cst_29 {dimension_numbers = #tpu.dot_dimension_numbers<[1], [0], [0], [1], [0, 0, 1, 1], [], []>} : vector<2x64xf32>, vector<64x256xf32>, vector<2x256xf32> -> vector<2x256xf32>
    %146 = vector.extract_strided_slice %20 {offsets = [6, 0], sizes = [2, 128], strides = [1, 1]} : vector<16x128xf32> to vector<2x128xf32>
    %147 = vector.extract_strided_slice %145 {offsets = [0, 0], sizes = [2, 128], strides = [1, 1]} : vector<2x256xf32> to vector<2x128xf32>
    %148 = arith.addf %146, %147 : vector<2x128xf32>
    %149 = arith.negf %148 : vector<2x128xf32>
    %150 = math.exp %149 : vector<2x128xf32>
    %cst_30 = arith.constant 1.000000e+00 : f32
    %151 = vector.broadcast %cst_30 : f32 to vector<2x128xf32>
    %152 = arith.addf %151, %150 : vector<2x128xf32>
    %153 = arith.divf %151, %152 : vector<2x128xf32>
    %154 = vector.extract_strided_slice %153 {offsets = [0, 0], sizes = [2, 32], strides = [1, 1]} : vector<2x128xf32> to vector<2x32xf32>
    %155 = vector.extract_strided_slice %153 {offsets = [0, 32], sizes = [2, 32], strides = [1, 1]} : vector<2x128xf32> to vector<2x32xf32>
    %156 = vector.extract_strided_slice %153 {offsets = [0, 96], sizes = [2, 32], strides = [1, 1]} : vector<2x128xf32> to vector<2x32xf32>
    %157 = vector.extract_strided_slice %148 {offsets = [0, 64], sizes = [2, 32], strides = [1, 1]} : vector<2x128xf32> to vector<2x32xf32>
    %158 = math.tanh %157 : vector<2x32xf32>
    %159 = arith.mulf %155, %121 : vector<2x32xf32>
    %160 = arith.mulf %154, %158 : vector<2x32xf32>
    %161 = arith.addf %159, %160 : vector<2x32xf32>
    %162 = math.tanh %161 : vector<2x32xf32>
    %163 = arith.mulf %156, %162 : vector<2x32xf32>
    %164 = vector.extract_strided_slice %21 {offsets = [8, 0], sizes = [2, 128], strides = [1, 1]} : vector<16x128xf32> to vector<2x128xf32>
    %165 = vector.extract_strided_slice %145 {offsets = [0, 128], sizes = [2, 128], strides = [1, 1]} : vector<2x256xf32> to vector<2x128xf32>
    %166 = arith.addf %164, %165 : vector<2x128xf32>
    %167 = arith.negf %166 : vector<2x128xf32>
    %168 = math.exp %167 : vector<2x128xf32>
    %cst_31 = arith.constant 1.000000e+00 : f32
    %169 = vector.broadcast %cst_31 : f32 to vector<2x128xf32>
    %170 = arith.addf %169, %168 : vector<2x128xf32>
    %171 = arith.divf %169, %170 : vector<2x128xf32>
    %172 = vector.extract_strided_slice %171 {offsets = [0, 0], sizes = [2, 32], strides = [1, 1]} : vector<2x128xf32> to vector<2x32xf32>
    %173 = vector.extract_strided_slice %171 {offsets = [0, 32], sizes = [2, 32], strides = [1, 1]} : vector<2x128xf32> to vector<2x32xf32>
    %174 = vector.extract_strided_slice %171 {offsets = [0, 96], sizes = [2, 32], strides = [1, 1]} : vector<2x128xf32> to vector<2x32xf32>
    %175 = vector.extract_strided_slice %166 {offsets = [0, 64], sizes = [2, 32], strides = [1, 1]} : vector<2x128xf32> to vector<2x32xf32>
    %176 = math.tanh %175 : vector<2x32xf32>
    %177 = arith.mulf %173, %139 : vector<2x32xf32>
    %178 = arith.mulf %172, %176 : vector<2x32xf32>
    %179 = arith.addf %177, %178 : vector<2x32xf32>
    %180 = math.tanh %179 : vector<2x32xf32>
    %181 = arith.mulf %174, %180 : vector<2x32xf32>
    %c6 = arith.constant 6 : index
    %c0_32 = arith.constant 0 : index
    %182 = vector.load %arg4[%c6, %c0_32] : memref<16x64xf32, #tpu.memory_space<vmem>>, vector<2x32xf32>
    tpu.vector_store %arg4[%c6, %c0_32], %163 {strides = array<i32>} : memref<16x64xf32, #tpu.memory_space<vmem>>, vector<2x32xf32>,
    %c8 = arith.constant 8 : index
    %c32_33 = arith.constant 32 : index
    %183 = vector.load %arg4[%c8, %c32_33] : memref<16x64xf32, #tpu.memory_space<vmem>>, vector<2x32xf32>
    tpu.vector_store %arg4[%c8, %c32_33], %181 {strides = array<i32>} : memref<16x64xf32, #tpu.memory_space<vmem>>, vector<2x32xf32>,
    %184 = tpu.concatenate %163, %181 in 1 : vector<2x32xf32>, vector<2x32xf32> -> vector<2x64xf32>
    %cst_34 = arith.constant dense<0.000000e+00> : vector<2x256xf32>
    %185 = tpu.matmul %184, %22, %cst_34 {dimension_numbers = #tpu.dot_dimension_numbers<[1], [0], [0], [1], [0, 0, 1, 1], [], []>} : vector<2x64xf32>, vector<64x256xf32>, vector<2x256xf32> -> vector<2x256xf32>
    %186 = vector.extract_strided_slice %20 {offsets = [8, 0], sizes = [2, 128], strides = [1, 1]} : vector<16x128xf32> to vector<2x128xf32>
    %187 = vector.extract_strided_slice %185 {offsets = [0, 0], sizes = [2, 128], strides = [1, 1]} : vector<2x256xf32> to vector<2x128xf32>
    %188 = arith.addf %186, %187 : vector<2x128xf32>
    %189 = arith.negf %188 : vector<2x128xf32>
    %190 = math.exp %189 : vector<2x128xf32>
    %cst_35 = arith.constant 1.000000e+00 : f32
    %191 = vector.broadcast %cst_35 : f32 to vector<2x128xf32>
    %192 = arith.addf %191, %190 : vector<2x128xf32>
    %193 = arith.divf %191, %192 : vector<2x128xf32>
    %194 = vector.extract_strided_slice %193 {offsets = [0, 0], sizes = [2, 32], strides = [1, 1]} : vector<2x128xf32> to vector<2x32xf32>
    %195 = vector.extract_strided_slice %193 {offsets = [0, 32], sizes = [2, 32], strides = [1, 1]} : vector<2x128xf32> to vector<2x32xf32>
    %196 = vector.extract_strided_slice %193 {offsets = [0, 96], sizes = [2, 32], strides = [1, 1]} : vector<2x128xf32> to vector<2x32xf32>
    %197 = vector.extract_strided_slice %188 {offsets = [0, 64], sizes = [2, 32], strides = [1, 1]} : vector<2x128xf32> to vector<2x32xf32>
    %198 = math.tanh %197 : vector<2x32xf32>
    %199 = arith.mulf %195, %161 : vector<2x32xf32>
    %200 = arith.mulf %194, %198 : vector<2x32xf32>
    %201 = arith.addf %199, %200 : vector<2x32xf32>
    %202 = math.tanh %201 : vector<2x32xf32>
    %203 = arith.mulf %196, %202 : vector<2x32xf32>
    %204 = vector.extract_strided_slice %21 {offsets = [6, 0], sizes = [2, 128], strides = [1, 1]} : vector<16x128xf32> to vector<2x128xf32>
    %205 = vector.extract_strided_slice %185 {offsets = [0, 128], sizes = [2, 128], strides = [1, 1]} : vector<2x256xf32> to vector<2x128xf32>
    %206 = arith.addf %204, %205 : vector<2x128xf32>
    %207 = arith.negf %206 : vector<2x128xf32>
    %208 = math.exp %207 : vector<2x128xf32>
    %cst_36 = arith.constant 1.000000e+00 : f32
    %209 = vector.broadcast %cst_36 : f32 to vector<2x128xf32>
    %210 = arith.addf %209, %208 : vector<2x128xf32>
    %211 = arith.divf %209, %210 : vector<2x128xf32>
    %212 = vector.extract_strided_slice %211 {offsets = [0, 0], sizes = [2, 32], strides = [1, 1]} : vector<2x128xf32> to vector<2x32xf32>
    %213 = vector.extract_strided_slice %211 {offsets = [0, 32], sizes = [2, 32], strides = [1, 1]} : vector<2x128xf32> to vector<2x32xf32>
    %214 = vector.extract_strided_slice %211 {offsets = [0, 96], sizes = [2, 32], strides = [1, 1]} : vector<2x128xf32> to vector<2x32xf32>
    %215 = vector.extract_strided_slice %206 {offsets = [0, 64], sizes = [2, 32], strides = [1, 1]} : vector<2x128xf32> to vector<2x32xf32>
    %216 = math.tanh %215 : vector<2x32xf32>
    %217 = arith.mulf %213, %179 : vector<2x32xf32>
    %218 = arith.mulf %212, %216 : vector<2x32xf32>
    %219 = arith.addf %217, %218 : vector<2x32xf32>
    %220 = math.tanh %219 : vector<2x32xf32>
    %221 = arith.mulf %214, %220 : vector<2x32xf32>
    %c8_37 = arith.constant 8 : index
    %c0_38 = arith.constant 0 : index
    %222 = vector.load %arg4[%c8_37, %c0_38] : memref<16x64xf32, #tpu.memory_space<vmem>>, vector<2x32xf32>
    tpu.vector_store %arg4[%c8_37, %c0_38], %203 {strides = array<i32>} : memref<16x64xf32, #tpu.memory_space<vmem>>, vector<2x32xf32>,
    %c6_39 = arith.constant 6 : index
    %c32_40 = arith.constant 32 : index
    %223 = vector.load %arg4[%c6_39, %c32_40] : memref<16x64xf32, #tpu.memory_space<vmem>>, vector<2x32xf32>
    tpu.vector_store %arg4[%c6_39, %c32_40], %221 {strides = array<i32>} : memref<16x64xf32, #tpu.memory_space<vmem>>, vector<2x32xf32>,
    %224 = tpu.concatenate %203, %221 in 1 : vector<2x32xf32>, vector<2x32xf32> -> vector<2x64xf32>
    %cst_41 = arith.constant dense<0.000000e+00> : vector<2x256xf32>
    %225 = tpu.matmul %224, %22, %cst_41 {dimension_numbers = #tpu.dot_dimension_numbers<[1], [0], [0], [1], [0, 0, 1, 1], [], []>} : vector<2x64xf32>, vector<64x256xf32>, vector<2x256xf32> -> vector<2x256xf32>
    %226 = vector.extract_strided_slice %20 {offsets = [10, 0], sizes = [2, 128], strides = [1, 1]} : vector<16x128xf32> to vector<2x128xf32>
    %227 = vector.extract_strided_slice %225 {offsets = [0, 0], sizes = [2, 128], strides = [1, 1]} : vector<2x256xf32> to vector<2x128xf32>
    %228 = arith.addf %226, %227 : vector<2x128xf32>
    %229 = arith.negf %228 : vector<2x128xf32>
    %230 = math.exp %229 : vector<2x128xf32>
    %cst_42 = arith.constant 1.000000e+00 : f32
    %231 = vector.broadcast %cst_42 : f32 to vector<2x128xf32>
    %232 = arith.addf %231, %230 : vector<2x128xf32>
    %233 = arith.divf %231, %232 : vector<2x128xf32>
    %234 = vector.extract_strided_slice %233 {offsets = [0, 0], sizes = [2, 32], strides = [1, 1]} : vector<2x128xf32> to vector<2x32xf32>
    %235 = vector.extract_strided_slice %233 {offsets = [0, 32], sizes = [2, 32], strides = [1, 1]} : vector<2x128xf32> to vector<2x32xf32>
    %236 = vector.extract_strided_slice %233 {offsets = [0, 96], sizes = [2, 32], strides = [1, 1]} : vector<2x128xf32> to vector<2x32xf32>
    %237 = vector.extract_strided_slice %228 {offsets = [0, 64], sizes = [2, 32], strides = [1, 1]} : vector<2x128xf32> to vector<2x32xf32>
    %238 = math.tanh %237 : vector<2x32xf32>
    %239 = arith.mulf %235, %201 : vector<2x32xf32>
    %240 = arith.mulf %234, %238 : vector<2x32xf32>
    %241 = arith.addf %239, %240 : vector<2x32xf32>
    %242 = math.tanh %241 : vector<2x32xf32>
    %243 = arith.mulf %236, %242 : vector<2x32xf32>
    %244 = vector.extract_strided_slice %21 {offsets = [4, 0], sizes = [2, 128], strides = [1, 1]} : vector<16x128xf32> to vector<2x128xf32>
    %245 = vector.extract_strided_slice %225 {offsets = [0, 128], sizes = [2, 128], strides = [1, 1]} : vector<2x256xf32> to vector<2x128xf32>
    %246 = arith.addf %244, %245 : vector<2x128xf32>
    %247 = arith.negf %246 : vector<2x128xf32>
    %248 = math.exp %247 : vector<2x128xf32>
    %cst_43 = arith.constant 1.000000e+00 : f32
    %249 = vector.broadcast %cst_43 : f32 to vector<2x128xf32>
    %250 = arith.addf %249, %248 : vector<2x128xf32>
    %251 = arith.divf %249, %250 : vector<2x128xf32>
    %252 = vector.extract_strided_slice %251 {offsets = [0, 0], sizes = [2, 32], strides = [1, 1]} : vector<2x128xf32> to vector<2x32xf32>
    %253 = vector.extract_strided_slice %251 {offsets = [0, 32], sizes = [2, 32], strides = [1, 1]} : vector<2x128xf32> to vector<2x32xf32>
    %254 = vector.extract_strided_slice %251 {offsets = [0, 96], sizes = [2, 32], strides = [1, 1]} : vector<2x128xf32> to vector<2x32xf32>
    %255 = vector.extract_strided_slice %246 {offsets = [0, 64], sizes = [2, 32], strides = [1, 1]} : vector<2x128xf32> to vector<2x32xf32>
    %256 = math.tanh %255 : vector<2x32xf32>
    %257 = arith.mulf %253, %219 : vector<2x32xf32>
    %258 = arith.mulf %252, %256 : vector<2x32xf32>
    %259 = arith.addf %257, %258 : vector<2x32xf32>
    %260 = math.tanh %259 : vector<2x32xf32>
    %261 = arith.mulf %254, %260 : vector<2x32xf32>
    %c10_44 = arith.constant 10 : index
    %c0_45 = arith.constant 0 : index
    %262 = vector.load %arg4[%c10_44, %c0_45] : memref<16x64xf32, #tpu.memory_space<vmem>>, vector<2x32xf32>
    tpu.vector_store %arg4[%c10_44, %c0_45], %243 {strides = array<i32>} : memref<16x64xf32, #tpu.memory_space<vmem>>, vector<2x32xf32>,
    %c4_46 = arith.constant 4 : index
    %c32_47 = arith.constant 32 : index
    %263 = vector.load %arg4[%c4_46, %c32_47] : memref<16x64xf32, #tpu.memory_space<vmem>>, vector<2x32xf32>
    tpu.vector_store %arg4[%c4_46, %c32_47], %261 {strides = array<i32>} : memref<16x64xf32, #tpu.memory_space<vmem>>, vector<2x32xf32>,
    %264 = tpu.concatenate %243, %261 in 1 : vector<2x32xf32>, vector<2x32xf32> -> vector<2x64xf32>
    %cst_48 = arith.constant dense<0.000000e+00> : vector<2x256xf32>
    %265 = tpu.matmul %264, %22, %cst_48 {dimension_numbers = #tpu.dot_dimension_numbers<[1], [0], [0], [1], [0, 0, 1, 1], [], []>} : vector<2x64xf32>, vector<64x256xf32>, vector<2x256xf32> -> vector<2x256xf32>
    %266 = vector.extract_strided_slice %20 {offsets = [12, 0], sizes = [2, 128], strides = [1, 1]} : vector<16x128xf32> to vector<2x128xf32>
    %267 = vector.extract_strided_slice %265 {offsets = [0, 0], sizes = [2, 128], strides = [1, 1]} : vector<2x256xf32> to vector<2x128xf32>
    %268 = arith.addf %266, %267 : vector<2x128xf32>
    %269 = arith.negf %268 : vector<2x128xf32>
    %270 = math.exp %269 : vector<2x128xf32>
    %cst_49 = arith.constant 1.000000e+00 : f32
    %271 = vector.broadcast %cst_49 : f32 to vector<2x128xf32>
    %272 = arith.addf %271, %270 : vector<2x128xf32>
    %273 = arith.divf %271, %272 : vector<2x128xf32>
    %274 = vector.extract_strided_slice %273 {offsets = [0, 0], sizes = [2, 32], strides = [1, 1]} : vector<2x128xf32> to vector<2x32xf32>
    %275 = vector.extract_strided_slice %273 {offsets = [0, 32], sizes = [2, 32], strides = [1, 1]} : vector<2x128xf32> to vector<2x32xf32>
    %276 = vector.extract_strided_slice %273 {offsets = [0, 96], sizes = [2, 32], strides = [1, 1]} : vector<2x128xf32> to vector<2x32xf32>
    %277 = vector.extract_strided_slice %268 {offsets = [0, 64], sizes = [2, 32], strides = [1, 1]} : vector<2x128xf32> to vector<2x32xf32>
    %278 = math.tanh %277 : vector<2x32xf32>
    %279 = arith.mulf %275, %241 : vector<2x32xf32>
    %280 = arith.mulf %274, %278 : vector<2x32xf32>
    %281 = arith.addf %279, %280 : vector<2x32xf32>
    %282 = math.tanh %281 : vector<2x32xf32>
    %283 = arith.mulf %276, %282 : vector<2x32xf32>
    %284 = vector.extract_strided_slice %21 {offsets = [2, 0], sizes = [2, 128], strides = [1, 1]} : vector<16x128xf32> to vector<2x128xf32>
    %285 = vector.extract_strided_slice %265 {offsets = [0, 128], sizes = [2, 128], strides = [1, 1]} : vector<2x256xf32> to vector<2x128xf32>
    %286 = arith.addf %284, %285 : vector<2x128xf32>
    %287 = arith.negf %286 : vector<2x128xf32>
    %288 = math.exp %287 : vector<2x128xf32>
    %cst_50 = arith.constant 1.000000e+00 : f32
    %289 = vector.broadcast %cst_50 : f32 to vector<2x128xf32>
    %290 = arith.addf %289, %288 : vector<2x128xf32>
    %291 = arith.divf %289, %290 : vector<2x128xf32>
    %292 = vector.extract_strided_slice %291 {offsets = [0, 0], sizes = [2, 32], strides = [1, 1]} : vector<2x128xf32> to vector<2x32xf32>
    %293 = vector.extract_strided_slice %291 {offsets = [0, 32], sizes = [2, 32], strides = [1, 1]} : vector<2x128xf32> to vector<2x32xf32>
    %294 = vector.extract_strided_slice %291 {offsets = [0, 96], sizes = [2, 32], strides = [1, 1]} : vector<2x128xf32> to vector<2x32xf32>
    %295 = vector.extract_strided_slice %286 {offsets = [0, 64], sizes = [2, 32], strides = [1, 1]} : vector<2x128xf32> to vector<2x32xf32>
    %296 = math.tanh %295 : vector<2x32xf32>
    %297 = arith.mulf %293, %259 : vector<2x32xf32>
    %298 = arith.mulf %292, %296 : vector<2x32xf32>
    %299 = arith.addf %297, %298 : vector<2x32xf32>
    %300 = math.tanh %299 : vector<2x32xf32>
    %301 = arith.mulf %294, %300 : vector<2x32xf32>
    %c12_51 = arith.constant 12 : index
    %c0_52 = arith.constant 0 : index
    %302 = vector.load %arg4[%c12_51, %c0_52] : memref<16x64xf32, #tpu.memory_space<vmem>>, vector<2x32xf32>
    tpu.vector_store %arg4[%c12_51, %c0_52], %283 {strides = array<i32>} : memref<16x64xf32, #tpu.memory_space<vmem>>, vector<2x32xf32>,
    %c2_53 = arith.constant 2 : index
    %c32_54 = arith.constant 32 : index
    %303 = vector.load %arg4[%c2_53, %c32_54] : memref<16x64xf32, #tpu.memory_space<vmem>>, vector<2x32xf32>
    tpu.vector_store %arg4[%c2_53, %c32_54], %301 {strides = array<i32>} : memref<16x64xf32, #tpu.memory_space<vmem>>, vector<2x32xf32>,
    %304 = tpu.concatenate %283, %301 in 1 : vector<2x32xf32>, vector<2x32xf32> -> vector<2x64xf32>
    %cst_55 = arith.constant dense<0.000000e+00> : vector<2x256xf32>
    %305 = tpu.matmul %304, %22, %cst_55 {dimension_numbers = #tpu.dot_dimension_numbers<[1], [0], [0], [1], [0, 0, 1, 1], [], []>} : vector<2x64xf32>, vector<64x256xf32>, vector<2x256xf32> -> vector<2x256xf32>
    %306 = vector.extract_strided_slice %20 {offsets = [14, 0], sizes = [2, 128], strides = [1, 1]} : vector<16x128xf32> to vector<2x128xf32>
    %307 = vector.extract_strided_slice %305 {offsets = [0, 0], sizes = [2, 128], strides = [1, 1]} : vector<2x256xf32> to vector<2x128xf32>
    %308 = arith.addf %306, %307 : vector<2x128xf32>
    %309 = arith.negf %308 : vector<2x128xf32>
    %310 = math.exp %309 : vector<2x128xf32>
    %cst_56 = arith.constant 1.000000e+00 : f32
    %311 = vector.broadcast %cst_56 : f32 to vector<2x128xf32>
    %312 = arith.addf %311, %310 : vector<2x128xf32>
    %313 = arith.divf %311, %312 : vector<2x128xf32>
    %314 = vector.extract_strided_slice %313 {offsets = [0, 0], sizes = [2, 32], strides = [1, 1]} : vector<2x128xf32> to vector<2x32xf32>
    %315 = vector.extract_strided_slice %313 {offsets = [0, 32], sizes = [2, 32], strides = [1, 1]} : vector<2x128xf32> to vector<2x32xf32>
    %316 = vector.extract_strided_slice %313 {offsets = [0, 96], sizes = [2, 32], strides = [1, 1]} : vector<2x128xf32> to vector<2x32xf32>
    %317 = vector.extract_strided_slice %308 {offsets = [0, 64], sizes = [2, 32], strides = [1, 1]} : vector<2x128xf32> to vector<2x32xf32>
    %318 = math.tanh %317 : vector<2x32xf32>
    %319 = arith.mulf %315, %281 : vector<2x32xf32>
    %320 = arith.mulf %314, %318 : vector<2x32xf32>
    %321 = arith.addf %319, %320 : vector<2x32xf32>
    %322 = math.tanh %321 : vector<2x32xf32>
    %323 = arith.mulf %316, %322 : vector<2x32xf32>
    %324 = vector.extract_strided_slice %21 {offsets = [0, 0], sizes = [2, 128], strides = [1, 1]} : vector<16x128xf32> to vector<2x128xf32>
    %325 = vector.extract_strided_slice %305 {offsets = [0, 128], sizes = [2, 128], strides = [1, 1]} : vector<2x256xf32> to vector<2x128xf32>
    %326 = arith.addf %324, %325 : vector<2x128xf32>
    %327 = arith.negf %326 : vector<2x128xf32>
    %328 = math.exp %327 : vector<2x128xf32>
    %cst_57 = arith.constant 1.000000e+00 : f32
    %329 = vector.broadcast %cst_57 : f32 to vector<2x128xf32>
    %330 = arith.addf %329, %328 : vector<2x128xf32>
    %331 = arith.divf %329, %330 : vector<2x128xf32>
    %332 = vector.extract_strided_slice %331 {offsets = [0, 0], sizes = [2, 32], strides = [1, 1]} : vector<2x128xf32> to vector<2x32xf32>
    %333 = vector.extract_strided_slice %331 {offsets = [0, 32], sizes = [2, 32], strides = [1, 1]} : vector<2x128xf32> to vector<2x32xf32>
    %334 = vector.extract_strided_slice %331 {offsets = [0, 96], sizes = [2, 32], strides = [1, 1]} : vector<2x128xf32> to vector<2x32xf32>
    %335 = vector.extract_strided_slice %326 {offsets = [0, 64], sizes = [2, 32], strides = [1, 1]} : vector<2x128xf32> to vector<2x32xf32>
    %336 = math.tanh %335 : vector<2x32xf32>
    %337 = arith.mulf %333, %299 : vector<2x32xf32>
    %338 = arith.mulf %332, %336 : vector<2x32xf32>
    %339 = arith.addf %337, %338 : vector<2x32xf32>
    %340 = math.tanh %339 : vector<2x32xf32>
    %341 = arith.mulf %334, %340 : vector<2x32xf32>
    %c14_58 = arith.constant 14 : index
    %c0_59 = arith.constant 0 : index
    %342 = vector.load %arg4[%c14_58, %c0_59] : memref<16x64xf32, #tpu.memory_space<vmem>>, vector<2x32xf32>
    tpu.vector_store %arg4[%c14_58, %c0_59], %323 {strides = array<i32>} : memref<16x64xf32, #tpu.memory_space<vmem>>, vector<2x32xf32>,
    %c0_60 = arith.constant 0 : index
    %c32_61 = arith.constant 32 : index
    %343 = vector.load %arg4[%c0_60, %c32_61] : memref<16x64xf32, #tpu.memory_space<vmem>>, vector<2x32xf32>
    tpu.vector_store %arg4[%c0_60, %c32_61], %341 {strides = array<i32>} : memref<16x64xf32, #tpu.memory_space<vmem>>, vector<2x32xf32>,
    %c0_62 = arith.constant 0 : index
    %c0_63 = arith.constant 0 : index
    %344 = vector.load %arg4[%c0_62, %c0_63] : memref<16x64xf32, #tpu.memory_space<vmem>>, vector<16x64xf32>
    %c200 = arith.constant 200 : index
    %c0_64 = arith.constant 0 : index
    %345 = vector.load %arg2[%c200, %c0_64] : memref<272x256xf32, #tpu.memory_space<vmem>>, vector<64x256xf32>
    %cst_65 = arith.constant dense<0.000000e+00> : vector<16x256xf32>
    %346 = tpu.matmul %344, %345, %cst_65 {dimension_numbers = #tpu.dot_dimension_numbers<[1], [0], [0], [1], [0, 0, 1, 1], [], []>} : vector<16x64xf32>, vector<64x256xf32>, vector<16x256xf32> -> vector<16x256xf32>
    %c264 = arith.constant 264 : index
    %c0_66 = arith.constant 0 : index
    %347 = vector.load %arg2[%c264, %c0_66] : memref<272x256xf32, #tpu.memory_space<vmem>>, vector<1x256xf32>
    %348 = vector.broadcast %347 : vector<1x256xf32> to vector<16x256xf32>
    %349 = arith.addf %346, %348 : vector<16x256xf32>
    %350 = vector.extract_strided_slice %349 {offsets = [0, 0], sizes = [16, 128], strides = [1, 1]} : vector<16x256xf32> to vector<16x128xf32>
    %c264_67 = arith.constant 264 : index
    %c0_68 = arith.constant 0 : index
    %351 = vector.load %arg1[%c264_67, %c0_68] : memref<504x128xf32, #tpu.memory_space<vmem>>, vector<32x128xf32>
    %352 = vector.extract_strided_slice %350 {offsets = [0, 0], sizes = [2, 128], strides = [1, 1]} : vector<16x128xf32> to vector<2x128xf32>
    %cst_69 = arith.constant dense<0.000000e+00> : vector<2x128xf32>
    %353 = tpu.matmul %23, %351, %cst_69 {dimension_numbers = #tpu.dot_dimension_numbers<[1], [0], [0], [1], [0, 0, 1, 1], [], []>} : vector<2x32xf32>, vector<32x128xf32>, vector<2x128xf32> -> vector<2x128xf32>
    %354 = arith.addf %352, %353 : vector<2x128xf32>
    %355 = arith.negf %354 : vector<2x128xf32>
    %356 = math.exp %355 : vector<2x128xf32>
    %cst_70 = arith.constant 1.000000e+00 : f32
    %357 = vector.broadcast %cst_70 : f32 to vector<2x128xf32>
    %358 = arith.addf %357, %356 : vector<2x128xf32>
    %359 = arith.divf %357, %358 : vector<2x128xf32>
    %360 = vector.extract_strided_slice %359 {offsets = [0, 0], sizes = [2, 32], strides = [1, 1]} : vector<2x128xf32> to vector<2x32xf32>
    %361 = vector.extract_strided_slice %359 {offsets = [0, 32], sizes = [2, 32], strides = [1, 1]} : vector<2x128xf32> to vector<2x32xf32>
    %362 = vector.extract_strided_slice %359 {offsets = [0, 96], sizes = [2, 32], strides = [1, 1]} : vector<2x128xf32> to vector<2x32xf32>
    %363 = vector.extract_strided_slice %354 {offsets = [0, 64], sizes = [2, 32], strides = [1, 1]} : vector<2x128xf32> to vector<2x32xf32>
    %364 = math.tanh %363 : vector<2x32xf32>
    %365 = arith.mulf %361, %23 : vector<2x32xf32>
    %366 = arith.mulf %360, %364 : vector<2x32xf32>
    %367 = arith.addf %365, %366 : vector<2x32xf32>
    %368 = math.tanh %367 : vector<2x32xf32>
    %369 = arith.mulf %362, %368 : vector<2x32xf32>
    %370 = vector.extract_strided_slice %350 {offsets = [2, 0], sizes = [2, 128], strides = [1, 1]} : vector<16x128xf32> to vector<2x128xf32>
    %cst_71 = arith.constant dense<0.000000e+00> : vector<2x128xf32>
    %371 = tpu.matmul %369, %351, %cst_71 {dimension_numbers = #tpu.dot_dimension_numbers<[1], [0], [0], [1], [0, 0, 1, 1], [], []>} : vector<2x32xf32>, vector<32x128xf32>, vector<2x128xf32> -> vector<2x128xf32>
    %372 = arith.addf %370, %371 : vector<2x128xf32>
    %373 = arith.negf %372 : vector<2x128xf32>
    %374 = math.exp %373 : vector<2x128xf32>
    %cst_72 = arith.constant 1.000000e+00 : f32
    %375 = vector.broadcast %cst_72 : f32 to vector<2x128xf32>
    %376 = arith.addf %375, %374 : vector<2x128xf32>
    %377 = arith.divf %375, %376 : vector<2x128xf32>
    %378 = vector.extract_strided_slice %377 {offsets = [0, 0], sizes = [2, 32], strides = [1, 1]} : vector<2x128xf32> to vector<2x32xf32>
    %379 = vector.extract_strided_slice %377 {offsets = [0, 32], sizes = [2, 32], strides = [1, 1]} : vector<2x128xf32> to vector<2x32xf32>
    %380 = vector.extract_strided_slice %377 {offsets = [0, 96], sizes = [2, 32], strides = [1, 1]} : vector<2x128xf32> to vector<2x32xf32>
    %381 = vector.extract_strided_slice %372 {offsets = [0, 64], sizes = [2, 32], strides = [1, 1]} : vector<2x128xf32> to vector<2x32xf32>
    %382 = math.tanh %381 : vector<2x32xf32>
    %383 = arith.mulf %379, %367 : vector<2x32xf32>
    %384 = arith.mulf %378, %382 : vector<2x32xf32>
    %385 = arith.addf %383, %384 : vector<2x32xf32>
    %386 = math.tanh %385 : vector<2x32xf32>
    %387 = arith.mulf %380, %386 : vector<2x32xf32>
    %388 = vector.extract_strided_slice %350 {offsets = [4, 0], sizes = [2, 128], strides = [1, 1]} : vector<16x128xf32> to vector<2x128xf32>
    %cst_73 = arith.constant dense<0.000000e+00> : vector<2x128xf32>
    %389 = tpu.matmul %387, %351, %cst_73 {dimension_numbers = #tpu.dot_dimension_numbers<[1], [0], [0], [1], [0, 0, 1, 1], [], []>} : vector<2x32xf32>, vector<32x128xf32>, vector<2x128xf32> -> vector<2x128xf32>
    %390 = arith.addf %388, %389 : vector<2x128xf32>
    %391 = arith.negf %390 : vector<2x128xf32>
    %392 = math.exp %391 : vector<2x128xf32>
    %cst_74 = arith.constant 1.000000e+00 : f32
    %393 = vector.broadcast %cst_74 : f32 to vector<2x128xf32>
    %394 = arith.addf %393, %392 : vector<2x128xf32>
    %395 = arith.divf %393, %394 : vector<2x128xf32>
    %396 = vector.extract_strided_slice %395 {offsets = [0, 0], sizes = [2, 32], strides = [1, 1]} : vector<2x128xf32> to vector<2x32xf32>
    %397 = vector.extract_strided_slice %395 {offsets = [0, 32], sizes = [2, 32], strides = [1, 1]} : vector<2x128xf32> to vector<2x32xf32>
    %398 = vector.extract_strided_slice %395 {offsets = [0, 96], sizes = [2, 32], strides = [1, 1]} : vector<2x128xf32> to vector<2x32xf32>
    %399 = vector.extract_strided_slice %390 {offsets = [0, 64], sizes = [2, 32], strides = [1, 1]} : vector<2x128xf32> to vector<2x32xf32>
    %400 = math.tanh %399 : vector<2x32xf32>
    %401 = arith.mulf %397, %385 : vector<2x32xf32>
    %402 = arith.mulf %396, %400 : vector<2x32xf32>
    %403 = arith.addf %401, %402 : vector<2x32xf32>
    %404 = math.tanh %403 : vector<2x32xf32>
    %405 = arith.mulf %398, %404 : vector<2x32xf32>
    %406 = vector.extract_strided_slice %350 {offsets = [6, 0], sizes = [2, 128], strides = [1, 1]} : vector<16x128xf32> to vector<2x128xf32>
    %cst_75 = arith.constant dense<0.000000e+00> : vector<2x128xf32>
    %407 = tpu.matmul %405, %351, %cst_75 {dimension_numbers = #tpu.dot_dimension_numbers<[1], [0], [0], [1], [0, 0, 1, 1], [], []>} : vector<2x32xf32>, vector<32x128xf32>, vector<2x128xf32> -> vector<2x128xf32>
    %408 = arith.addf %406, %407 : vector<2x128xf32>
    %409 = arith.negf %408 : vector<2x128xf32>
    %410 = math.exp %409 : vector<2x128xf32>
    %cst_76 = arith.constant 1.000000e+00 : f32
    %411 = vector.broadcast %cst_76 : f32 to vector<2x128xf32>
    %412 = arith.addf %411, %410 : vector<2x128xf32>
    %413 = arith.divf %411, %412 : vector<2x128xf32>
    %414 = vector.extract_strided_slice %413 {offsets = [0, 0], sizes = [2, 32], strides = [1, 1]} : vector<2x128xf32> to vector<2x32xf32>
    %415 = vector.extract_strided_slice %413 {offsets = [0, 32], sizes = [2, 32], strides = [1, 1]} : vector<2x128xf32> to vector<2x32xf32>
    %416 = vector.extract_strided_slice %413 {offsets = [0, 96], sizes = [2, 32], strides = [1, 1]} : vector<2x128xf32> to vector<2x32xf32>
    %417 = vector.extract_strided_slice %408 {offsets = [0, 64], sizes = [2, 32], strides = [1, 1]} : vector<2x128xf32> to vector<2x32xf32>
    %418 = math.tanh %417 : vector<2x32xf32>
    %419 = arith.mulf %415, %403 : vector<2x32xf32>
    %420 = arith.mulf %414, %418 : vector<2x32xf32>
    %421 = arith.addf %419, %420 : vector<2x32xf32>
    %422 = math.tanh %421 : vector<2x32xf32>
    %423 = arith.mulf %416, %422 : vector<2x32xf32>
    %424 = vector.extract_strided_slice %350 {offsets = [8, 0], sizes = [2, 128], strides = [1, 1]} : vector<16x128xf32> to vector<2x128xf32>
    %cst_77 = arith.constant dense<0.000000e+00> : vector<2x128xf32>
    %425 = tpu.matmul %423, %351, %cst_77 {dimension_numbers = #tpu.dot_dimension_numbers<[1], [0], [0], [1], [0, 0, 1, 1], [], []>} : vector<2x32xf32>, vector<32x128xf32>, vector<2x128xf32> -> vector<2x128xf32>
    %426 = arith.addf %424, %425 : vector<2x128xf32>
    %427 = arith.negf %426 : vector<2x128xf32>
    %428 = math.exp %427 : vector<2x128xf32>
    %cst_78 = arith.constant 1.000000e+00 : f32
    %429 = vector.broadcast %cst_78 : f32 to vector<2x128xf32>
    %430 = arith.addf %429, %428 : vector<2x128xf32>
    %431 = arith.divf %429, %430 : vector<2x128xf32>
    %432 = vector.extract_strided_slice %431 {offsets = [0, 0], sizes = [2, 32], strides = [1, 1]} : vector<2x128xf32> to vector<2x32xf32>
    %433 = vector.extract_strided_slice %431 {offsets = [0, 32], sizes = [2, 32], strides = [1, 1]} : vector<2x128xf32> to vector<2x32xf32>
    %434 = vector.extract_strided_slice %431 {offsets = [0, 96], sizes = [2, 32], strides = [1, 1]} : vector<2x128xf32> to vector<2x32xf32>
    %435 = vector.extract_strided_slice %426 {offsets = [0, 64], sizes = [2, 32], strides = [1, 1]} : vector<2x128xf32> to vector<2x32xf32>
    %436 = math.tanh %435 : vector<2x32xf32>
    %437 = arith.mulf %433, %421 : vector<2x32xf32>
    %438 = arith.mulf %432, %436 : vector<2x32xf32>
    %439 = arith.addf %437, %438 : vector<2x32xf32>
    %440 = math.tanh %439 : vector<2x32xf32>
    %441 = arith.mulf %434, %440 : vector<2x32xf32>
    %442 = vector.extract_strided_slice %350 {offsets = [10, 0], sizes = [2, 128], strides = [1, 1]} : vector<16x128xf32> to vector<2x128xf32>
    %cst_79 = arith.constant dense<0.000000e+00> : vector<2x128xf32>
    %443 = tpu.matmul %441, %351, %cst_79 {dimension_numbers = #tpu.dot_dimension_numbers<[1], [0], [0], [1], [0, 0, 1, 1], [], []>} : vector<2x32xf32>, vector<32x128xf32>, vector<2x128xf32> -> vector<2x128xf32>
    %444 = arith.addf %442, %443 : vector<2x128xf32>
    %445 = arith.negf %444 : vector<2x128xf32>
    %446 = math.exp %445 : vector<2x128xf32>
    %cst_80 = arith.constant 1.000000e+00 : f32
    %447 = vector.broadcast %cst_80 : f32 to vector<2x128xf32>
    %448 = arith.addf %447, %446 : vector<2x128xf32>
    %449 = arith.divf %447, %448 : vector<2x128xf32>
    %450 = vector.extract_strided_slice %449 {offsets = [0, 0], sizes = [2, 32], strides = [1, 1]} : vector<2x128xf32> to vector<2x32xf32>
    %451 = vector.extract_strided_slice %449 {offsets = [0, 32], sizes = [2, 32], strides = [1, 1]} : vector<2x128xf32> to vector<2x32xf32>
    %452 = vector.extract_strided_slice %449 {offsets = [0, 96], sizes = [2, 32], strides = [1, 1]} : vector<2x128xf32> to vector<2x32xf32>
    %453 = vector.extract_strided_slice %444 {offsets = [0, 64], sizes = [2, 32], strides = [1, 1]} : vector<2x128xf32> to vector<2x32xf32>
    %454 = math.tanh %453 : vector<2x32xf32>
    %455 = arith.mulf %451, %439 : vector<2x32xf32>
    %456 = arith.mulf %450, %454 : vector<2x32xf32>
    %457 = arith.addf %455, %456 : vector<2x32xf32>
    %458 = math.tanh %457 : vector<2x32xf32>
    %459 = arith.mulf %452, %458 : vector<2x32xf32>
    %460 = vector.extract_strided_slice %350 {offsets = [12, 0], sizes = [2, 128], strides = [1, 1]} : vector<16x128xf32> to vector<2x128xf32>
    %cst_81 = arith.constant dense<0.000000e+00> : vector<2x128xf32>
    %461 = tpu.matmul %459, %351, %cst_81 {dimension_numbers = #tpu.dot_dimension_numbers<[1], [0], [0], [1], [0, 0, 1, 1], [], []>} : vector<2x32xf32>, vector<32x128xf32>, vector<2x128xf32> -> vector<2x128xf32>
    %462 = arith.addf %460, %461 : vector<2x128xf32>
    %463 = arith.negf %462 : vector<2x128xf32>
    %464 = math.exp %463 : vector<2x128xf32>
    %cst_82 = arith.constant 1.000000e+00 : f32
    %465 = vector.broadcast %cst_82 : f32 to vector<2x128xf32>
    %466 = arith.addf %465, %464 : vector<2x128xf32>
    %467 = arith.divf %465, %466 : vector<2x128xf32>
    %468 = vector.extract_strided_slice %467 {offsets = [0, 0], sizes = [2, 32], strides = [1, 1]} : vector<2x128xf32> to vector<2x32xf32>
    %469 = vector.extract_strided_slice %467 {offsets = [0, 32], sizes = [2, 32], strides = [1, 1]} : vector<2x128xf32> to vector<2x32xf32>
    %470 = vector.extract_strided_slice %467 {offsets = [0, 96], sizes = [2, 32], strides = [1, 1]} : vector<2x128xf32> to vector<2x32xf32>
    %471 = vector.extract_strided_slice %462 {offsets = [0, 64], sizes = [2, 32], strides = [1, 1]} : vector<2x128xf32> to vector<2x32xf32>
    %472 = math.tanh %471 : vector<2x32xf32>
    %473 = arith.mulf %469, %457 : vector<2x32xf32>
    %474 = arith.mulf %468, %472 : vector<2x32xf32>
    %475 = arith.addf %473, %474 : vector<2x32xf32>
    %476 = math.tanh %475 : vector<2x32xf32>
    %477 = arith.mulf %470, %476 : vector<2x32xf32>
    %478 = vector.extract_strided_slice %350 {offsets = [14, 0], sizes = [2, 128], strides = [1, 1]} : vector<16x128xf32> to vector<2x128xf32>
    %cst_83 = arith.constant dense<0.000000e+00> : vector<2x128xf32>
    %479 = tpu.matmul %477, %351, %cst_83 {dimension_numbers = #tpu.dot_dimension_numbers<[1], [0], [0], [1], [0, 0, 1, 1], [], []>} : vector<2x32xf32>, vector<32x128xf32>, vector<2x128xf32> -> vector<2x128xf32>
    %480 = arith.addf %478, %479 : vector<2x128xf32>
    %481 = arith.negf %480 : vector<2x128xf32>
    %482 = math.exp %481 : vector<2x128xf32>
    %cst_84 = arith.constant 1.000000e+00 : f32
    %483 = vector.broadcast %cst_84 : f32 to vector<2x128xf32>
    %484 = arith.addf %483, %482 : vector<2x128xf32>
    %485 = arith.divf %483, %484 : vector<2x128xf32>
    %486 = vector.extract_strided_slice %485 {offsets = [0, 0], sizes = [2, 32], strides = [1, 1]} : vector<2x128xf32> to vector<2x32xf32>
    %487 = vector.extract_strided_slice %485 {offsets = [0, 32], sizes = [2, 32], strides = [1, 1]} : vector<2x128xf32> to vector<2x32xf32>
    %488 = vector.extract_strided_slice %485 {offsets = [0, 96], sizes = [2, 32], strides = [1, 1]} : vector<2x128xf32> to vector<2x32xf32>
    %489 = vector.extract_strided_slice %480 {offsets = [0, 64], sizes = [2, 32], strides = [1, 1]} : vector<2x128xf32> to vector<2x32xf32>
    %490 = math.tanh %489 : vector<2x32xf32>
    %491 = arith.mulf %487, %475 : vector<2x32xf32>
    %492 = arith.mulf %486, %490 : vector<2x32xf32>
    %493 = arith.addf %491, %492 : vector<2x32xf32>
    %494 = math.tanh %493 : vector<2x32xf32>
    %495 = arith.mulf %488, %494 : vector<2x32xf32>
    %496 = vector.extract_strided_slice %349 {offsets = [14, 128], sizes = [2, 128], strides = [1, 1]} : vector<16x256xf32> to vector<2x128xf32>
    %497 = arith.negf %496 : vector<2x128xf32>
    %498 = math.exp %497 : vector<2x128xf32>
    %cst_85 = arith.constant 1.000000e+00 : f32
    %499 = vector.broadcast %cst_85 : f32 to vector<2x128xf32>
    %500 = arith.addf %499, %498 : vector<2x128xf32>
    %501 = arith.divf %499, %500 : vector<2x128xf32>
    %502 = vector.extract_strided_slice %501 {offsets = [0, 0], sizes = [2, 32], strides = [1, 1]} : vector<2x128xf32> to vector<2x32xf32>
    %503 = vector.extract_strided_slice %501 {offsets = [0, 32], sizes = [2, 32], strides = [1, 1]} : vector<2x128xf32> to vector<2x32xf32>
    %504 = vector.extract_strided_slice %501 {offsets = [0, 96], sizes = [2, 32], strides = [1, 1]} : vector<2x128xf32> to vector<2x32xf32>
    %505 = vector.extract_strided_slice %496 {offsets = [0, 64], sizes = [2, 32], strides = [1, 1]} : vector<2x128xf32> to vector<2x32xf32>
    %506 = math.tanh %505 : vector<2x32xf32>
    %507 = arith.mulf %503, %23 : vector<2x32xf32>
    %508 = arith.mulf %502, %506 : vector<2x32xf32>
    %509 = arith.addf %507, %508 : vector<2x32xf32>
    %510 = math.tanh %509 : vector<2x32xf32>
    %511 = arith.mulf %504, %510 : vector<2x32xf32>
    %512 = tpu.concatenate %495, %511 in 1 : vector<2x32xf32>, vector<2x32xf32> -> vector<2x64xf32>
    %c296 = arith.constant 296 : index
    %c0_86 = arith.constant 0 : index
    %513 = vector.load %arg1[%c296, %c0_86] : memref<504x128xf32, #tpu.memory_space<vmem>>, vector<64x128xf32>
    %cst_87 = arith.constant dense<0.000000e+00> : vector<2x128xf32>
    %514 = tpu.matmul %512, %513, %cst_87 {dimension_numbers = #tpu.dot_dimension_numbers<[1], [0], [0], [1], [0, 0, 1, 1], [], []>} : vector<2x64xf32>, vector<64x128xf32>, vector<2x128xf32> -> vector<2x128xf32>
    %c360 = arith.constant 360 : index
    %c0_88 = arith.constant 0 : index
    %515 = vector.load %arg1[%c360, %c0_88] : memref<504x128xf32, #tpu.memory_space<vmem>>, vector<1x128xf32>
    %516 = vector.broadcast %515 : vector<1x128xf32> to vector<2x128xf32>
    %517 = arith.addf %514, %516 : vector<2x128xf32>
    %cst_89 = arith.constant 0.000000e+00 : f32
    %518 = vector.broadcast %cst_89 : f32 to vector<2x128xf32>
    %519 = arith.maximumf %517, %518 : vector<2x128xf32>
    %c368 = arith.constant 368 : index
    %c0_90 = arith.constant 0 : index
    %520 = vector.load %arg1[%c368, %c0_90] : memref<504x128xf32, #tpu.memory_space<vmem>>, vector<128x128xf32>
    %cst_91 = arith.constant dense<0.000000e+00> : vector<2x128xf32>
    %521 = tpu.matmul %519, %520, %cst_91 {dimension_numbers = #tpu.dot_dimension_numbers<[1], [0], [0], [1], [0, 0, 1, 1], [], []>} : vector<2x128xf32>, vector<128x128xf32>, vector<2x128xf32> -> vector<2x128xf32>
    %c496 = arith.constant 496 : index
    %c0_92 = arith.constant 0 : index
    %522 = vector.load %arg1[%c496, %c0_92] : memref<504x128xf32, #tpu.memory_space<vmem>>, vector<1x128xf32>
    %523 = vector.broadcast %522 : vector<1x128xf32> to vector<2x128xf32>
    %524 = arith.addf %521, %523 : vector<2x128xf32>
    %525 = vector.extract_strided_slice %524 {offsets = [0, 0], sizes = [2, 2], strides = [1, 1]} : vector<2x128xf32> to vector<2x2xf32>
    %526 = arith.negf %525 : vector<2x2xf32>
    %527 = math.exp %526 : vector<2x2xf32>
    %cst_93 = arith.constant 1.000000e+00 : f32
    %528 = vector.broadcast %cst_93 : f32 to vector<2x2xf32>
    %529 = arith.addf %528, %527 : vector<2x2xf32>
    %530 = arith.divf %528, %529 : vector<2x2xf32>
    %c0_94 = arith.constant 0 : index
    %c0_95 = arith.constant 0 : index
    %531 = vector.load %arg3[%c0_94, %c0_95] : memref<2x2xf32, #tpu.memory_space<vmem>>, vector<2x2xf32>
    tpu.vector_store %arg3[%c0_94, %c0_95], %530 {strides = array<i32>} : memref<2x2xf32, #tpu.memory_space<vmem>>, vector<2x2xf32>,
    return
  }
}

</mosaic_0001>

<bundles_post_ra>
// kernel: forward.1
= control target key start
LH: loop header
LB: loop body
LE: loop exit
PB: predicated region body
PF: predicated region fallthrough
CT: control target
= control target key end

     0   :  { %8 = vsyncpa [#allocation4], 0  ;;  %s4053_s0 = inlined_call_operand.vmem [shape: s32[16,1], index: 0, kind: input, shape index: {}]   ;;  %s4054_s1 = inlined_call_operand.hbm [shape: f32[504,128], index: 1, kind: input, shape index: {}]   ;;  %s4055_s2 = inlined_call_operand.hbm [shape: f32[272,256], index: 2, kind: input, shape index: {}]   ;;  %s4056_s3 = inlined_call_operand.hbm [shape: f32[2,2], index: 3, kind: output, shape index: {}]  }
   0x1   :  { %9 = vsyncpa [#allocation7], 0 }
   0x2   :  { %10 = vsyncpa [#allocation5], 0  ;;  %s3428_s12 = smov [#allocation3]  }
   0x3   :  { %s18_s13 = sshll.u32 %s3428_s12, 4  ;;  %s19_s13 = int_to_ptr.vmem [resolvable:$true] %s18_s13 }
   0x4   :  { %s3370_s14 = scalar_lea.vmem %s19_s13, 8064  ;;  %p3375_p1 = scmp.lt.s32.totalorder %s19_s13, %s19_s13 }
   0x5   :  { %p3371_p0 = scmp.ne.s32.totalorder %s19_s13, %s3370_s14  ;;  %p3376_p2 = scmp.lt.s32.totalorder %s3370_s14, %s3370_s14 }
   0x7   :  { %p3377_p3 = por %p3376_p2, %p3375_p1 }
   0x9   :  { %p3378_p4 = pnand %p3377_p3, %p3371_p0 }
   0xb   :  { %3381 = shalt.err (!%p3378_p4)
}
   0xc   :  { %s3429_s15 = smov 128   ;;  %s3430_s16 = smov 8  }
   0xd   :  { %24 = dma.hbm_to_vmem [thread:$0]  %s4054_s1, 8064, %s19_s13, [#allocation4], %s3429_s15, %s3429_s15, %s3430_s16  }
   0xe   :  { %s3431_s19 = smov [#allocation6]  }
   0xf   :  { %s30_s20 = sshll.u32 %s3431_s19, 4  ;;  %s31_s20 = int_to_ptr.vmem [resolvable:$true] %s30_s20 }
  0x10   :  { %s3390_s21 = scalar_lea.vmem %s31_s20, 8704  ;;  %p3395_p6 = scmp.lt.s32.totalorder %s31_s20, %s31_s20 }
  0x11   :  { %p3391_p5 = scmp.ne.s32.totalorder %s31_s20, %s3390_s21  ;;  %p3396_p7 = scmp.lt.s32.totalorder %s3390_s21, %s3390_s21 }
  0x13   :  { %p3397_p8 = por %p3396_p7, %p3395_p6 }
  0x15   :  { %p3398_p9 = pnand %p3397_p8, %p3391_p5 }
  0x17   :  { %3401 = shalt.err (!%p3398_p9)
}
  0x18   :  { %s3432_s22 = smov 256   ;;  %s3433_s23 = smov 16  }
  0x19   :  { %36 = dma.hbm_to_vmem [thread:$0]  %s4055_s2, 8704, %s31_s20, [#allocation7], %s3432_s22, %s3432_s22, %s3433_s23  }
  0x1a   :  { %3422 = dma.done.wait [#allocation4], 8064  }
  0x1b   :  { %3423 = vsyncadd [#allocation4], 4294959232 }
  0x1c   :  { %3424 = dma.done.wait [#allocation7], 8704  }
  0x1d   :  { %3425 = vsyncadd [#allocation7], 4294958592  ;;  %v3434_v0 = vmov 0   ;;  %v43_v1 = vld [vmem:[%s4053_s0] sm:$0xff]  ;;  %v74_v2 = vld [vmem:[#allocation3 + $0x78] sm:$0xff]  ;;  %v45_v33 = vlaneseq  ;;  %v3435_v36 = vmov 1.0  }
  0x1e   :  { %3157 = vset.pattern.permute.xlu0 %v3434_v0  ;;  %2932 = vmatprep.subr.mxu0 %v74_v2  ;;  %v73_v3 = vld [vmem:[#allocation3 + $0x70] sm:$0xff]  ;;  %v44_v4 = vld [vmem:[%s4053_s0 + $0x8] sm:$0xff]  ;;  %v72_v5 = vld [vmem:[#allocation3 + $0x68] sm:$0xff]  ;;  %s3437_s0 = smov 64   ;;  %s3438_s2 = smov 32   ;;  %vm518_vm2 = vcmask 254976  }
  0x1f   :  { %48 = vperm.xlu0 %3157, %v43_v1   ;;  %2933 = vmatpush3.msra.mxu0 %v74_v2  ;;  %v71_v6 = vld [vmem:[#allocation3 + $0x60] sm:$0xff]  ;;  %v70_v7 = vld [vmem:[#allocation3 + $0x58] sm:$0xff]  ;;  %v164_v9 = vld [vmem:[#allocation3 + $0xf0] sm:$0xff]  ;;  %v46_v34 = vand.u32 127, %v45_v33  ;;  %vm530_vm3 = vcmask 261120   ;;  %vm386_vm4 = vcmask 523264  }
  0x20   :  { %2934 = vmatprep.subr.mxu0 %v73_v3  ;;  %v165_v8 = vld [vmem:[#allocation3 + $0xf8] sm:$0xff]  ;;  %v69_v10 = vld [vmem:[#allocation3 + $0x50] sm:$0xff]  ;;  %v163_v11 = vld [vmem:[#allocation3 + $0xe8] sm:$0xff]  ;;  %vm672_vm5 = vcmask 257026   ;;  %vm826_vm6 = vcmask 259076   ;;  %vm977_vm7 = vcmask 261126  }
  0x21   :  { %2935 = vmatpush3.msra.mxu0 %v73_v3  ;;  %2967 = vmatprep.subr.mxu1 %v165_v8  ;;  %v68_v12 = vld [vmem:[#allocation3 + $0x48] sm:$0xff]  ;;  %v162_v13 = vld [vmem:[#allocation3 + $0xe0] sm:$0xff]  ;;  %v161_v15 = vld [vmem:[#allocation3 + $0xd8] sm:$0xff]  ;;  %vm678_vm8 = vcmask 521476   ;;  %vm524_vm9 = vcmask 523526   ;;  %vm832_vm10 = vcmask 519426  }
  0x22   :  { %2936 = vmatprep.subr.mxu0 %v72_v5  ;;  %2968 = vmatpush3.msra.mxu1 %v165_v8  ;;  %v67_v14 = vld [vmem:[#allocation3 + $0x40] sm:$0xff]  ;;  %v66_v16 = vld [vmem:[#allocation3 + $0x38] sm:$0xff]  ;;  %v160_v17 = vld [vmem:[#allocation3 + $0xd0] sm:$0xff]  ;;  %vm3439_vm11 = vmmov 0   ;;  %vm983_vm12 = vcmask 517376   ;;  %s3440_s29 = smov [#allocation8]  }
  0x23   :  { %51 = vperm.xlu0 %3157, %v44_v4   ;;  %2937 = vmatpush3.msra.mxu0 %v72_v5  ;;  %v65_v18 = vld [vmem:[#allocation3 + $0x30] sm:$0xff]  ;;  %v159_v19 = vld [vmem:[#allocation3 + $0xc8] sm:$0xff]  ;;  %v158_v21 = vld [vmem:[#allocation3 + $0xc0] sm:$0xff]  ;;  %s2770_s30 = sshll.u32 %s3440_s29, 4  ;;  %vm2762_vm13 = vcmask 9216   ;;  %s2771_s30 = int_to_ptr.vmem [resolvable:$true] %s2770_s30 }
  0x24   :  { %2938 = vmatprep.subr.mxu0 %v71_v6  ;;  %2969 = vmatprep.subr.mxu1 %v164_v9  ;;  %v64_v20 = vld [vmem:[#allocation3 + $0x28] sm:$0xff]  ;;  %v63_v22 = vld [vmem:[#allocation3 + $0x20] sm:$0xff]  ;;  %v157_v23 = vld [vmem:[#allocation3 + $0xb8] sm:$0xff]  ;;  %s3402_s4 = scalar_lea.vmem %s2771_s30, 32  ;;  %p3407_p11 = scmp.lt.s32.totalorder %s2771_s30, %s2771_s30 }
  0x25   :  { %2939 = vmatpush3.msra.mxu0 %v71_v6  ;;  %2970 = vmatpush3.msra.mxu1 %v164_v9  ;;  %v62_v24 = vld [vmem:[#allocation3 + $0x18] sm:$0xff]  ;;  %v156_v25 = vld [vmem:[#allocation3 + $0xb0] sm:$0xff]  ;;  %v155_v27 = vld [vmem:[#allocation3 + $0xa8] sm:$0xff]  ;;  %p3403_p10 = scmp.ne.s32.totalorder %s2771_s30, %s3402_s4  ;;  %p3408_p12 = scmp.lt.s32.totalorder %s3402_s4, %s3402_s4 }
  0x26   :  { %2940 = vmatprep.subr.mxu0 %v70_v7  ;;  %2971 = vmatprep.subr.mxu1 %v163_v11  ;;  %v61_v26 = vld [vmem:[#allocation3 + $0x10] sm:$0xff]  ;;  %v60_v28 = vld [vmem:[#allocation3 + $0x8] sm:$0xff]  ;;  %v154_v29 = vld [vmem:[#allocation3 + $0xa0] sm:$0xff] }
  0x27   :  { %2941 = vmatpush3.msra.mxu0 %v70_v7  ;;  %2972 = vmatpush3.msra.mxu1 %v163_v11  ;;  %v59_v30 = vld [vmem:[#allocation3] sm:$0xff]  ;;  %v153_v31 = vld [vmem:[#allocation3 + $0x98] sm:$0xff]  ;;  %v152_v32 = vld [vmem:[#allocation3 + $0x90] sm:$0xff]  ;;  %p3409_p13 = por %p3408_p12, %p3407_p11 }
  0x28   :  { %2942 = vmatprep.subr.mxu0 %v69_v10  ;;  %2973 = vmatprep.subr.mxu1 %v162_v13  ;;  %v151_v38 = vld [vmem:[#allocation3 + $0x88] sm:$0xff]  ;;  %v150_v39 = vld [vmem:[#allocation3 + $0x80] sm:$0xff]  ;;  %v279_v40 = vld [vmem:[#allocation6 + $0xf8] sm:$0xff] }
  0x29   :  { %2943 = vmatpush3.msra.mxu0 %v69_v10  ;;  %2974 = vmatpush3.msra.mxu1 %v162_v13  ;;  %v278_v41 = vld [vmem:[#allocation6 + $0xf0] sm:$0xff]  ;;  %v277_v42 = vld [vmem:[#allocation6 + $0xe8] sm:$0xff]  ;;  %v276_v43 = vld [vmem:[#allocation6 + $0xe0] sm:$0xff]  ;;  %p3410_p0 = pnand %p3409_p13, %p3403_p10 }
  0x2a   :  { %2944 = vmatprep.subr.mxu0 %v68_v12  ;;  %2975 = vmatprep.subr.mxu1 %v161_v15  ;;  %v275_v44 = vld [vmem:[#allocation6 + $0xd8] sm:$0xff]  ;;  %v274_v45 = vld [vmem:[#allocation6 + $0xd0] sm:$0xff]  ;;  %v273_v46 = vld [vmem:[#allocation6 + $0xc8] sm:$0xff] }
  0x2b   :  { %2945 = vmatpush3.msra.mxu0 %v68_v12  ;;  %2976 = vmatpush3.msra.mxu1 %v161_v15  ;;  %v272_v47 = vld [vmem:[#allocation6 + $0xc0] sm:$0xff]  ;;  %v271_v48 = vld [vmem:[#allocation6 + $0xb8] sm:$0xff]  ;;  %v3474_v49 = vld [vmem:[#allocation6 + $0x188] sm:$0xff] }
  0x2c   :  { %2946 = vmatprep.subr.mxu0 %v67_v14  ;;  %2977 = vmatprep.subr.mxu1 %v160_v17  ;;  %v270_v50 = vld [vmem:[#allocation6 + $0xb0] sm:$0xff]  ;;  %v269_v51 = vld [vmem:[#allocation6 + $0xa8] sm:$0xff]  ;;  %v268_v52 = vld [vmem:[#allocation6 + $0xa0] sm:$0xff] }
  0x2d   :  { %2947 = vmatpush3.msra.mxu0 %v67_v14  ;;  %2978 = vmatpush3.msra.mxu1 %v160_v17  ;;  %v267_v53 = vld [vmem:[#allocation6 + $0x98] sm:$0xff]  ;;  %v266_v54 = vld [vmem:[#allocation6 + $0x90] sm:$0xff]  ;;  %v265_v55 = vld [vmem:[#allocation6 + $0x88] sm:$0xff] }
  0x2e   :  { %2948 = vmatprep.subr.mxu0 %v66_v16  ;;  %2979 = vmatprep.subr.mxu1 %v159_v19  ;;  %v264_v56 = vld [vmem:[#allocation6 + $0x80] sm:$0xff]  ;;  %v263_v57 = vld [vmem:[#allocation6 + $0x78] sm:$0xff]  ;;  %v262_v58 = vld [vmem:[#allocation6 + $0x70] sm:$0xff] }
  0x2f   :  { %2949 = vmatpush3.msra.mxu0 %v66_v16  ;;  %2980 = vmatpush3.msra.mxu1 %v159_v19  ;;  %v261_v59 = vld [vmem:[#allocation6 + $0x68] sm:$0xff]  ;;  %v260_v60 = vld [vmem:[#allocation6 + $0x60] sm:$0xff]  ;;  %v259_v61 = vld [vmem:[#allocation6 + $0x58] sm:$0xff] }
  0x30   :  { %2950 = vmatprep.subr.mxu0 %v65_v18  ;;  %2981 = vmatprep.subr.mxu1 %v158_v21  ;;  %v258_v62 = vld [vmem:[#allocation6 + $0x50] sm:$0xff]  ;;  %v257_v63 = vld [vmem:[#allocation6 + $0x48] sm:$0xff]  ;;  %v256_v0 = vld [vmem:[#allocation6 + $0x40] sm:$0xff] }
  0x31   :  { %2951 = vmatpush3.msra.mxu0 %v65_v18  ;;  %2982 = vmatpush3.msra.mxu1 %v158_v21  ;;  %v255_v1 = vld [vmem:[#allocation6 + $0x38] sm:$0xff]  ;;  %v3477_v4 = vld [vmem:[#allocation6 + $0x180] sm:$0xff]  ;;  %v3481_v6 = vld [vmem:[#allocation6 + $0x170] sm:$0xff] }
  0x32   :  { %2952 = vmatprep.subr.mxu0 %v64_v20  ;;  %2983 = vmatprep.subr.mxu1 %v157_v23  ;;  %v3479_v5 = vld [vmem:[#allocation6 + $0x178] sm:$0xff]  ;;  %v3484_v7 = vld [vmem:[#allocation6 + $0x168] sm:$0xff]  ;;  %v3487_v8 = vld [vmem:[#allocation6 + $0x160] sm:$0xff] }
  0x33   :  { %2953 = vmatpush3.msra.mxu0 %v64_v20  ;;  %2984 = vmatpush3.msra.mxu1 %v157_v23  ;;  %v3490_v9 = vld [vmem:[#allocation6 + $0x158] sm:$0xff]  ;;  %v254_v10 = vld [vmem:[#allocation6 + $0x30] sm:$0xff]  ;;  %v253_v12 = vld [vmem:[#allocation6 + $0x28] sm:$0xff] }
  0x34   :  { %2954 = vmatprep.subr.mxu0 %v63_v22  ;;  %2985 = vmatprep.subr.mxu1 %v156_v25  ;;  %v3495_v11 = vld [vmem:[#allocation6 + $0x150] sm:$0xff]  ;;  %v3498_v13 = vld [vmem:[#allocation6 + $0x148] sm:$0xff]  ;;  %v252_v14 = vld [vmem:[#allocation6 + $0x20] sm:$0xff] }
  0x35   :  { %2955 = vmatpush3.msra.mxu0 %v63_v22  ;;  %2986 = vmatpush3.msra.mxu1 %v156_v25  ;;  %v3501_v15 = vld [vmem:[#allocation6 + $0x140] sm:$0xff]  ;;  %v251_v16 = vld [vmem:[#allocation6 + $0x18] sm:$0xff]  ;;  %v250_v18 = vld [vmem:[#allocation6 + $0x10] sm:$0xff] }
  0x36   :  { %2956 = vmatprep.subr.mxu0 %v62_v24  ;;  %2987 = vmatprep.subr.mxu1 %v155_v27  ;;  %v3504_v17 = vld [vmem:[#allocation6 + $0x138] sm:$0xff]  ;;  %v3507_v19 = vld [vmem:[#allocation6 + $0x130] sm:$0xff]  ;;  %v249_v20 = vld [vmem:[#allocation6 + $0x8] sm:$0xff] }
  0x37   :  { %2957 = vmatpush3.msra.mxu0 %v62_v24  ;;  %2988 = vmatpush3.msra.mxu1 %v155_v27  ;;  %v3510_v21 = vld [vmem:[#allocation6 + $0x128] sm:$0xff]  ;;  %v248_v22 = vld [vmem:[#allocation6] sm:$0xff]  ;;  %v3436_v24 = vmov 0.0   ;;  %v3516_v25 = vld [vmem:[#allocation6 + $0x118] sm:$0xff] }
  0x38   :  { %2958 = vmatprep.subr.mxu0 %v61_v26  ;;  %2989 = vmatprep.subr.mxu1 %v154_v29  ;;  %v3513_v23 = vld [vmem:[#allocation6 + $0x120] sm:$0xff] }
  0x39   :  { %2959 = vmatpush3.msra.mxu0 %v61_v26  ;;  %2990 = vmatpush3.msra.mxu1 %v154_v29  ;;  %v3519_v26 = vld [vmem:[#allocation6 + $0x110] sm:$0xff] }
  0x3a   :  { %2960 = vmatprep.subr.mxu0 %v60_v28  ;;  %2991 = vmatprep.subr.mxu1 %v153_v31 }
  0x3b   :  { %2961 = vmatpush3.msra.mxu0 %v60_v28  ;;  %2992 = vmatpush3.msra.mxu1 %v153_v31  ;;  %v2784_v28 = vld [vmem:[#allocation3 + $0x100] ss:$0 sm:$0xff] }
  0x3c   :  { %2962 = vmatprep.subr.mxu0 %v59_v30  ;;  %2993 = vmatprep.subr.mxu1 %v152_v32 }
  0x3d   :  { %2963 = vmatpush3.msra.mxu0 %v59_v30  ;;  %2994 = vmatpush3.msra.mxu1 %v152_v32 }
  0x3e   :  { %2995 = vmatprep.subr.mxu1 %v151_v38  ;;  %293 = vmatprep.subr.mxu0 %v279_v40 }
  0x3f   :  { %2996 = vmatpush3.msra.mxu1 %v151_v38 }
  0x40   :  { %2997 = vmatprep.subr.mxu1 %v150_v39 }
  0x41   :  { %2998 = vmatpush3.msra.mxu1 %v150_v39 }
  0x42   :  { %406 = vmatprep.subr.mxu1 %v3474_v49 }
  0x9a   :  { %v49_v35 = vpop.permute.xlu0 %48 }
  0x9b   :  { %vm53_vm0 = vcmp.eq.s32.totalorder %v46_v34, %v49_v35  ;;  %v3563_v35 = vshrl.u32 %v45_v33, 7 }
  0x9c   :  { %2964 = vmatprep.mubr.msk.f32.mxu0 %vm53_vm0, %v3435_v36 }
  0x9d   :  { %v285_v38 = vsub.s32 0, %v3563_v35 }
  0x9e   :  { %v52_v37 = vpop.permute.xlu0 %51 }
  0x9f   :  { %vm54_vm1 = vcmp.eq.s32.totalorder %v46_v34, %v52_v37  ;;  %v281_v37 = vld [vmem:[#allocation6 + $0x100] ss:$8 sm:$0x3] }
  0xa0   :  { %2965 = vmatmul.mubr.msk.f32.vlgmr.msra.gmra.mxu0 %vm54_vm1, %v3435_v36  ;;  %v289_v36 = vsub.s32 1, %v3563_v35 }
  0xa1   :  { %294 = vmatpush1.msra.mxu0 %v278_v41  ;;  %357 = vmatprep.mubr.f32.mxu0 %v3436_v24 }
  0xa2   :  { %295 = vmatprep.subr.mxu0 %v277_v42  ;;  %v290_v39 = vrot.slane %v281_v37, %v289_v36 }
  0xa3   :  { %296 = vmatpush1.msra.mxu0 %v276_v43  ;;  %v286_v43 = vrot.slane %v281_v37, %v285_v38 }
  0xa4   :  { %297 = vmatprep.subr.mxu0 %v275_v44 }
  0xa5   :  { %298 = vmatpush1.msra.mxu0 %v274_v45 }
  0xa6   :  { %299 = vmatprep.subr.mxu0 %v273_v46 }
  0xa7   :  { %300 = vmatpush1.msra.mxu0 %v272_v47 }
  0xa8   :  { %301 = vmatprep.subr.mxu0 %v271_v48 }
  0xa9   :  { %302 = vmatpush1.msra.mxu0 %v270_v50 }
  0xaa   :  { %303 = vmatprep.subr.mxu0 %v269_v51 }
  0xab   :  { %304 = vmatpush1.msra.mxu0 %v268_v52 }
  0xac   :  { %305 = vmatprep.subr.mxu0 %v267_v53 }
  0xad   :  { %306 = vmatpush1.msra.mxu0 %v266_v54 }
  0xae   :  { %307 = vmatprep.subr.mxu0 %v265_v55 }
  0xaf   :  { %308 = vmatpush1.msra.mxu0 %v264_v56 }
  0xb0   :  { %309 = vmatprep.subr.mxu0 %v263_v57 }
  0xb1   :  { %310 = vmatpush1.msra.mxu0 %v262_v58 }
  0xb2   :  { %311 = vmatprep.subr.mxu0 %v261_v59 }
  0xb3   :  { %312 = vmatpush1.msra.mxu0 %v260_v60 }
  0xb4   :  { %313 = vmatprep.subr.mxu0 %v259_v61 }
  0xb5   :  { %314 = vmatpush1.msra.mxu0 %v258_v62 }
  0xb6   :  { %315 = vmatprep.subr.mxu0 %v257_v63 }
  0xb7   :  { %316 = vmatpush1.msra.mxu0 %v256_v0 }
  0xb8   :  { %317 = vmatprep.subr.mxu0 %v255_v1 }
  0xb9   :  { %318 = vmatpush1.msra.mxu0 %v254_v10 }
  0xba   :  { %319 = vmatprep.subr.mxu0 %v253_v12 }
  0xbb   :  { %320 = vmatpush1.msra.mxu0 %v252_v14 }
  0xbc   :  { %321 = vmatprep.subr.mxu0 %v251_v16 }
  0xbd   :  { %322 = vmatpush1.msra.mxu0 %v250_v18 }
  0xbe   :  { %323 = vmatprep.subr.mxu0 %v249_v20 }
  0xbf   :  { %324 = vmatpush1.msra.mxu0 %v248_v22 }
  0xc0   :  { %705 = vmatprep.subr.mxu0 %v3474_v49 }
 0x160   :  { %v2966_v2 = vpop.f32.mrf.mxu0 }
 0x162   :  { %v141_v3 = vpop.f32.mrf.mxu0 }
 0x163   :  { %2999 = vmatprep.mubr.f32.mxu1 %v141_v3 }
 0x164   :  { %3000 = vmatmul.mubr.f32.vlgmr.msra.gmra.mxu1 %v2966_v2 }
 0x165   :  { %407 = vmatpush1.msra.mxu1 %v3477_v4  ;;  %454 = vmatprep.mubr.f32.mxu1 %v3436_v24 }
 0x166   :  { %408 = vmatprep.subr.mxu1 %v3479_v5 }
 0x167   :  { %409 = vmatpush1.msra.mxu1 %v3481_v6 }
 0x168   :  { %410 = vmatprep.subr.mxu1 %v3484_v7 }
 0x169   :  { %411 = vmatpush1.msra.mxu1 %v3487_v8 }
 0x16a   :  { %412 = vmatprep.subr.mxu1 %v3490_v9 }
 0x16b   :  { %413 = vmatpush1.msra.mxu1 %v3495_v11 }
 0x16c   :  { %414 = vmatprep.subr.mxu1 %v3498_v13 }
 0x16d   :  { %415 = vmatpush1.msra.mxu1 %v3501_v15 }
 0x16e   :  { %416 = vmatprep.subr.mxu1 %v3504_v17 }
 0x16f   :  { %417 = vmatpush1.msra.mxu1 %v3507_v19 }
 0x170   :  { %418 = vmatprep.subr.mxu1 %v3510_v21 }
 0x171   :  { %419 = vmatpush1.msra.mxu1 %v3513_v23 }
 0x172   :  { %420 = vmatprep.subr.mxu1 %v3516_v25 }
 0x173   :  { %421 = vmatpush1.msra.mxu1 %v3519_v26 }
 0x174   :  { %455 = vmatmul.mubr.f32.vlgmr.msra.gmra.mxu1 %v3436_v24  ;;  %551 = vmatprep.subr.mxu1 %v3474_v49 }
 0x175   :  { %552 = vmatpush1.msra.mxu1 %v3477_v4  ;;  %599 = vmatprep.mubr.f32.mxu1 %v3436_v24 }
 0x176   :  { %553 = vmatprep.subr.mxu1 %v3479_v5 }
 0x177   :  { %554 = vmatpush1.msra.mxu1 %v3481_v6 }
 0x178   :  { %555 = vmatprep.subr.mxu1 %v3484_v7 }
 0x179   :  { %556 = vmatpush1.msra.mxu1 %v3487_v8 }
 0x17a   :  { %557 = vmatprep.subr.mxu1 %v3490_v9 }
 0x17b   :  { %558 = vmatpush1.msra.mxu1 %v3495_v11 }
 0x17c   :  { %559 = vmatprep.subr.mxu1 %v3498_v13 }
 0x17d   :  { %560 = vmatpush1.msra.mxu1 %v3501_v15 }
 0x17e   :  { %561 = vmatprep.subr.mxu1 %v3504_v17 }
 0x17f   :  { %562 = vmatpush1.msra.mxu1 %v3507_v19 }
 0x180   :  { %563 = vmatprep.subr.mxu1 %v3510_v21 }
 0x181   :  { %564 = vmatpush1.msra.mxu1 %v3513_v23 }
 0x182   :  { %565 = vmatprep.subr.mxu1 %v3516_v25 }
 0x183   :  { %566 = vmatpush1.msra.mxu1 %v3519_v26 }
 0x184   :  { %859 = vmatprep.subr.mxu1 %v3474_v49 }
 0x224   :  { %v3001_v27 = vpop.f32.mrf.mxu1 }
 0x225   :  { %v243_v31 = vadd.f32 %v3001_v27, %v2784_v28 }
 0x226   :  { %v237_v29 = vpop.f32.mrf.mxu1 }
 0x227   :  { %v238_v30 = vadd.f32 %v2784_v28, %v237_v29  ;;  %v247_v34 = vmax.f32 %v243_v31, 0.0 }
 0x229   :  { %v246_v32 = vmax.f32 %v238_v30, 0.0 }
 0x22b   :  { %358 = vmatmul.mubr.f32.vlgmr.msra.gmra.mxu0 %v246_v32 }
 0x22c   :  { %363 = vmatprep.mubr.f32.mxu0 %v3436_v24  ;;  %706 = vmatpush1.msra.mxu0 %v3477_v4 }
 0x22d   :  { %707 = vmatprep.subr.mxu0 %v3479_v5 }
 0x22e   :  { %708 = vmatpush1.msra.mxu0 %v3481_v6 }
 0x22f   :  { %364 = vmatmul.mubr.f32.gmra.mxu0 %v247_v34  ;;  %709 = vmatprep.subr.mxu0 %v3484_v7 }
 0x230   :  { %710 = vmatpush1.msra.mxu0 %v3487_v8  ;;  %753 = vmatprep.mubr.f32.mxu0 %v3436_v24 }
 0x231   :  { %711 = vmatprep.subr.mxu0 %v3490_v9 }
 0x232   :  { %712 = vmatpush1.msra.mxu0 %v3495_v11 }
 0x233   :  { %713 = vmatprep.subr.mxu0 %v3498_v13 }
 0x234   :  { %714 = vmatpush1.msra.mxu0 %v3501_v15  ;;  %v456_v41 = vpop.f32.mrf.mxu1 }
 0x235   :  { %715 = vmatprep.subr.mxu0 %v3504_v17 }
 0x236   :  { %716 = vmatpush1.msra.mxu0 %v3507_v19  ;;  %v458_v46 = vpop.f32.mrf.mxu1 }
 0x237   :  { %717 = vmatprep.subr.mxu0 %v3510_v21  ;;  %v487_v50 = vrot.slane %v458_v46, 2 }
 0x238   :  { %718 = vmatpush1.msra.mxu0 %v3513_v23 }
 0x239   :  { %719 = vmatprep.subr.mxu0 %v3516_v25 }
 0x23a   :  { %720 = vmatpush1.msra.mxu0 %v3519_v26 }
 0x23b   :  { %1010 = vmatprep.subr.mxu0 %v3474_v49 }
 0x2eb   :  { %v359_v40 = vpop.f32.mrf.mxu0 }
 0x2ec   :  { %v3575_v48 = vadd.f32 %v359_v40, %v286_v43 }
 0x2ed   :  { %v361_v42 = vpop.f32.mrf.mxu0 }
 0x2ee   :  { %v3571_v44 = vadd.f32 %v361_v42, %v290_v39  ;;  %v461_v53 = vadd.f32 %v456_v41, %v3575_v48 }
 0x2ef   :  { %v365_v45 = vpop.f32.mrf.mxu0 }
 0x2f0   :  { %v3573_v33 = vadd.f32 %v365_v45, %v286_v43  ;;  %v2785_v57 = vmul.f32 -1.442695, %v461_v53 }
 0x2f1   :  { %v367_v47 = vpop.f32.mrf.mxu0 }
 0x2f2   :  { %v3577_v51 = vadd.f32 %v367_v47, %v290_v39 }
 0x2f4   :  { %v489_v52 = vadd.f32 %v487_v50, %v3577_v51 }
 0x2f6   :  { %3158 = vtanh.f32 %v489_v52  ;;  %v2786_v56 = vmul.f32 -1.442695, %v489_v52 }
 0x2f7   :  { %3160 = vtanh.f32 %v461_v53 }
 0x2f8   :  { %3162 = vpow2.f32 %v2786_v56 }
 0x2f9   :  { %3164 = vpow2.f32 %v2785_v57 }
 0x303   :  { %v3159_v54 = vpop.eup %3158 }
 0x304   :  { %499 = vrot.lane.b32.xlu1 %v3159_v54, %s3437_s0  ;;  %v3161_v55 = vpop.eup %3160 }
 0x305   :  { %v3163_v58 = vpop.eup %3162 }
 0x306   :  { %v493_v59 = vadd.f32 1.0, %v3163_v58  ;;  %v3165_v60 = vpop.eup %3164 }
 0x307   :  { %v465_v61 = vadd.f32 1.0, %v3165_v60 }
 0x308   :  { %471 = vrot.lane.b32.xlu1 %v3161_v55, %s3437_s0  ;;  %3166 = vrcp.f32 %v493_v59 }
 0x309   :  { %3168 = vrcp.f32 %v465_v61 }
 0x315   :  { %v3167_v62 = vpop.eup %3166 }
 0x316   :  { %v3169_v1 = vpop.eup %3168  ;;  %v497_v10 = vmul.f32 0.0, %v3167_v62 }
 0x317   :  { %v469_v16 = vmul.f32 0.0, %v3169_v1 }
 0x376   :  { %v500_v63 = vpop.permute.xlu1 %499 }
 0x377   :  { %v502_v0 = vmul.f32 %v3167_v62, %v500_v63 }
 0x379   :  { %504 = vrot.lane.b32.xlu0 %v502_v0, %s3438_s2 }
 0x37a   :  { %v472_v2 = vpop.permute.xlu1 %471 }
 0x37b   :  { %v474_v3 = vmul.f32 %v3169_v1, %v472_v2 }
 0x37d   :  { %476 = vrot.lane.b32.xlu1 %v474_v3, %s3438_s2 }
 0x3eb   :  { %v505_v12 = vpop.permute.xlu0 %504 }
 0x3ec   :  { %v3585_v14 = vadd.f32 %v505_v12, %v497_v10 }
 0x3ee   :  { %3170 = vtanh.f32 %v3585_v14  ;;  %v649_v2 = vrot.slane %v3585_v14, 2 }
 0x3ef   :  { %v477_v18 = vpop.permute.xlu1 %476 }
 0x3f0   :  { %v3588_v20 = vadd.f32 %v477_v18, %v469_v16 }
 0x3f2   :  { %3172 = vtanh.f32 %v3588_v20  ;;  %v618_v0 = vrot.slane %v3588_v20, 6 }
 0x3fb   :  { %v3171_v22 = vpop.eup %3170 }
 0x3fc   :  { %510 = vrot.lane.b32.xlu0 %v3171_v22, %s3437_s0 }
 0x3ff   :  { %v3173_v27 = vpop.eup %3172 }
 0x400   :  { %482 = vrot.lane.b32.xlu1 %v3173_v27, %s3437_s0 }
 0x46e   :  { %v511_v28 = vpop.permute.xlu0 %510 }
 0x46f   :  { %v3593_v29 = vmul.f32 %v3167_v62, %v511_v28 }
 0x471   :  { %v526_v30 = vrot.slane %v3593_v29, 6 }
 0x472   :  { %v483_v31 = vpop.permute.xlu1 %482 }
 0x473   :  { %v485_v32 = vmul.f32 %v3169_v1, %v483_v31  ;;  %527 = vrot.lane.b32.xlu1 %v526_v30, %s3437_s0 }
 0x475   :  { %515 = vrot.lane.b32.xlu0 %v485_v32, %s3438_s2 }
 0x4e5   :  { %v528_v34 = vpop.permute.xlu1 %527 }
 0x4e7   :  { %v516_v37 = vpop.permute.xlu0 %515 }
 0x4e8   :  { %519 = vst.msk [vmem:[#allocation2] sm:$0x3] %vm518_vm2, %v516_v37  ;;  %v531_v39 = vsel %vm530_vm3, %v516_v37, %v528_v34 }
 0x4e9   :  { %2787 = vmatmul.mubr.msk.f32.vlgmr.msra.gmra.mxu1 %vm386_vm4, %v531_v39 }
 0x4ea   :  { %860 = vmatpush1.msra.mxu1 %v3477_v4  ;;  %907 = vmatprep.mubr.f32.mxu1 %v3436_v24 }
 0x4eb   :  { %861 = vmatprep.subr.mxu1 %v3479_v5 }
 0x4ec   :  { %862 = vmatpush1.msra.mxu1 %v3481_v6 }
 0x4ed   :  { %863 = vmatprep.subr.mxu1 %v3484_v7 }
 0x4ee   :  { %864 = vmatpush1.msra.mxu1 %v3487_v8 }
 0x4ef   :  { %865 = vmatprep.subr.mxu1 %v3490_v9 }
 0x4f0   :  { %866 = vmatpush1.msra.mxu1 %v3495_v11 }
 0x4f1   :  { %867 = vmatprep.subr.mxu1 %v3498_v13 }
 0x4f2   :  { %868 = vmatpush1.msra.mxu1 %v3501_v15 }
 0x4f3   :  { %869 = vmatprep.subr.mxu1 %v3504_v17 }
 0x4f4   :  { %870 = vmatpush1.msra.mxu1 %v3507_v19 }
 0x4f5   :  { %871 = vmatprep.subr.mxu1 %v3510_v21 }
 0x4f6   :  { %872 = vmatpush1.msra.mxu1 %v3513_v23 }
 0x4f7   :  { %873 = vmatprep.subr.mxu1 %v3516_v25 }
 0x4f8   :  { %874 = vmatpush1.msra.mxu1 %v3519_v26 }
 0x4f9   :  { %1158 = vmatprep.subr.mxu1 %v3474_v49 }
 0x5a9   :  { %v601_v40 = vpop.f32.mrf.mxu1 }
 0x5aa   :  { %v607_v41 = vrot.slane %v601_v40, 6 }
 0x5ab   :  { %v603_v42 = vpop.f32.mrf.mxu1 }
 0x5ac   :  { %v609_v43 = vadd.f32 %v607_v41, %v3575_v48  ;;  %v638_v45 = vrot.slane %v603_v42, 4 }
 0x5ae   :  { %3174 = vtanh.f32 %v609_v43  ;;  %v640_v46 = vadd.f32 %v638_v45, %v3577_v51  ;;  %v2788_v52 = vmul.f32 -1.442695, %v609_v43 }
 0x5b0   :  { %3176 = vtanh.f32 %v640_v46  ;;  %v2789_v53 = vmul.f32 -1.442695, %v640_v46 }
 0x5b1   :  { %3178 = vpow2.f32 %v2788_v52 }
 0x5b2   :  { %3180 = vpow2.f32 %v2789_v53 }
 0x5bb   :  { %v3175_v47 = vpop.eup %3174 }
 0x5bc   :  { %622 = vrot.lane.b32.xlu1 %v3175_v47, %s3437_s0 }
 0x5bd   :  { %v3177_v50 = vpop.eup %3176 }
 0x5be   :  { %653 = vrot.lane.b32.xlu0 %v3177_v50, %s3437_s0  ;;  %v3179_v54 = vpop.eup %3178 }
 0x5bf   :  { %v3181_v55 = vpop.eup %3180  ;;  %v613_v56 = vadd.f32 1.0, %v3179_v54 }
 0x5c0   :  { %v644_v57 = vadd.f32 1.0, %v3181_v55 }
 0x5c1   :  { %3182 = vrcp.f32 %v613_v56 }
 0x5c2   :  { %3184 = vrcp.f32 %v644_v57 }
 0x5ce   :  { %v3183_v58 = vpop.eup %3182 }
 0x5cf   :  { %v3185_v61 = vpop.eup %3184  ;;  %v620_v1 = vmul.f32 %v3183_v58, %v618_v0 }
 0x5d0   :  { %v651_v12 = vmul.f32 %v3185_v61, %v649_v2 }
 0x62e   :  { %v623_v59 = vpop.permute.xlu1 %622 }
 0x62f   :  { %v625_v60 = vmul.f32 %v3183_v58, %v623_v59 }
 0x630   :  { %v654_v62 = vpop.permute.xlu0 %653 }
 0x631   :  { %627 = vrot.lane.b32.xlu1 %v625_v60, %s3438_s2  ;;  %v656_v63 = vmul.f32 %v3185_v61, %v654_v62 }
 0x633   :  { %658 = vrot.lane.b32.xlu0 %v656_v63, %s3438_s2 }
 0x6a3   :  { %v628_v3 = vpop.permute.xlu1 %627 }
 0x6a4   :  { %v3626_v10 = vadd.f32 %v628_v3, %v620_v1 }
 0x6a5   :  { %v659_v16 = vpop.permute.xlu0 %658 }
 0x6a6   :  { %3186 = vtanh.f32 %v3626_v10  ;;  %v3629_v18 = vadd.f32 %v659_v16, %v651_v12  ;;  %v772_v0 = vrot.slane %v3626_v10, 6 }
 0x6a8   :  { %3188 = vtanh.f32 %v3629_v18  ;;  %v803_v2 = vrot.slane %v3629_v18, 2 }
 0x6b3   :  { %v3187_v22 = vpop.eup %3186 }
 0x6b4   :  { %633 = vrot.lane.b32.xlu1 %v3187_v22, %s3437_s0 }
 0x6b5   :  { %v3189_v27 = vpop.eup %3188 }
 0x6b6   :  { %664 = vrot.lane.b32.xlu0 %v3189_v27, %s3437_s0 }
 0x726   :  { %v634_v20 = vpop.permute.xlu1 %633 }
 0x727   :  { %v636_v28 = vmul.f32 %v3183_v58, %v634_v20 }
 0x728   :  { %v665_v14 = vpop.permute.xlu0 %664 }
 0x729   :  { %669 = vrot.lane.b32.xlu0 %v636_v28, %s3438_s2  ;;  %v3635_v30 = vmul.f32 %v3185_v61, %v665_v14 }
 0x72b   :  { %v680_v31 = vrot.slane %v3635_v30, 2 }
 0x72d   :  { %681 = vrot.lane.b32.xlu1 %v680_v31, %s3437_s0 }
 0x79b   :  { %v670_v32 = vpop.permute.xlu0 %669 }
 0x79c   :  { %673 = vst.msk [vmem:[#allocation2] sm:$0xc] %vm672_vm5, %v670_v32 }
 0x79f   :  { %v682_v34 = vpop.permute.xlu1 %681 }
 0x7a0   :  { %v684_v37 = vsel %vm530_vm3, %v670_v32, %v682_v34 }
 0x7a1   :  { %v686_v39 = vrot.slane %v684_v37, 2 }
 0x7a3   :  { %2790 = vmatmul.mubr.msk.f32.vlgmr.msra.gmra.mxu0 %vm386_vm4, %v686_v39 }
 0x7a4   :  { %1011 = vmatpush1.msra.mxu0 %v3477_v4  ;;  %1058 = vmatprep.mubr.f32.mxu0 %v3436_v24 }
 0x7a5   :  { %1012 = vmatprep.subr.mxu0 %v3479_v5 }
 0x7a6   :  { %1013 = vmatpush1.msra.mxu0 %v3481_v6 }
 0x7a7   :  { %1014 = vmatprep.subr.mxu0 %v3484_v7 }
 0x7a8   :  { %1015 = vmatpush1.msra.mxu0 %v3487_v8 }
 0x7a9   :  { %1016 = vmatprep.subr.mxu0 %v3490_v9 }
 0x7aa   :  { %1017 = vmatpush1.msra.mxu0 %v3495_v11 }
 0x7ab   :  { %1018 = vmatprep.subr.mxu0 %v3498_v13 }
 0x7ac   :  { %1019 = vmatpush1.msra.mxu0 %v3501_v15 }
 0x7ad   :  { %1020 = vmatprep.subr.mxu0 %v3504_v17 }
 0x7ae   :  { %1021 = vmatpush1.msra.mxu0 %v3507_v19 }
 0x7af   :  { %1022 = vmatprep.subr.mxu0 %v3510_v21 }
 0x7b0   :  { %1023 = vmatpush1.msra.mxu0 %v3513_v23 }
 0x7b1   :  { %1024 = vmatprep.subr.mxu0 %v3516_v25 }
 0x7b2   :  { %1025 = vmatpush1.msra.mxu0 %v3519_v26 }
 0x7b3   :  { %1310 = vmatprep.subr.mxu0 %v3474_v49 }
 0x863   :  { %v755_v40 = vpop.f32.mrf.mxu0 }
 0x864   :  { %v761_v41 = vrot.slane %v755_v40, 4 }
 0x865   :  { %v757_v42 = vpop.f32.mrf.mxu0 }
 0x866   :  { %v763_v43 = vadd.f32 %v761_v41, %v3575_v48  ;;  %v792_v45 = vrot.slane %v757_v42, 6 }
 0x868   :  { %3190 = vtanh.f32 %v763_v43  ;;  %v794_v46 = vadd.f32 %v792_v45, %v3577_v51  ;;  %v2791_v52 = vmul.f32 -1.442695, %v763_v43 }
 0x86a   :  { %3192 = vtanh.f32 %v794_v46  ;;  %v2792_v53 = vmul.f32 -1.442695, %v794_v46 }
 0x86b   :  { %3194 = vpow2.f32 %v2791_v52 }
 0x86c   :  { %3196 = vpow2.f32 %v2792_v53 }
 0x875   :  { %v3191_v47 = vpop.eup %3190 }
 0x876   :  { %776 = vrot.lane.b32.xlu1 %v3191_v47, %s3437_s0 }
 0x877   :  { %v3193_v50 = vpop.eup %3192 }
 0x878   :  { %807 = vrot.lane.b32.xlu0 %v3193_v50, %s3437_s0  ;;  %v3195_v54 = vpop.eup %3194 }
 0x879   :  { %v3197_v55 = vpop.eup %3196  ;;  %v767_v56 = vadd.f32 1.0, %v3195_v54 }
 0x87a   :  { %v798_v57 = vadd.f32 1.0, %v3197_v55 }
 0x87b   :  { %3198 = vrcp.f32 %v767_v56 }
 0x87c   :  { %3200 = vrcp.f32 %v798_v57 }
 0x888   :  { %v3199_v58 = vpop.eup %3198 }
 0x889   :  { %v3201_v61 = vpop.eup %3200  ;;  %v774_v1 = vmul.f32 %v3199_v58, %v772_v0 }
 0x88a   :  { %v805_v16 = vmul.f32 %v3201_v61, %v803_v2 }
 0x8e8   :  { %v777_v59 = vpop.permute.xlu1 %776 }
 0x8e9   :  { %v779_v60 = vmul.f32 %v3199_v58, %v777_v59 }
 0x8ea   :  { %v808_v62 = vpop.permute.xlu0 %807 }
 0x8eb   :  { %781 = vrot.lane.b32.xlu1 %v779_v60, %s3438_s2  ;;  %v810_v63 = vmul.f32 %v3201_v61, %v808_v62 }
 0x8ed   :  { %812 = vrot.lane.b32.xlu0 %v810_v63, %s3438_s2 }
 0x95d   :  { %v782_v3 = vpop.permute.xlu1 %781 }
 0x95e   :  { %v3667_v12 = vadd.f32 %v782_v3, %v774_v1 }
 0x95f   :  { %v813_v22 = vpop.permute.xlu0 %812 }
 0x960   :  { %3202 = vtanh.f32 %v3667_v12  ;;  %v3670_v27 = vadd.f32 %v813_v22, %v805_v16 }
 0x962   :  { %3204 = vtanh.f32 %v3670_v27  ;;  %v954_v62 = vrot.slane %v3670_v27, 2 }
 0x96d   :  { %v3203_v20 = vpop.eup %3202 }
 0x96e   :  { %787 = vrot.lane.b32.xlu1 %v3203_v20, %s3437_s0 }
 0x96f   :  { %v3205_v28 = vpop.eup %3204 }
 0x970   :  { %818 = vrot.lane.b32.xlu0 %v3205_v28, %s3437_s0 }
 0x9e0   :  { %v788_v10 = vpop.permute.xlu1 %787 }
 0x9e1   :  { %v790_v14 = vmul.f32 %v3199_v58, %v788_v10 }
 0x9e2   :  { %v819_v18 = vpop.permute.xlu0 %818 }
 0x9e3   :  { %823 = vrot.lane.b32.xlu0 %v790_v14, %s3438_s2  ;;  %v3676_v31 = vmul.f32 %v3201_v61, %v819_v18  ;;  %v926_v61 = vrot.slane %v3667_v12, 6 }
 0x9e5   :  { %v834_v32 = vrot.slane %v3676_v31, 6 }
 0x9e7   :  { %835 = vrot.lane.b32.xlu1 %v834_v32, %s3437_s0 }
 0xa55   :  { %v824_v34 = vpop.permute.xlu0 %823 }
 0xa56   :  { %827 = vst.msk [vmem:[#allocation2] sm:$0x30] %vm826_vm6, %v824_v34 }
 0xa59   :  { %v836_v37 = vpop.permute.xlu1 %835 }
 0xa5a   :  { %v838_v39 = vsel %vm530_vm3, %v824_v34, %v836_v37 }
 0xa5b   :  { %v840_v40 = vrot.slane %v838_v39, 4 }
 0xa5d   :  { %2793 = vmatmul.mubr.msk.f32.vlgmr.msra.gmra.mxu1 %vm386_vm4, %v840_v40 }
 0xa5e   :  { %1159 = vmatpush1.msra.mxu1 %v3477_v4  ;;  %1206 = vmatprep.mubr.f32.mxu1 %v3436_v24 }
 0xa5f   :  { %1160 = vmatprep.subr.mxu1 %v3479_v5 }
 0xa60   :  { %1161 = vmatpush1.msra.mxu1 %v3481_v6 }
 0xa61   :  { %1162 = vmatprep.subr.mxu1 %v3484_v7 }
 0xa62   :  { %1163 = vmatpush1.msra.mxu1 %v3487_v8 }
 0xa63   :  { %1164 = vmatprep.subr.mxu1 %v3490_v9 }
 0xa64   :  { %1165 = vmatpush1.msra.mxu1 %v3495_v11 }
 0xa65   :  { %1166 = vmatprep.subr.mxu1 %v3498_v13 }
 0xa66   :  { %1167 = vmatpush1.msra.mxu1 %v3501_v15 }
 0xa67   :  { %1168 = vmatprep.subr.mxu1 %v3504_v17 }
 0xa68   :  { %1169 = vmatpush1.msra.mxu1 %v3507_v19 }
 0xa69   :  { %1170 = vmatprep.subr.mxu1 %v3510_v21 }
 0xa6a   :  { %1171 = vmatpush1.msra.mxu1 %v3513_v23 }
 0xa6b   :  { %1172 = vmatprep.subr.mxu1 %v3516_v25 }
 0xa6c   :  { %1173 = vmatpush1.msra.mxu1 %v3519_v26 }
 0xa6d   :  { %1462 = vmatprep.subr.mxu1 %v3474_v49 }
 0xb1d   :  { %v909_v41 = vpop.f32.mrf.mxu1 }
 0xb1e   :  { %v915_v42 = vrot.slane %v909_v41, 2 }
 0xb1f   :  { %v911_v43 = vpop.f32.mrf.mxu1 }
 0xb20   :  { %v917_v45 = vadd.f32 %v915_v42, %v3575_v48  ;;  %v945_v46 = vadd.f32 %v911_v43, %v3577_v51 }
 0xb22   :  { %3206 = vtanh.f32 %v917_v45  ;;  %v2794_v52 = vmul.f32 -1.442695, %v917_v45  ;;  %v2795_v53 = vmul.f32 -1.442695, %v945_v46 }
 0xb23   :  { %3208 = vtanh.f32 %v945_v46 }
 0xb24   :  { %3210 = vpow2.f32 %v2794_v52 }
 0xb25   :  { %3212 = vpow2.f32 %v2795_v53 }
 0xb2f   :  { %v3207_v47 = vpop.eup %3206 }
 0xb30   :  { %v3209_v50 = vpop.eup %3208  ;;  %930 = vrot.lane.b32.xlu1 %v3207_v47, %s3437_s0 }
 0xb31   :  { %958 = vrot.lane.b32.xlu0 %v3209_v50, %s3437_s0  ;;  %v3211_v49 = vpop.eup %3210 }
 0xb32   :  { %v3213_v54 = vpop.eup %3212  ;;  %v921_v55 = vadd.f32 1.0, %v3211_v49 }
 0xb33   :  { %v949_v56 = vadd.f32 1.0, %v3213_v54 }
 0xb34   :  { %3214 = vrcp.f32 %v921_v55 }
 0xb35   :  { %3216 = vrcp.f32 %v949_v56 }
 0xb41   :  { %v3215_v48 = vpop.eup %3214 }
 0xb42   :  { %v3217_v57 = vpop.eup %3216  ;;  %v928_v63 = vmul.f32 %v3215_v48, %v926_v61 }
 0xb43   :  { %v956_v1 = vmul.f32 %v3217_v57, %v954_v62 }
 0xba2   :  { %v931_v51 = vpop.permute.xlu1 %930 }
 0xba3   :  { %v933_v58 = vmul.f32 %v3215_v48, %v931_v51  ;;  %v959_v59 = vpop.permute.xlu0 %958 }
 0xba4   :  { %v961_v60 = vmul.f32 %v3217_v57, %v959_v59 }
 0xba5   :  { %935 = vrot.lane.b32.xlu1 %v933_v58, %s3438_s2 }
 0xba6   :  { %963 = vrot.lane.b32.xlu0 %v961_v60, %s3438_s2 }
 0xc17   :  { %v936_v0 = vpop.permute.xlu1 %935 }
 0xc18   :  { %v3708_v2 = vadd.f32 %v936_v0, %v928_v63  ;;  %v964_v3 = vpop.permute.xlu0 %963 }
 0xc19   :  { %v3710_v16 = vadd.f32 %v964_v3, %v956_v1 }
 0xc1a   :  { %3218 = vtanh.f32 %v3708_v2  ;;  %v1074_v59 = vrot.slane %v3708_v2, 6 }
 0xc1b   :  { %3220 = vtanh.f32 %v3710_v16  ;;  %v1105_v62 = vrot.slane %v3710_v16, 2 }
 0xc27   :  { %v3219_v22 = vpop.eup %3218 }
 0xc28   :  { %v3221_v20 = vpop.eup %3220  ;;  %941 = vrot.lane.b32.xlu1 %v3219_v22, %s3437_s0 }
 0xc29   :  { %969 = vrot.lane.b32.xlu0 %v3221_v20, %s3437_s0 }
 0xc9a   :  { %v942_v12 = vpop.permute.xlu1 %941 }
 0xc9b   :  { %v944_v27 = vmul.f32 %v3215_v48, %v942_v12  ;;  %v970_v28 = vpop.permute.xlu0 %969 }
 0xc9c   :  { %v3716_v10 = vmul.f32 %v3217_v57, %v970_v28 }
 0xc9d   :  { %974 = vrot.lane.b32.xlu0 %v944_v27, %s3438_s2 }
 0xc9e   :  { %v985_v14 = vrot.slane %v3716_v10, 2 }
 0xca0   :  { %986 = vrot.lane.b32.xlu1 %v985_v14, %s3437_s0 }
 0xd0f   :  { %v975_v18 = vpop.permute.xlu0 %974 }
 0xd10   :  { %978 = vst.msk [vmem:[#allocation2] sm:$0xc0] %vm977_vm7, %v975_v18 }
 0xd12   :  { %v987_v32 = vpop.permute.xlu1 %986 }
 0xd13   :  { %v989_v34 = vsel %vm530_vm3, %v975_v18, %v987_v32 }
 0xd14   :  { %v991_v37 = vrot.slane %v989_v34, 6 }
 0xd16   :  { %2796 = vmatmul.mubr.msk.f32.vlgmr.msra.gmra.mxu0 %vm386_vm4, %v991_v37 }
 0xd17   :  { %1311 = vmatpush1.msra.mxu0 %v3477_v4  ;;  %1358 = vmatprep.mubr.f32.mxu0 %v3436_v24 }
 0xd18   :  { %1312 = vmatprep.subr.mxu0 %v3479_v5 }
 0xd19   :  { %1313 = vmatpush1.msra.mxu0 %v3481_v6 }
 0xd1a   :  { %1314 = vmatprep.subr.mxu0 %v3484_v7 }
 0xd1b   :  { %1315 = vmatpush1.msra.mxu0 %v3487_v8 }
 0xd1c   :  { %1316 = vmatprep.subr.mxu0 %v3490_v9 }
 0xd1d   :  { %1317 = vmatpush1.msra.mxu0 %v3495_v11 }
 0xd1e   :  { %1318 = vmatprep.subr.mxu0 %v3498_v13 }
 0xd1f   :  { %1319 = vmatpush1.msra.mxu0 %v3501_v15 }
 0xd20   :  { %1320 = vmatprep.subr.mxu0 %v3504_v17 }
 0xd21   :  { %1321 = vmatpush1.msra.mxu0 %v3507_v19 }
 0xd22   :  { %1322 = vmatprep.subr.mxu0 %v3510_v21 }
 0xd23   :  { %1323 = vmatpush1.msra.mxu0 %v3513_v23 }
 0xd24   :  { %1324 = vmatprep.subr.mxu0 %v3516_v25 }
 0xd25   :  { %1325 = vmatpush1.msra.mxu0 %v3519_v26 }
 0xdd6   :  { %v1060_v39 = vpop.f32.mrf.mxu0 }
 0xdd7   :  { %v1065_v40 = vadd.f32 %v1060_v39, %v3573_v33 }
 0xdd8   :  { %v1062_v41 = vpop.f32.mrf.mxu0 }
 0xdd9   :  { %3222 = vtanh.f32 %v1065_v40  ;;  %v1094_v42 = vrot.slane %v1062_v41, 2  ;;  %v2797_v47 = vmul.f32 -1.442695, %v1065_v40 }
 0xddb   :  { %v1096_v43 = vadd.f32 %v1094_v42, %v3571_v44 }
 0xddd   :  { %3224 = vtanh.f32 %v1096_v43  ;;  %v2798_v50 = vmul.f32 -1.442695, %v1096_v43 }
 0xdde   :  { %3226 = vpow2.f32 %v2797_v47 }
 0xddf   :  { %3228 = vpow2.f32 %v2798_v50 }
 0xde6   :  { %v3223_v45 = vpop.eup %3222 }
 0xde7   :  { %1078 = vrot.lane.b32.xlu1 %v3223_v45, %s3437_s0 }
 0xdea   :  { %v3225_v46 = vpop.eup %3224 }
 0xdeb   :  { %1109 = vrot.lane.b32.xlu0 %v3225_v46, %s3437_s0  ;;  %v3227_v52 = vpop.eup %3226 }
 0xdec   :  { %v1069_v53 = vadd.f32 1.0, %v3227_v52  ;;  %v3229_v49 = vpop.eup %3228 }
 0xded   :  { %v1100_v54 = vadd.f32 1.0, %v3229_v49 }
 0xdee   :  { %3230 = vrcp.f32 %v1069_v53 }
 0xdef   :  { %3232 = vrcp.f32 %v1100_v54 }
 0xdfb   :  { %v3231_v55 = vpop.eup %3230 }
 0xdfc   :  { %v3233_v51 = vpop.eup %3232  ;;  %v1076_v60 = vmul.f32 %v3231_v55, %v1074_v59 }
 0xdfd   :  { %v1107_v0 = vmul.f32 %v3233_v51, %v1105_v62 }
 0xe59   :  { %v1079_v56 = vpop.permute.xlu1 %1078 }
 0xe5a   :  { %v1081_v48 = vmul.f32 %v3231_v55, %v1079_v56 }
 0xe5c   :  { %1083 = vrot.lane.b32.xlu1 %v1081_v48, %s3438_s2 }
 0xe5d   :  { %v1110_v57 = vpop.permute.xlu0 %1109 }
 0xe5e   :  { %v1112_v58 = vmul.f32 %v3233_v51, %v1110_v57 }
 0xe60   :  { %1114 = vrot.lane.b32.xlu0 %v1112_v58, %s3438_s2 }
 0xece   :  { %v1084_v61 = vpop.permute.xlu1 %1083 }
 0xecf   :  { %v3748_v63 = vadd.f32 %v1084_v61, %v1076_v60 }
 0xed1   :  { %3234 = vtanh.f32 %v3748_v63  ;;  %v1225_v42 = vrot.slane %v3748_v63, 6 }
 0xed2   :  { %v1115_v1 = vpop.permute.xlu0 %1114 }
 0xed3   :  { %v3751_v3 = vadd.f32 %v1115_v1, %v1107_v0 }
 0xed5   :  { %3236 = vtanh.f32 %v3751_v3  ;;  %v1256_v45 = vrot.slane %v3751_v3, 2 }
 0xede   :  { %v3235_v22 = vpop.eup %3234 }
 0xedf   :  { %1089 = vrot.lane.b32.xlu1 %v3235_v22, %s3437_s0 }
 0xee2   :  { %v3237_v20 = vpop.eup %3236 }
 0xee3   :  { %1120 = vrot.lane.b32.xlu0 %v3237_v20, %s3437_s0 }
 0xf51   :  { %v1090_v2 = vpop.permute.xlu1 %1089 }
 0xf52   :  { %v1092_v12 = vmul.f32 %v3231_v55, %v1090_v2 }
 0xf54   :  { %1125 = vrot.lane.b32.xlu0 %v1092_v12, %s3438_s2 }
 0xf55   :  { %v1121_v16 = vpop.permute.xlu0 %1120 }
 0xf56   :  { %v3757_v27 = vmul.f32 %v3233_v51, %v1121_v16 }
 0xf58   :  { %v1134_v28 = vrot.slane %v3757_v27, 6 }
 0xf5a   :  { %1135 = vrot.lane.b32.xlu1 %v1134_v28, %s3437_s0 }
 0xfc6   :  { %v3761_v14 = vpop.permute.xlu0 %1125 }
 0xfcc   :  { %v1136_v18 = vpop.permute.xlu1 %1135 }
 0xfcd   :  { %v1138_v32 = vsel %vm530_vm3, %v3761_v14, %v1136_v18 }
 0xfce   :  { %2799 = vmatmul.mubr.msk.f32.vlgmr.msra.gmra.mxu1 %vm386_vm4, %v1138_v32 }
 0xfcf   :  { %1463 = vmatpush1.msra.mxu1 %v3477_v4  ;;  %1510 = vmatprep.mubr.f32.mxu1 %v3436_v24 }
 0xfd0   :  { %1464 = vmatprep.subr.mxu1 %v3479_v5 }
 0xfd1   :  { %1465 = vmatpush1.msra.mxu1 %v3481_v6 }
 0xfd2   :  { %1466 = vmatprep.subr.mxu1 %v3484_v7 }
 0xfd3   :  { %1467 = vmatpush1.msra.mxu1 %v3487_v8 }
 0xfd4   :  { %1468 = vmatprep.subr.mxu1 %v3490_v9 }
 0xfd5   :  { %1469 = vmatpush1.msra.mxu1 %v3495_v11 }
 0xfd6   :  { %1470 = vmatprep.subr.mxu1 %v3498_v13 }
 0xfd7   :  { %1471 = vmatpush1.msra.mxu1 %v3501_v15 }
 0xfd8   :  { %1472 = vmatprep.subr.mxu1 %v3504_v17 }
 0xfd9   :  { %1473 = vmatpush1.msra.mxu1 %v3507_v19 }
 0xfda   :  { %1474 = vmatprep.subr.mxu1 %v3510_v21 }
 0xfdb   :  { %1475 = vmatpush1.msra.mxu1 %v3513_v23 }
 0xfdc   :  { %1476 = vmatprep.subr.mxu1 %v3516_v25 }
 0xfdd   :  { %1477 = vmatpush1.msra.mxu1 %v3519_v26 }
 0xfde   :  { %3013 = vmatprep.subr.mxu1 %v3436_v24 }
0x108e   :  { %v1208_v4 = vpop.f32.mrf.mxu1 }
0x108f   :  { %v1214_v5 = vrot.slane %v1208_v4, 6 }
0x1090   :  { %v1210_v6 = vpop.f32.mrf.mxu1 }
0x1091   :  { %v1216_v7 = vadd.f32 %v1214_v5, %v3573_v33  ;;  %v1245_v8 = vrot.slane %v1210_v6, 4 }
0x1093   :  { %3238 = vtanh.f32 %v1216_v7  ;;  %v1247_v9 = vadd.f32 %v1245_v8, %v3571_v44  ;;  %v2800_v15 = vmul.f32 -1.442695, %v1216_v7 }
0x1095   :  { %3240 = vtanh.f32 %v1247_v9  ;;  %v2801_v17 = vmul.f32 -1.442695, %v1247_v9 }
0x1096   :  { %3242 = vpow2.f32 %v2800_v15 }
0x1097   :  { %3244 = vpow2.f32 %v2801_v17 }
0x10a0   :  { %v3239_v11 = vpop.eup %3238 }
0x10a1   :  { %1229 = vrot.lane.b32.xlu1 %v3239_v11, %s3437_s0 }
0x10a2   :  { %v3241_v13 = vpop.eup %3240 }
0x10a3   :  { %1260 = vrot.lane.b32.xlu0 %v3241_v13, %s3437_s0  ;;  %v3243_v19 = vpop.eup %3242 }
0x10a4   :  { %v3245_v21 = vpop.eup %3244  ;;  %v1220_v23 = vadd.f32 1.0, %v3243_v19 }
0x10a5   :  { %v1251_v25 = vadd.f32 1.0, %v3245_v21 }
0x10a6   :  { %3246 = vrcp.f32 %v1220_v23 }
0x10a7   :  { %3248 = vrcp.f32 %v1251_v25 }
0x10b3   :  { %v3247_v26 = vpop.eup %3246 }
0x10b4   :  { %v3249_v39 = vpop.eup %3248  ;;  %v1227_v43 = vmul.f32 %v3247_v26, %v1225_v42 }
0x10b5   :  { %v1258_v50 = vmul.f32 %v3249_v39, %v1256_v45 }
0x1113   :  { %v1230_v34 = vpop.permute.xlu1 %1229 }
0x1114   :  { %v1232_v37 = vmul.f32 %v3247_v26, %v1230_v34 }
0x1115   :  { %v1261_v40 = vpop.permute.xlu0 %1260 }
0x1116   :  { %1234 = vrot.lane.b32.xlu1 %v1232_v37, %s3438_s2  ;;  %v1263_v41 = vmul.f32 %v3249_v39, %v1261_v40 }
0x1118   :  { %1265 = vrot.lane.b32.xlu0 %v1263_v41, %s3438_s2 }
0x1188   :  { %v1235_v46 = vpop.permute.xlu1 %1234 }
0x1189   :  { %v1237_v47 = vadd.f32 %v1235_v46, %v1227_v43 }
0x118a   :  { %v1266_v52 = vpop.permute.xlu0 %1265 }
0x118b   :  { %3250 = vtanh.f32 %v1237_v47  ;;  %v1268_v53 = vadd.f32 %v1266_v52, %v1258_v50  ;;  %v1377_v13 = vrot.slane %v1237_v47, 6 }
0x118d   :  { %3252 = vtanh.f32 %v1268_v53  ;;  %v1408_v17 = vrot.slane %v1268_v53, 2 }
0x1198   :  { %v3251_v49 = vpop.eup %3250 }
0x1199   :  { %1240 = vrot.lane.b32.xlu1 %v3251_v49, %s3437_s0 }
0x119a   :  { %v3253_v54 = vpop.eup %3252 }
0x119b   :  { %1271 = vrot.lane.b32.xlu0 %v3253_v54, %s3437_s0 }
0x120b   :  { %v1241_v55 = vpop.permute.xlu1 %1240 }
0x120c   :  { %v1243_v56 = vmul.f32 %v3247_v26, %v1241_v55 }
0x120d   :  { %v1272_v48 = vpop.permute.xlu0 %1271 }
0x120e   :  { %1276 = vrot.lane.b32.xlu0 %v1243_v56, %s3438_s2  ;;  %v3794_v51 = vmul.f32 %v3249_v39, %v1272_v48 }
0x1210   :  { %v1285_v57 = vrot.slane %v3794_v51, 2 }
0x1212   :  { %1286 = vrot.lane.b32.xlu1 %v1285_v57, %s3437_s0 }
0x1280   :  { %v3798_v58 = vpop.permute.xlu0 %1276 }
0x1284   :  { %v1287_v59 = vpop.permute.xlu1 %1286 }
0x1285   :  { %v1289_v60 = vsel %vm530_vm3, %v3798_v58, %v1287_v59 }
0x1286   :  { %v1291_v61 = vrot.slane %v1289_v60, 2 }
0x1288   :  { %2802 = vmatmul.mubr.msk.f32.vlgmr.msra.gmra.mxu0 %vm386_vm4, %v1291_v61 }
0x1289   :  { %1687 = vmatprep.mubr.f32.mxu0 %v3436_v24 }
0x1348   :  { %v1360_v62 = vpop.f32.mrf.mxu0 }
0x1349   :  { %v1366_v63 = vrot.slane %v1360_v62, 4 }
0x134a   :  { %v1362_v0 = vpop.f32.mrf.mxu0 }
0x134b   :  { %v1368_v1 = vadd.f32 %v1366_v63, %v3573_v33  ;;  %v1397_v3 = vrot.slane %v1362_v0, 6 }
0x134d   :  { %3254 = vtanh.f32 %v1368_v1  ;;  %v1399_v22 = vadd.f32 %v1397_v3, %v3571_v44  ;;  %v2803_v12 = vmul.f32 -1.442695, %v1368_v1 }
0x134f   :  { %3256 = vtanh.f32 %v1399_v22  ;;  %v2804_v16 = vmul.f32 -1.442695, %v1399_v22 }
0x1350   :  { %3258 = vpow2.f32 %v2803_v12 }
0x1351   :  { %3260 = vpow2.f32 %v2804_v16 }
0x135a   :  { %v3255_v20 = vpop.eup %3254 }
0x135b   :  { %1381 = vrot.lane.b32.xlu1 %v3255_v20, %s3437_s0 }
0x135c   :  { %v3257_v2 = vpop.eup %3256 }
0x135d   :  { %1412 = vrot.lane.b32.xlu0 %v3257_v2, %s3437_s0  ;;  %v3259_v28 = vpop.eup %3258 }
0x135e   :  { %v3261_v18 = vpop.eup %3260  ;;  %v1372_v32 = vadd.f32 1.0, %v3259_v28 }
0x135f   :  { %v1403_v4 = vadd.f32 1.0, %v3261_v18 }
0x1360   :  { %3262 = vrcp.f32 %v1372_v32 }
0x1361   :  { %3264 = vrcp.f32 %v1403_v4 }
0x136d   :  { %v3263_v5 = vpop.eup %3262 }
0x136e   :  { %v3265_v8 = vpop.eup %3264  ;;  %v1379_v15 = vmul.f32 %v3263_v5, %v1377_v13  ;;  %v1599_v13 = vld [vmem:[#allocation6 + $0x1e8] sm:$0xff] }
0x136f   :  { %v1410_v23 = vmul.f32 %v3265_v8, %v1408_v17  ;;  %v1597_v17 = vld [vmem:[#allocation6 + $0x1d8] sm:$0xff] }
0x13cd   :  { %v1382_v6 = vpop.permute.xlu1 %1381 }
0x13ce   :  { %v1384_v7 = vmul.f32 %v3263_v5, %v1382_v6 }
0x13cf   :  { %v1413_v9 = vpop.permute.xlu0 %1412 }
0x13d0   :  { %1386 = vrot.lane.b32.xlu1 %v1384_v7, %s3438_s2  ;;  %v1415_v11 = vmul.f32 %v3265_v8, %v1413_v9  ;;  %v1603_v7 = vld [vmem:[#allocation6 + $0x208] sm:$0xff]  ;;  %v1601_v9 = vld [vmem:[#allocation6 + $0x1f8] sm:$0xff] }
0x13d1   :  { %1639 = vmatprep.subr.mxu0 %v1603_v7 }
0x13d2   :  { %1417 = vrot.lane.b32.xlu0 %v1415_v11, %s3438_s2  ;;  %v1600_v11 = vld [vmem:[#allocation6 + $0x1f0] sm:$0xff] }
0x1442   :  { %v1387_v19 = vpop.permute.xlu1 %1386 }
0x1443   :  { %v1389_v21 = vadd.f32 %v1387_v19, %v1379_v15  ;;  %v1598_v15 = vld [vmem:[#allocation6 + $0x1e0] sm:$0xff]  ;;  %v1593_v19 = vld [vmem:[#allocation6 + $0x1b8] sm:$0xff] }
0x1444   :  { %v1418_v25 = vpop.permute.xlu0 %1417 }
0x1445   :  { %3266 = vtanh.f32 %v1389_v21  ;;  %v1420_v26 = vadd.f32 %v1418_v25, %v1410_v23  ;;  %v1529_v20 = vrot.slane %v1389_v21, 6  ;;  %v1592_v21 = vld [vmem:[#allocation6 + $0x1b0] sm:$0xff]  ;;  %v1591_v23 = vld [vmem:[#allocation6 + $0x1a8] sm:$0xff]  ;;  %v1590_v25 = vld [vmem:[#allocation6 + $0x1a0] sm:$0xff] }
0x1447   :  { %3268 = vtanh.f32 %v1420_v26  ;;  %v1557_v2 = vrot.slane %v1420_v26, 2  ;;  %v1589_v26 = vld [vmem:[#allocation6 + $0x198] sm:$0xff] }
0x1452   :  { %v3267_v34 = vpop.eup %3266 }
0x1453   :  { %1392 = vrot.lane.b32.xlu1 %v3267_v34, %s3437_s0  ;;  %v1588_v34 = vld [vmem:[#allocation6 + $0x190] sm:$0xff] }
0x1454   :  { %v3269_v37 = vpop.eup %3268 }
0x1455   :  { %1423 = vrot.lane.b32.xlu0 %v3269_v37, %s3437_s0 }
0x14c5   :  { %v1393_v39 = vpop.permute.xlu1 %1392 }
0x14c6   :  { %v1395_v40 = vmul.f32 %v3263_v5, %v1393_v39 }
0x14c7   :  { %v1424_v41 = vpop.permute.xlu0 %1423 }
0x14c8   :  { %1428 = vrot.lane.b32.xlu0 %v1395_v40, %s3438_s2  ;;  %v1426_v42 = vmul.f32 %v3265_v8, %v1424_v41  ;;  %v1602_v8 = vld [vmem:[#allocation6 + $0x200] sm:$0xff] }
0x14c9   :  { %1640 = vmatpush1.msra.mxu0 %v1602_v8  ;;  %v3851_v40 = vld [vmem:[#allocation3 + $0x118] sm:$0xff] }
0x14ca   :  { %v1437_v43 = vrot.slane %v1426_v42, 6  ;;  %1641 = vmatprep.subr.mxu0 %v1601_v9 }
0x14cb   :  { %1642 = vmatpush1.msra.mxu0 %v1600_v11 }
0x14cc   :  { %1438 = vrot.lane.b32.xlu1 %v1437_v43, %s3437_s0  ;;  %1643 = vmatprep.subr.mxu0 %v1599_v13  ;;  %v3859_v43 = vld [vmem:[#allocation3 + $0x110] sm:$0xff] }
0x14cd   :  { %1644 = vmatpush1.msra.mxu0 %v1598_v15 }
0x14ce   :  { %1645 = vmatprep.subr.mxu0 %v1597_v17 }
0x153a   :  { %v3814_v45 = vpop.permute.xlu0 %1428 }
0x153e   :  { %v1439_v46 = vpop.permute.xlu1 %1438 }
0x153f   :  { %v1441_v47 = vsel %vm530_vm3, %v3814_v45, %v1439_v46 }
0x1540   :  { %v1443_v50 = vrot.slane %v1441_v47, 4  ;;  %v3864_v47 = vld [vmem:[#allocation3 + $0x108] sm:$0xff] }
0x1542   :  { %2805 = vmatmul.mubr.msk.f32.vlgmr.msra.gmra.mxu1 %vm386_vm4, %v1443_v50 }
0x1543   :  { %3021 = vmatprep.mubr.msk.f32.mxu1 %vm3439_vm11, %v3436_v24 }
0x1602   :  { %v1512_v52 = vpop.f32.mrf.mxu1 }
0x1603   :  { %v1518_v53 = vrot.slane %v1512_v52, 2 }
0x1604   :  { %v1514_v49 = vpop.f32.mrf.mxu1 }
0x1605   :  { %v1520_v54 = vadd.f32 %v1518_v53, %v3573_v33  ;;  %v1548_v55 = vadd.f32 %v1514_v49, %v3571_v44 }
0x1607   :  { %3270 = vtanh.f32 %v1520_v54  ;;  %v2806_v57 = vmul.f32 -1.442695, %v1520_v54  ;;  %v2807_v59 = vmul.f32 -1.442695, %v1548_v55 }
0x1608   :  { %3272 = vtanh.f32 %v1548_v55 }
0x1609   :  { %3274 = vpow2.f32 %v2806_v57 }
0x160a   :  { %3276 = vpow2.f32 %v2807_v59 }
0x1614   :  { %v3271_v56 = vpop.eup %3270 }
0x1615   :  { %v3273_v48 = vpop.eup %3272  ;;  %1533 = vrot.lane.b32.xlu1 %v3271_v56, %s3437_s0  ;;  %v3906_v56 = vld [vmem:[#allocation6 + $0x210] ss:$8 sm:$0x3] }
0x1616   :  { %1561 = vrot.lane.b32.xlu0 %v3273_v48, %s3437_s0  ;;  %v3275_v60 = vpop.eup %3274  ;;  %v1610_v57 = vrot.slane %v3906_v56, %v285_v38 }
0x1617   :  { %v3277_v61 = vpop.eup %3276  ;;  %v1524_v62 = vadd.f32 1.0, %v3275_v60 }
0x1618   :  { %v1552_v63 = vadd.f32 1.0, %v3277_v61 }
0x1619   :  { %3278 = vrcp.f32 %v1524_v62 }
0x161a   :  { %3280 = vrcp.f32 %v1552_v63 }
0x1626   :  { %v3823_v33 = vpop.eup %3278 }
0x1627   :  { %v3825_v0 = vpop.eup %3280  ;;  %v1531_v12 = vmul.f32 %v3823_v33, %v1529_v20 }
0x1628   :  { %v1559_v28 = vmul.f32 %v3825_v0, %v1557_v2 }
0x1687   :  { %v1534_v44 = vpop.permute.xlu1 %1533 }
0x1688   :  { %v1536_v1 = vmul.f32 %v3823_v33, %v1534_v44  ;;  %v1562_v3 = vpop.permute.xlu0 %1561 }
0x1689   :  { %v1564_v22 = vmul.f32 %v3825_v0, %v1562_v3 }
0x168a   :  { %1538 = vrot.lane.b32.xlu1 %v1536_v1, %s3438_s2 }
0x168b   :  { %1566 = vrot.lane.b32.xlu0 %v1564_v22, %s3438_s2 }
0x16fc   :  { %v1539_v16 = vpop.permute.xlu1 %1538 }
0x16fd   :  { %v1541_v18 = vadd.f32 %v1539_v16, %v1531_v12  ;;  %v1567_v32 = vpop.permute.xlu0 %1566 }
0x16fe   :  { %v1569_v4 = vadd.f32 %v1567_v32, %v1559_v28 }
0x16ff   :  { %3282 = vtanh.f32 %v1541_v18 }
0x1700   :  { %3284 = vtanh.f32 %v1569_v4 }
0x170c   :  { %v3283_v5 = vpop.eup %3282 }
0x170d   :  { %v3285_v6 = vpop.eup %3284  ;;  %1544 = vrot.lane.b32.xlu1 %v3283_v5, %s3437_s0 }
0x170e   :  { %1572 = vrot.lane.b32.xlu0 %v3285_v6, %s3437_s0 }
0x1711   :  { %1281 = vrot.lane.b32.xlu1 %v3794_v51, %s3437_s0  ;;  %v1596_v51 = vld [vmem:[#allocation6 + $0x1d0] sm:$0xff] }
0x1712   :  { %1130 = vrot.lane.b32.xlu0 %v3757_v27, %s3437_s0  ;;  %1646 = vmatpush1.msra.mxu0 %v1596_v51  ;;  %v1595_v27 = vld [vmem:[#allocation6 + $0x1c8] sm:$0xff] }
0x1713   :  { %1647 = vmatprep.subr.mxu0 %v1595_v27 }
0x1715   :  { %675 = vrot.lane.b32.xlu1 %v3635_v30, %s3437_s0  ;;  %v1594_v30 = vld [vmem:[#allocation6 + $0x1c0] sm:$0xff] }
0x1716   :  { %1433 = vrot.lane.b32.xlu0 %v1426_v42, %s3437_s0  ;;  %1648 = vmatpush1.msra.mxu0 %v1594_v30 }
0x1717   :  { %1649 = vmatprep.subr.mxu0 %v1593_v19 }
0x1718   :  { %1650 = vmatpush1.msra.mxu0 %v1592_v21 }
0x1719   :  { %1651 = vmatprep.subr.mxu0 %v1591_v23 }
0x171a   :  { %521 = vrot.lane.b32.xlu0 %v3593_v29, %s3437_s0  ;;  %1652 = vmatpush1.msra.mxu0 %v1590_v25  ;;  %v3847_v29 = vld [vmem:[#allocation3 + $0x120] sm:$0xff] }
0x171b   :  { %1653 = vmatprep.subr.mxu0 %v1589_v26  ;;  %3014 = vmatpush3.msra.mxu1 %v3847_v29 }
0x171c   :  { %1654 = vmatpush1.msra.mxu0 %v1588_v34  ;;  %3015 = vmatprep.subr.mxu1 %v3436_v24 }
0x171d   :  { %3002 = vmatprep.subr.mxu0 %v3436_v24  ;;  %3016 = vmatpush3.msra.mxu1 %v3851_v40 }
0x171e   :  { %829 = vrot.lane.b32.xlu0 %v3676_v31, %s3437_s0  ;;  %3017 = vmatprep.subr.mxu1 %v3436_v24 }
0x171f   :  { %3018 = vmatpush3.msra.mxu1 %v3859_v43 }
0x1720   :  { %3019 = vmatprep.subr.mxu1 %v3436_v24 }
0x1721   :  { %3020 = vmatpush3.msra.mxu1 %v3864_v47 }
0x1722   :  { %3035 = vmatprep.subr.mxu1 %v3436_v24 }
0x177f   :  { %v1545_v31 = vpop.permute.xlu1 %1544 }
0x1780   :  { %v1547_v37 = vmul.f32 %v3823_v33, %v1545_v31  ;;  %v1573_v39 = vpop.permute.xlu0 %1572 }
0x1781   :  { %v1575_v41 = vmul.f32 %v3825_v0, %v1573_v39 }
0x1782   :  { %1577 = vrot.lane.b32.xlu0 %v1547_v37, %s3438_s2 }
0x1783   :  { %1582 = vrot.lane.b32.xlu1 %v1575_v41, %s3437_s0  ;;  %v1282_v42 = vpop.permute.xlu1 %1281 }
0x1784   :  { %1284 = vst.msk [vmem:[#allocation2] sm:$0x30] %vm678_vm8, %v1282_v42  ;;  %v1131_v46 = vpop.permute.xlu0 %1130 }
0x1785   :  { %1133 = vst.msk [vmem:[#allocation2] sm:$0xc0] %vm524_vm9, %v1131_v46 }
0x1787   :  { %980 = vrot.lane.b32.xlu1 %v3716_v10, %s3437_s0  ;;  %v676_v50 = vpop.permute.xlu1 %675 }
0x1788   :  { %679 = vst.msk [vmem:[#allocation2 + $0x8] sm:$0x30] %vm678_vm8, %v676_v50  ;;  %v1434_v52 = vpop.permute.xlu0 %1433 }
0x1789   :  { %1431 = vst.msk [vmem:[#allocation2 + $0x8] sm:$0x30] %vm826_vm6, %v3814_v45 }
0x178a   :  { %1436 = vst.msk [vmem:[#allocation2] sm:$0xc] %vm832_vm10, %v1434_v52 }
0x178c   :  { %v522_v53 = vpop.permute.xlu0 %521 }
0x178d   :  { %525 = vst.msk [vmem:[#allocation2 + $0x8] sm:$0xc0] %vm524_vm9, %v522_v53 }
0x1790   :  { %v830_v49 = vpop.permute.xlu0 %829 }
0x1791   :  { %833 = vst.msk [vmem:[#allocation2 + $0x8] sm:$0xc] %vm832_vm10, %v830_v49 }
0x1792   :  { %1279 = vst.msk [vmem:[#allocation2 + $0x8] sm:$0xc] %vm672_vm5, %v3798_v58 }
0x17f4   :  { %v1578_v10 = vpop.permute.xlu0 %1577 }
0x17f5   :  { %v1583_v54 = vpop.permute.xlu1 %1582  ;;  %1580 = vst.msk [vmem:[#allocation2 + $0x8] sm:$0xc0] %vm977_vm7, %v1578_v10 }
0x17f6   :  { %1585 = vst.msk [vmem:[#allocation2] sm:$0x3] %vm983_vm12, %v1583_v54 }
0x17f9   :  { %v981_v55 = vpop.permute.xlu1 %980 }
0x17fa   :  { %984 = vst.msk [vmem:[#allocation2 + $0x8] sm:$0x3] %vm983_vm12, %v981_v55 }
0x17fb   :  { %1128 = vst.msk [vmem:[#allocation2 + $0x8] sm:$0x3] %vm518_vm2, %v3761_v14 }
0x17fd   :  { %v1586_v45 = vld [vmem:[#allocation2] sm:$0xff] }
0x17fe   :  { %2808 = vmatmul.mubr.msk.f32.vlgmr.msra.gmra.mxu0 %vm386_vm4, %v1586_v45 }
0x17ff   :  { %3003 = vmatpush3.msra.mxu0 %v3847_v29  ;;  %1692 = vmatprep.mubr.f32.mxu0 %v3436_v24 }
0x1800   :  { %3004 = vmatprep.subr.mxu0 %v3436_v24 }
0x1801   :  { %3005 = vmatpush3.msra.mxu0 %v3851_v40 }
0x1802   :  { %3006 = vmatprep.subr.mxu0 %v3436_v24  ;;  %v1587_v58 = vld [vmem:[#allocation2 + $0x8] sm:$0xff] }
0x1803   :  { %2809 = vmatmul.mubr.msk.f32.gmra.mxu0 %vm386_vm4, %v1587_v58 }
0x1804   :  { %3007 = vmatpush3.msra.mxu0 %v3859_v43  ;;  %3010 = vmatprep.mubr.msk.f32.mxu0 %vm3439_vm11, %v3436_v24 }
0x1805   :  { %3008 = vmatprep.subr.mxu0 %v3436_v24 }
0x1806   :  { %3009 = vmatpush3.msra.mxu0 %v3864_v47 }
0x1807   :  { %3011 = vmatmul.mubr.f32.vlgmr.msra.gmra.mxu0 %v3436_v24  ;;  %3024 = vmatprep.subr.mxu0 %v3436_v24 }
0x1808   :  { %3025 = vmatpush3.msra.mxu0 %v3847_v29  ;;  %3032 = vmatprep.mubr.msk.f32.mxu0 %vm3439_vm11, %v3436_v24 }
0x1809   :  { %3026 = vmatprep.subr.mxu0 %v3436_v24 }
0x180a   :  { %3027 = vmatpush3.msra.mxu0 %v3851_v40 }
0x180b   :  { %3028 = vmatprep.subr.mxu0 %v3436_v24 }
0x180c   :  { %3029 = vmatpush3.msra.mxu0 %v3859_v43 }
0x180d   :  { %3030 = vmatprep.subr.mxu0 %v3436_v24 }
0x180e   :  { %3031 = vmatpush3.msra.mxu0 %v3864_v47 }
0x180f   :  { %3046 = vmatprep.subr.mxu0 %v3436_v24 }
0x18be   :  { %v1689_v14 = vpop.f32.mrf.mxu0 }
0x18bf   :  { %v3915_v62 = vadd.f32 %v1689_v14, %v1610_v57 }
0x18c0   :  { %v1691_v48 = vpop.f32.mrf.mxu0 }
0x18c3   :  { %v1694_v59 = vpop.f32.mrf.mxu0 }
0x18c4   :  { %v3911_v60 = vadd.f32 %v1694_v59, %v1610_v57 }
0x18c5   :  { %v3913_v61 = vpop.f32.mrf.mxu0 }
0x18c7   :  { %v1771_v63 = vpop.f32.mrf.mxu0 }
0x18c8   :  { %v1775_v33 = vadd.f32 %v1771_v63, %v3915_v62 }
0x18c9   :  { %v3012_v44 = vpop.f32.mrf.mxu0 }
0x18ca   :  { %3286 = vtanh.f32 %v1775_v33  ;;  %v2810_v1 = vmul.f32 -1.442695, %v1775_v33 }
0x18cc   :  { %3288 = vpow2.f32 %v2810_v1 }
0x18d7   :  { %v3287_v0 = vpop.eup %3286 }
0x18d8   :  { %1785 = vrot.lane.b32.xlu1 %v3287_v0, %s3437_s0 }
0x18d9   :  { %v3289_v3 = vpop.eup %3288 }
0x18da   :  { %v1779_v22 = vadd.f32 1.0, %v3289_v3 }
0x18dc   :  { %3290 = vrcp.f32 %v1779_v22 }
0x18e9   :  { %v3291_v38 = vpop.eup %3290 }
0x18ea   :  { %v1783_v12 = vmul.f32 0.0, %v3291_v38 }
0x194a   :  { %v1786_v20 = vpop.permute.xlu1 %1785 }
0x194b   :  { %v1788_v2 = vmul.f32 %v3291_v38, %v1786_v20 }
0x194d   :  { %1790 = vrot.lane.b32.xlu0 %v1788_v2, %s3438_s2 }
0x19bf   :  { %v1791_v16 = vpop.permute.xlu0 %1790 }
0x19c0   :  { %v1793_v28 = vadd.f32 %v1791_v16, %v1783_v12 }
0x19c2   :  { %3292 = vtanh.f32 %v1793_v28  ;;  %v1887_v19 = vrot.slane %v1793_v28, 6 }
0x19cf   :  { %v3293_v18 = vpop.eup %3292 }
0x19d0   :  { %1796 = vrot.lane.b32.xlu1 %v3293_v18, %s3437_s0 }
0x1a42   :  { %v1797_v32 = vpop.permute.xlu1 %1796 }
0x1a43   :  { %v1799_v4 = vmul.f32 %v3291_v38, %v1797_v32 }
0x1a45   :  { %1801 = vrot.lane.b32.xlu0 %v1799_v4, %s3438_s2 }
0x1ab7   :  { %v1802_v5 = vpop.permute.xlu0 %1801 }
0x1ab8   :  { %3022 = vmatmul.mubr.msk.f32.vlgmr.msra.gmra.mxu1 %vm530_vm3, %v1802_v5 }
0x1ab9   :  { %3036 = vmatpush3.msra.mxu1 %v3847_v29  ;;  %3043 = vmatprep.mubr.msk.f32.mxu1 %vm3439_vm11, %v3436_v24 }
0x1aba   :  { %3037 = vmatprep.subr.mxu1 %v3436_v24 }
0x1abb   :  { %3038 = vmatpush3.msra.mxu1 %v3851_v40 }
0x1abc   :  { %3039 = vmatprep.subr.mxu1 %v3436_v24 }
0x1abd   :  { %3040 = vmatpush3.msra.mxu1 %v3859_v43 }
0x1abe   :  { %3041 = vmatprep.subr.mxu1 %v3436_v24 }
0x1abf   :  { %3042 = vmatpush3.msra.mxu1 %v3864_v47 }
0x1ac0   :  { %3057 = vmatprep.subr.mxu1 %v3436_v24 }
0x1b78   :  { %v1871_v6 = vpop.f32.mrf.mxu1 }
0x1b79   :  { %v1876_v7 = vrot.slane %v1871_v6, 6 }
0x1b7a   :  { %v3023_v8 = vpop.f32.mrf.mxu1 }
0x1b7b   :  { %v1878_v9 = vadd.f32 %v1876_v7, %v3915_v62 }
0x1b7d   :  { %3294 = vtanh.f32 %v1878_v9  ;;  %v2812_v13 = vmul.f32 -1.442695, %v1878_v9 }
0x1b7f   :  { %3296 = vpow2.f32 %v2812_v13 }
0x1b8a   :  { %v3295_v11 = vpop.eup %3294 }
0x1b8b   :  { %1891 = vrot.lane.b32.xlu1 %v3295_v11, %s3437_s0 }
0x1b8c   :  { %v3297_v15 = vpop.eup %3296 }
0x1b8d   :  { %v1882_v17 = vadd.f32 1.0, %v3297_v15 }
0x1b8f   :  { %3298 = vrcp.f32 %v1882_v17 }
0x1b9c   :  { %v3299_v51 = vpop.eup %3298 }
0x1b9d   :  { %v1889_v21 = vmul.f32 %v3299_v51, %v1887_v19 }
0x1bfd   :  { %v1892_v27 = vpop.permute.xlu1 %1891 }
0x1bfe   :  { %v1894_v30 = vmul.f32 %v3299_v51, %v1892_v27 }
0x1c00   :  { %1896 = vrot.lane.b32.xlu0 %v1894_v30, %s3438_s2 }
0x1c72   :  { %v1897_v23 = vpop.permute.xlu0 %1896 }
0x1c73   :  { %v1899_v25 = vadd.f32 %v1897_v23, %v1889_v21 }
0x1c75   :  { %3300 = vtanh.f32 %v1899_v25  ;;  %v1994_v58 = vrot.slane %v1899_v25, 6 }
0x1c82   :  { %v3301_v26 = vpop.eup %3300 }
0x1c83   :  { %1902 = vrot.lane.b32.xlu1 %v3301_v26, %s3437_s0 }
0x1cf5   :  { %v1903_v34 = vpop.permute.xlu1 %1902 }
0x1cf6   :  { %v1905_v31 = vmul.f32 %v3299_v51, %v1903_v34 }
0x1cf8   :  { %v1907_v37 = vrot.slane %v1905_v31, 2 }
0x1cfa   :  { %1908 = vrot.lane.b32.xlu0 %v1907_v37, %s3438_s2 }
0x1d6c   :  { %v1909_v39 = vpop.permute.xlu0 %1908 }
0x1d6d   :  { %3033 = vmatmul.mubr.msk.f32.vlgmr.msra.gmra.mxu0 %vm530_vm3, %v1909_v39 }
0x1d6e   :  { %3047 = vmatpush3.msra.mxu0 %v3847_v29  ;;  %3054 = vmatprep.mubr.msk.f32.mxu0 %vm3439_vm11, %v3436_v24 }
0x1d6f   :  { %3048 = vmatprep.subr.mxu0 %v3436_v24 }
0x1d70   :  { %3049 = vmatpush3.msra.mxu0 %v3851_v40 }
0x1d71   :  { %3050 = vmatprep.subr.mxu0 %v3436_v24 }
0x1d72   :  { %3051 = vmatpush3.msra.mxu0 %v3859_v43 }
0x1d73   :  { %3052 = vmatprep.subr.mxu0 %v3436_v24 }
0x1d74   :  { %3053 = vmatpush3.msra.mxu0 %v3864_v47 }
0x1d75   :  { %3068 = vmatprep.subr.mxu0 %v3436_v24 }
0x1e2d   :  { %v1978_v41 = vpop.f32.mrf.mxu0 }
0x1e2e   :  { %v1983_v42 = vrot.slane %v1978_v41, 4 }
0x1e2f   :  { %v3034_v46 = vpop.f32.mrf.mxu0 }
0x1e30   :  { %v1985_v50 = vadd.f32 %v1983_v42, %v3915_v62 }
0x1e32   :  { %3302 = vtanh.f32 %v1985_v50  ;;  %v2814_v53 = vmul.f32 -1.442695, %v1985_v50 }
0x1e34   :  { %3304 = vpow2.f32 %v2814_v53 }
0x1e3f   :  { %v3303_v52 = vpop.eup %3302 }
0x1e40   :  { %1998 = vrot.lane.b32.xlu1 %v3303_v52, %s3437_s0 }
0x1e41   :  { %v3305_v49 = vpop.eup %3304 }
0x1e42   :  { %v1989_v10 = vadd.f32 1.0, %v3305_v49 }
0x1e44   :  { %3306 = vrcp.f32 %v1989_v10 }
0x1e51   :  { %v3307_v54 = vpop.eup %3306 }
0x1e52   :  { %v1996_v14 = vmul.f32 %v3307_v54, %v1994_v58 }
0x1eb2   :  { %v1999_v55 = vpop.permute.xlu1 %1998 }
0x1eb3   :  { %v2001_v45 = vmul.f32 %v3307_v54, %v1999_v55 }
0x1eb5   :  { %2003 = vrot.lane.b32.xlu0 %v2001_v45, %s3438_s2 }
0x1f27   :  { %v2004_v48 = vpop.permute.xlu0 %2003 }
0x1f28   :  { %v2006_v57 = vadd.f32 %v2004_v48, %v1996_v14 }
0x1f2a   :  { %3308 = vtanh.f32 %v2006_v57  ;;  %v2101_v4 = vrot.slane %v2006_v57, 6 }
0x1f37   :  { %v3309_v59 = vpop.eup %3308 }
0x1f38   :  { %2009 = vrot.lane.b32.xlu1 %v3309_v59, %s3437_s0 }
0x1faa   :  { %v2010_v63 = vpop.permute.xlu1 %2009 }
0x1fab   :  { %v2012_v33 = vmul.f32 %v3307_v54, %v2010_v63 }
0x1fad   :  { %v2014_v44 = vrot.slane %v2012_v33, 4 }
0x1faf   :  { %2015 = vrot.lane.b32.xlu0 %v2014_v44, %s3438_s2 }
0x2021   :  { %v2016_v0 = vpop.permute.xlu0 %2015 }
0x2022   :  { %3044 = vmatmul.mubr.msk.f32.vlgmr.msra.gmra.mxu1 %vm530_vm3, %v2016_v0 }
0x2023   :  { %3058 = vmatpush3.msra.mxu1 %v3847_v29  ;;  %3065 = vmatprep.mubr.msk.f32.mxu1 %vm3439_vm11, %v3436_v24 }
0x2024   :  { %3059 = vmatprep.subr.mxu1 %v3436_v24 }
0x2025   :  { %3060 = vmatpush3.msra.mxu1 %v3851_v40 }
0x2026   :  { %3061 = vmatprep.subr.mxu1 %v3436_v24 }
0x2027   :  { %3062 = vmatpush3.msra.mxu1 %v3859_v43 }
0x2028   :  { %3063 = vmatprep.subr.mxu1 %v3436_v24 }
0x2029   :  { %3064 = vmatpush3.msra.mxu1 %v3864_v47 }
0x202a   :  { %3079 = vmatprep.subr.mxu1 %v3436_v24 }
0x20e2   :  { %v2085_v1 = vpop.f32.mrf.mxu1 }
0x20e3   :  { %v2090_v3 = vrot.slane %v2085_v1, 2 }
0x20e4   :  { %v3045_v22 = vpop.f32.mrf.mxu1 }
0x20e5   :  { %v2092_v38 = vadd.f32 %v2090_v3, %v3915_v62 }
0x20e7   :  { %3310 = vtanh.f32 %v2092_v38  ;;  %v2816_v2 = vmul.f32 -1.442695, %v2092_v38 }
0x20e9   :  { %3312 = vpow2.f32 %v2816_v2 }
0x20f4   :  { %v3311_v20 = vpop.eup %3310 }
0x20f5   :  { %2105 = vrot.lane.b32.xlu1 %v3311_v20, %s3437_s0 }
0x20f6   :  { %v3313_v12 = vpop.eup %3312 }
0x20f7   :  { %v2096_v16 = vadd.f32 1.0, %v3313_v12 }
0x20f9   :  { %3314 = vrcp.f32 %v2096_v16 }
0x2106   :  { %v3315_v28 = vpop.eup %3314 }
0x2107   :  { %v2103_v5 = vmul.f32 %v3315_v28, %v2101_v4 }
0x2167   :  { %v2106_v18 = vpop.permute.xlu1 %2105 }
0x2168   :  { %v2108_v32 = vmul.f32 %v3315_v28, %v2106_v18 }
0x216a   :  { %2110 = vrot.lane.b32.xlu0 %v2108_v32, %s3438_s2 }
0x21dc   :  { %v2111_v6 = vpop.permute.xlu0 %2110 }
0x21dd   :  { %v2113_v7 = vadd.f32 %v2111_v6, %v2103_v5 }
0x21df   :  { %3316 = vtanh.f32 %v2113_v7  ;;  %v2205_v34 = vrot.slane %v2113_v7, 6 }
0x21ec   :  { %v3317_v62 = vpop.eup %3316 }
0x21ed   :  { %2116 = vrot.lane.b32.xlu1 %v3317_v62, %s3437_s0 }
0x225f   :  { %v2117_v8 = vpop.permute.xlu1 %2116 }
0x2260   :  { %v2119_v9 = vmul.f32 %v3315_v28, %v2117_v8  ;;  %v1614_v8 = vrot.slane %v3906_v56, %v289_v36 }
0x2262   :  { %v2121_v11 = vrot.slane %v2119_v9, 6  ;;  %v1697_v9 = vadd.f32 %v3913_v61, %v1614_v8  ;;  %v2666_v8 = vld [vmem:[#allocation3 + $0x178] sm:$0xff] }
0x2264   :  { %2122 = vrot.lane.b32.xlu0 %v2121_v11, %s3438_s2 }
0x22d6   :  { %v2123_v13 = vpop.permute.xlu0 %2122 }
0x22d7   :  { %3055 = vmatmul.mubr.msk.f32.vlgmr.msra.gmra.mxu0 %vm530_vm3, %v2123_v13 }
0x22d8   :  { %3069 = vmatpush3.msra.mxu0 %v3847_v29  ;;  %3076 = vmatprep.mubr.msk.f32.mxu0 %vm3439_vm11, %v3436_v24 }
0x22d9   :  { %3070 = vmatprep.subr.mxu0 %v3436_v24 }
0x22da   :  { %3071 = vmatpush3.msra.mxu0 %v3851_v40 }
0x22db   :  { %3072 = vmatprep.subr.mxu0 %v3436_v24 }
0x22dc   :  { %3073 = vmatpush3.msra.mxu0 %v3859_v43 }
0x22dd   :  { %3074 = vmatprep.subr.mxu0 %v3436_v24 }
0x22de   :  { %3075 = vmatpush3.msra.mxu0 %v3864_v47 }
0x22df   :  { %3090 = vmatprep.subr.mxu0 %v3436_v24 }
0x2397   :  { %v2192_v15 = vpop.f32.mrf.mxu0 }
0x2398   :  { %v2196_v17 = vadd.f32 %v2192_v15, %v3911_v60 }
0x2399   :  { %v3056_v51 = vpop.f32.mrf.mxu0 }
0x239a   :  { %3318 = vtanh.f32 %v2196_v17  ;;  %v2818_v30 = vmul.f32 -1.442695, %v2196_v17  ;;  %v2825_v51 = vmul.f32 -1.442695, %v1697_v9 }
0x239c   :  { %3320 = vpow2.f32 %v2818_v30 }
0x23a7   :  { %v3319_v27 = vpop.eup %3318 }
0x23a8   :  { %2209 = vrot.lane.b32.xlu1 %v3319_v27, %s3437_s0 }
0x23a9   :  { %v3321_v19 = vpop.eup %3320 }
0x23aa   :  { %v2200_v21 = vadd.f32 1.0, %v3321_v19 }
0x23ac   :  { %3322 = vrcp.f32 %v2200_v21 }
0x23b9   :  { %v3323_v23 = vpop.eup %3322 }
0x23ba   :  { %v2207_v31 = vmul.f32 %v3323_v23, %v2205_v34 }
0x241a   :  { %v2210_v25 = vpop.permute.xlu1 %2209 }
0x241b   :  { %v2212_v26 = vmul.f32 %v3323_v23, %v2210_v25 }
0x241d   :  { %2214 = vrot.lane.b32.xlu0 %v2212_v26, %s3438_s2 }
0x248f   :  { %v2215_v37 = vpop.permute.xlu0 %2214 }
0x2490   :  { %v2217_v39 = vadd.f32 %v2215_v37, %v2207_v31 }
0x2492   :  { %3324 = vtanh.f32 %v2217_v39 }
0x249f   :  { %v3325_v41 = vpop.eup %3324 }
0x24a0   :  { %2220 = vrot.lane.b32.xlu1 %v3325_v41, %s3437_s0 }
0x2512   :  { %v2221_v42 = vpop.permute.xlu1 %2220 }
0x2513   :  { %v2223_v46 = vmul.f32 %v3323_v23, %v2221_v42 }
0x2515   :  { %2225 = vrot.lane.b32.xlu0 %v2223_v46, %s3438_s2 }
0x2587   :  { %v2226_v50 = vpop.permute.xlu0 %2225 }
0x2588   :  { %3066 = vmatmul.mubr.msk.f32.vlgmr.msra.gmra.mxu1 %vm530_vm3, %v2226_v50 }
0x2589   :  { %3080 = vmatpush3.msra.mxu1 %v3847_v29  ;;  %3087 = vmatprep.mubr.msk.f32.mxu1 %vm3439_vm11, %v3436_v24 }
0x258a   :  { %3081 = vmatprep.subr.mxu1 %v3436_v24 }
0x258b   :  { %3082 = vmatpush3.msra.mxu1 %v3851_v40 }
0x258c   :  { %3083 = vmatprep.subr.mxu1 %v3436_v24 }
0x258d   :  { %3084 = vmatpush3.msra.mxu1 %v3859_v43 }
0x258e   :  { %3085 = vmatprep.subr.mxu1 %v3436_v24 }
0x258f   :  { %3086 = vmatpush3.msra.mxu1 %v3864_v47  ;;  %v2311_v47 = vrot.slane %v2217_v39, 6 }
0x2590   :  { %3109 = vmatprep.subr.mxu1 %v3436_v24 }
0x2648   :  { %v2295_v52 = vpop.f32.mrf.mxu1 }
0x2649   :  { %v2300_v53 = vrot.slane %v2295_v52, 6 }
0x264a   :  { %v3067_v29 = vpop.f32.mrf.mxu1 }
0x264b   :  { %v2302_v49 = vadd.f32 %v2300_v53, %v3911_v60 }
0x264d   :  { %3326 = vtanh.f32 %v2302_v49  ;;  %v2820_v40 = vmul.f32 -1.442695, %v2302_v49 }
0x264f   :  { %3328 = vpow2.f32 %v2820_v40 }
0x265a   :  { %v3327_v10 = vpop.eup %3326 }
0x265b   :  { %2315 = vrot.lane.b32.xlu1 %v3327_v10, %s3437_s0 }
0x265c   :  { %v3329_v54 = vpop.eup %3328 }
0x265d   :  { %v2306_v55 = vadd.f32 1.0, %v3329_v54 }
0x265f   :  { %3330 = vrcp.f32 %v2306_v55  ;;  %v2584_v55 = vld [vmem:[#allocation3 + $0x160] sm:$0xff] }
0x266c   :  { %v3331_v43 = vpop.eup %3330 }
0x266d   :  { %v2313_v14 = vmul.f32 %v3331_v43, %v2311_v47  ;;  %v2580_v47 = vld [vmem:[#allocation3 + $0x140] sm:$0xff] }
0x26cd   :  { %v2316_v45 = vpop.permute.xlu1 %2315 }
0x26ce   :  { %v2318_v58 = vmul.f32 %v3331_v43, %v2316_v45  ;;  %v2582_v45 = vld [vmem:[#allocation3 + $0x150] sm:$0xff] }
0x26d0   :  { %2320 = vrot.lane.b32.xlu0 %v2318_v58, %s3438_s2  ;;  %v2581_v58 = vld [vmem:[#allocation3 + $0x148] sm:$0xff] }
0x2742   :  { %v2321_v48 = vpop.permute.xlu0 %2320 }
0x2743   :  { %v2323_v57 = vadd.f32 %v2321_v48, %v2313_v14  ;;  %v2579_v14 = vld [vmem:[#allocation3 + $0x138] sm:$0xff] }
0x2745   :  { %3332 = vtanh.f32 %v2323_v57  ;;  %v2418_v4 = vrot.slane %v2323_v57, 6  ;;  %v2578_v57 = vld [vmem:[#allocation3 + $0x130] sm:$0xff] }
0x2752   :  { %v3333_v59 = vpop.eup %3332 }
0x2753   :  { %2326 = vrot.lane.b32.xlu1 %v3333_v59, %s3437_s0  ;;  %v2577_v59 = vld [vmem:[#allocation3 + $0x128] sm:$0xff] }
0x27c5   :  { %v2327_v63 = vpop.permute.xlu1 %2326 }
0x27c6   :  { %v2329_v33 = vmul.f32 %v3331_v43, %v2327_v63  ;;  %v2583_v43 = vld [vmem:[#allocation3 + $0x158] sm:$0xff]  ;;  %v2680_v63 = vld [vmem:[#allocation3 + $0x1e8] sm:$0xff] }
0x27c8   :  { %v2331_v44 = vrot.slane %v2329_v33, 2  ;;  %v2679_v33 = vld [vmem:[#allocation3 + $0x1e0] sm:$0xff] }
0x27ca   :  { %2332 = vrot.lane.b32.xlu0 %v2331_v44, %s3438_s2  ;;  %v2678_v44 = vld [vmem:[#allocation3 + $0x1d8] sm:$0xff] }
0x283c   :  { %v2333_v0 = vpop.permute.xlu0 %2332 }
0x283d   :  { %3077 = vmatmul.mubr.msk.f32.vlgmr.msra.gmra.mxu0 %vm530_vm3, %v2333_v0  ;;  %v2677_v0 = vld [vmem:[#allocation3 + $0x1d0] sm:$0xff] }
0x283e   :  { %3106 = vmatprep.mubr.msk.f32.mxu0 %vm3439_vm11, %v3436_v24  ;;  %3091 = vmatpush3.msra.mxu0 %v2584_v55 }
0x283f   :  { %3092 = vmatprep.subr.mxu0 %v3436_v24 }
0x2840   :  { %3093 = vmatpush3.msra.mxu0 %v2583_v43 }
0x2841   :  { %3094 = vmatprep.subr.mxu0 %v3436_v24 }
0x2842   :  { %3095 = vmatpush3.msra.mxu0 %v2582_v45 }
0x2843   :  { %3096 = vmatprep.subr.mxu0 %v3436_v24 }
0x2844   :  { %3097 = vmatpush3.msra.mxu0 %v2581_v58 }
0x2845   :  { %3098 = vmatprep.subr.mxu0 %v3436_v24 }
0x2846   :  { %3099 = vmatpush3.msra.mxu0 %v2580_v47 }
0x2847   :  { %3100 = vmatprep.subr.mxu0 %v3436_v24 }
0x2848   :  { %3101 = vmatpush3.msra.mxu0 %v2579_v14 }
0x2849   :  { %3102 = vmatprep.subr.mxu0 %v3436_v24 }
0x284a   :  { %3103 = vmatpush3.msra.mxu0 %v2578_v57 }
0x284b   :  { %3104 = vmatprep.subr.mxu0 %v3436_v24 }
0x284c   :  { %3105 = vmatpush3.msra.mxu0 %v2577_v59 }
0x28fd   :  { %v2402_v1 = vpop.f32.mrf.mxu0 }
0x28fe   :  { %v2407_v3 = vrot.slane %v2402_v1, 4  ;;  %v2676_v1 = vld [vmem:[#allocation3 + $0x1c8] sm:$0xff] }
0x28ff   :  { %v3078_v22 = vpop.f32.mrf.mxu0 }
0x2900   :  { %v2409_v38 = vadd.f32 %v2407_v3, %v3911_v60 }
0x2902   :  { %3334 = vtanh.f32 %v2409_v38  ;;  %v2822_v2 = vmul.f32 -1.442695, %v2409_v38  ;;  %v2675_v38 = vld [vmem:[#allocation3 + $0x1c0] sm:$0xff] }
0x2904   :  { %3336 = vpow2.f32 %v2822_v2  ;;  %v2673_v2 = vld [vmem:[#allocation3 + $0x1b0] sm:$0xff] }
0x290f   :  { %v3335_v20 = vpop.eup %3334 }
0x2910   :  { %2422 = vrot.lane.b32.xlu1 %v3335_v20, %s3437_s0  ;;  %v2674_v20 = vld [vmem:[#allocation3 + $0x1b8] sm:$0xff] }
0x2911   :  { %v3337_v12 = vpop.eup %3336 }
0x2912   :  { %v2413_v16 = vadd.f32 1.0, %v3337_v12  ;;  %v2672_v12 = vld [vmem:[#allocation3 + $0x1a8] sm:$0xff] }
0x2914   :  { %3338 = vrcp.f32 %v2413_v16  ;;  %v2671_v16 = vld [vmem:[#allocation3 + $0x1a0] sm:$0xff] }
0x2921   :  { %v3339_v28 = vpop.eup %3338 }
0x2922   :  { %v2420_v5 = vmul.f32 %v3339_v28, %v2418_v4 }
0x2982   :  { %v2423_v18 = vpop.permute.xlu1 %2422 }
0x2983   :  { %v2425_v32 = vmul.f32 %v3339_v28, %v2423_v18  ;;  %v2669_v18 = vld [vmem:[#allocation3 + $0x190] sm:$0xff] }
0x2985   :  { %2427 = vrot.lane.b32.xlu0 %v2425_v32, %s3438_s2  ;;  %v2668_v32 = vld [vmem:[#allocation3 + $0x188] sm:$0xff] }
0x29f7   :  { %v2428_v6 = vpop.permute.xlu0 %2427 }
0x29f8   :  { %v2430_v7 = vadd.f32 %v2428_v6, %v2420_v5 }
0x29fa   :  { %3340 = vtanh.f32 %v2430_v7  ;;  %v2525_v10 = vrot.slane %v2430_v7, 6 }
0x29fb   :  { %3342 = vtanh.f32 %v1697_v9  ;;  %v2665_v9 = vld [vmem:[#allocation3 + $0x170] sm:$0xff] }
0x29fc   :  { %3344 = vpow2.f32 %v2825_v51 }
0x2a07   :  { %v3341_v62 = vpop.eup %3340 }
0x2a08   :  { %2433 = vrot.lane.b32.xlu1 %v3341_v62, %s3437_s0  ;;  %v3343_v17 = vpop.eup %3342  ;;  %v2667_v62 = vld [vmem:[#allocation3 + $0x180] sm:$0xff] }
0x2a09   :  { %v3345_v27 = vpop.eup %3344 }
0x2a0a   :  { %v2547_v30 = vadd.f32 1.0, %v3345_v27  ;;  %v2828_v27 = vld [vmem:[#allocation3 + $0x1f0] ss:$0 sm:$0xff] }
0x2a0c   :  { %3346 = vrcp.f32 %v2547_v30 }
0x2a19   :  { %v3347_v35 = vpop.eup %3346 }
0x2a1a   :  { %v2551_v61 = vmul.f32 0.0, %v3347_v35 }
0x2a7a   :  { %v2434_v11 = vpop.permute.xlu1 %2433 }
0x2a7b   :  { %v2436_v13 = vmul.f32 %v3339_v28, %v2434_v11  ;;  %v2670_v28 = vld [vmem:[#allocation3 + $0x198] sm:$0xff]  ;;  %v2826_v11 = vld [vmem:[#allocation3 + $0x168] ss:$0 sm:$0xff] }
0x2a7d   :  { %v2438_v15 = vrot.slane %v2436_v13, 4 }
0x2a7f   :  { %2439 = vrot.lane.b32.xlu0 %v2438_v15, %s3438_s2 }
0x2a83   :  { %2553 = vrot.lane.b32.xlu0 %v3343_v17, %s3437_s0 }
0x2af1   :  { %v2440_v19 = vpop.permute.xlu0 %2439 }
0x2af2   :  { %3088 = vmatmul.mubr.msk.f32.vlgmr.msra.gmra.mxu1 %vm530_vm3, %v2440_v19 }
0x2af3   :  { %3141 = vmatprep.mubr.msk.f32.mxu1 %vm3439_vm11, %v3436_v24  ;;  %3110 = vmatpush3.msra.mxu1 %v2680_v63 }
0x2af4   :  { %3111 = vmatprep.subr.mxu1 %v3436_v24 }
0x2af5   :  { %v2554_v36 = vpop.permute.xlu0 %2553  ;;  %3112 = vmatpush3.msra.mxu1 %v2679_v33 }
0x2af6   :  { %v2556_v56 = vmul.f32 %v3347_v35, %v2554_v36  ;;  %3113 = vmatprep.subr.mxu1 %v3436_v24 }
0x2af7   :  { %3114 = vmatpush3.msra.mxu1 %v2678_v44 }
0x2af8   :  { %2558 = vrot.lane.b32.xlu0 %v2556_v56, %s3438_s2  ;;  %3115 = vmatprep.subr.mxu1 %v3436_v24 }
0x2af9   :  { %3116 = vmatpush3.msra.mxu1 %v2677_v0 }
0x2afa   :  { %3117 = vmatprep.subr.mxu1 %v3436_v24 }
0x2afb   :  { %3118 = vmatpush3.msra.mxu1 %v2676_v1 }
0x2afc   :  { %3119 = vmatprep.subr.mxu1 %v3436_v24 }
0x2afd   :  { %3120 = vmatpush3.msra.mxu1 %v2675_v38 }
0x2afe   :  { %3121 = vmatprep.subr.mxu1 %v3436_v24 }
0x2aff   :  { %3122 = vmatpush3.msra.mxu1 %v2674_v20 }
0x2b00   :  { %3123 = vmatprep.subr.mxu1 %v3436_v24 }
0x2b01   :  { %3124 = vmatpush3.msra.mxu1 %v2673_v2 }
0x2b02   :  { %3125 = vmatprep.subr.mxu1 %v3436_v24 }
0x2b03   :  { %3126 = vmatpush3.msra.mxu1 %v2672_v12 }
0x2b04   :  { %3127 = vmatprep.subr.mxu1 %v3436_v24 }
0x2b05   :  { %3128 = vmatpush3.msra.mxu1 %v2671_v16 }
0x2b06   :  { %3129 = vmatprep.subr.mxu1 %v3436_v24 }
0x2b07   :  { %3130 = vmatpush3.msra.mxu1 %v2670_v28 }
0x2b08   :  { %3131 = vmatprep.subr.mxu1 %v3436_v24 }
0x2b09   :  { %3132 = vmatpush3.msra.mxu1 %v2669_v18 }
0x2b0a   :  { %3133 = vmatprep.subr.mxu1 %v3436_v24 }
0x2b0b   :  { %3134 = vmatpush3.msra.mxu1 %v2668_v32 }
0x2b0c   :  { %3135 = vmatprep.subr.mxu1 %v3436_v24 }
0x2b0d   :  { %3136 = vmatpush3.msra.mxu1 %v2667_v62 }
0x2b0e   :  { %3137 = vmatprep.subr.mxu1 %v3436_v24 }
0x2b0f   :  { %3138 = vmatpush3.msra.mxu1 %v2666_v8 }
0x2b10   :  { %3139 = vmatprep.subr.mxu1 %v3436_v24 }
0x2b11   :  { %3140 = vmatpush3.msra.mxu1 %v2665_v9 }
0x2b6a   :  { %v2559_v21 = vpop.permute.xlu0 %2558 }
0x2b6b   :  { %v2561_v23 = vadd.f32 %v2559_v21, %v2551_v61 }
0x2b6d   :  { %3348 = vtanh.f32 %v2561_v23 }
0x2b7a   :  { %v3349_v25 = vpop.eup %3348 }
0x2b7b   :  { %2564 = vrot.lane.b32.xlu0 %v3349_v25, %s3437_s0 }
0x2bb2   :  { %v2509_v26 = vpop.f32.mrf.mxu1 }
0x2bb3   :  { %v2514_v34 = vrot.slane %v2509_v26, 2 }
0x2bb4   :  { %v3089_v31 = vpop.f32.mrf.mxu1 }
0x2bb5   :  { %v2516_v37 = vadd.f32 %v2514_v34, %v3911_v60 }
0x2bb7   :  { %3350 = vtanh.f32 %v2516_v37  ;;  %v2824_v46 = vmul.f32 -1.442695, %v2516_v37 }
0x2bb9   :  { %3352 = vpow2.f32 %v2824_v46 }
0x2bc4   :  { %v3351_v39 = vpop.eup %3350 }
0x2bc5   :  { %2529 = vrot.lane.b32.xlu1 %v3351_v39, %s3437_s0 }
0x2bc6   :  { %v3353_v50 = vpop.eup %3352 }
0x2bc7   :  { %v2520_v52 = vadd.f32 1.0, %v3353_v50 }
0x2bc9   :  { %3354 = vrcp.f32 %v2520_v52 }
0x2bd6   :  { %v3355_v53 = vpop.eup %3354 }
0x2bd7   :  { %v2527_v60 = vmul.f32 %v3355_v53, %v2525_v10 }
0x2bed   :  { %v2565_v41 = vpop.permute.xlu0 %2564 }
0x2bee   :  { %v2567_v42 = vmul.f32 %v3347_v35, %v2565_v41 }
0x2bf0   :  { %2573 = vrot.lane.b32.xlu0 %v2567_v42, %s3437_s0 }
0x2c37   :  { %v2530_v29 = vpop.permute.xlu1 %2529 }
0x2c38   :  { %v2532_v49 = vmul.f32 %v3355_v53, %v2530_v29 }
0x2c3a   :  { %2534 = vrot.lane.b32.xlu1 %v2532_v49, %s3438_s2 }
0x2c62   :  { %v2574_v4 = vpop.permute.xlu0 %2573 }
0x2cac   :  { %v2535_v40 = vpop.permute.xlu1 %2534 }
0x2cad   :  { %v2537_v54 = vadd.f32 %v2535_v40, %v2527_v60 }
0x2caf   :  { %3356 = vtanh.f32 %v2537_v54 }
0x2cbc   :  { %v3357_v48 = vpop.eup %3356 }
0x2cbd   :  { %2540 = vrot.lane.b32.xlu1 %v3357_v48, %s3437_s0 }
0x2d2f   :  { %v2541_v3 = vpop.permute.xlu1 %2540 }
0x2d30   :  { %v2543_v22 = vmul.f32 %v3355_v53, %v2541_v3 }
0x2d32   :  { %2569 = vrot.lane.b32.xlu1 %v2543_v22, %s3438_s2 }
0x2da4   :  { %v2570_v5 = vpop.permute.xlu1 %2569 }
0x2da5   :  { %v2576_v6 = vsel %vm530_vm3, %v2570_v5, %v2574_v4 }
0x2da6   :  { %v2591_v7 = vrot.slane %v2576_v6, 6 }
0x2da8   :  { %3107 = vmatmul.mubr.msk.f32.vlgmr.msra.gmra.mxu0 %vm386_vm4, %v2591_v7 }
0x2e68   :  { %v2660_v13 = vpop.f32.mrf.mxu0 }
0x2e69   :  { %v2661_v15 = vadd.f32 %v2826_v11, %v2660_v13 }
0x2e6a   :  { %v3108_v17 = vpop.f32.mrf.mxu0 }
0x2e6b   :  { %v2664_v51 = vmax.f32 %v2661_v15, 0.0 }
0x2e6d   :  { %3142 = vmatmul.mubr.f32.vlgmr.msra.gmra.mxu1 %v2664_v51 }
0x2f2d   :  { %v2752_v30 = vpop.f32.mrf.mxu1 }
0x2f2e   :  { %v2753_v19 = vadd.f32 %v2828_v27, %v2752_v30 }
0x2f2f   :  { %v3143_v35 = vpop.f32.mrf.mxu1 }
0x2f30   :  { %v2829_v36 = vmul.f32 -1.442695, %v2753_v19 }
0x2f32   :  { %3358 = vpow2.f32 %v2829_v36 }
0x2f3f   :  { %v3359_v56 = vpop.eup %3358 }
0x2f40   :  { %v2759_v61 = vadd.f32 1.0, %v3359_v56 }
0x2f42   :  { %3360 = vrcp.f32 %v2759_v61 }
0x2f4f   :  { %v3361_v24 = vpop.eup %3360 }
0x2f50   :  { %2763 = vst.msk [vmem:[#allocation8] sm:$0x3] %vm2762_vm13, %v3361_v24 }
0x2f51   :  { %3413 = shalt.err (!%p3410_p0)
}
0x2f52   :  { %2773 = dma.vmem_to_hbm [thread:$0]  %s2771_s30, 32, %s4056_s3, [#allocation5]  }
0x2f53   :  { %3426 = dma.done.wait [#allocation5], 32  }
0x2f54   :  { %3427 = vsyncadd [#allocation5], 4294967264 }
0x2f55   :  { %2777 = vsyncpa [#allocation4], 1 }
0x2f56   :  { %2778 = vsyncpa [#allocation7], 1 }
0x2f57   :  { %2779 = vsyncpa [#allocation5], 1 }

</bundles_post_ra>
